<compile_context>
chip_gen: v5e
topology: v5e:2x2
jax: 0.10.0
libtpu: 0.0.40
codegen_flags: <defaults>
</compile_context>

<pallas_src>
import functools

import numpy as np
import jax
import jax.numpy as jnp
from jax.experimental import pallas as pl
from jax.experimental.pallas import tpu as pltpu


_NEG_INF = -1e30
_NT_DIMS = (((1,), (1,)), ((), ()))   # contract last dims of both operands (A @ B^T)


# ----------------------------------------------------------------------------
# Fused kernel: one invocation == the whole autoregressive rollout.
# ----------------------------------------------------------------------------
def _fused_local_attn_kernel(x_ref, cmat_ref, mask_ref,
                             wqkv_ref, bqkv_ref,
                             wosa_ref, bosa_ref, w2_ref, b2_ref,
                             gamma_ref, beta_ref,
                             out_ref, *, n_obs, n_steps, e_pad):
    f32 = jnp.float32
    bf16 = jnp.bfloat16

    # Load every weight / table once; reused by all unrolled steps.
    wqkv = wqkv_ref[...]          # (3*E_pad, H)  bf16
    bqkv = bqkv_ref[...]          # (3*E_pad, N)  f32
    cmat = cmat_ref[...]          # (N, N)        bf16 one-hot center-gather
    mask = mask_ref[...]          # (N, N)        f32 additive neighbour mask
    wosa = wosa_ref[...]          # (H, E_pad)    bf16
    bosa = bosa_ref[...]          # (H, N)        f32 (pre-broadcast)
    w2 = w2_ref[...]              # (H, H)        bf16
    b2 = b2_ref[...]              # (H, N)        f32 (pre-broadcast)
    gamma = gamma_ref[...]        # (H, N)        f32 (pre-broadcast)
    beta = beta_ref[...]          # (H, N)        f32 (pre-broadcast)

    h = jnp.zeros_like(b2)        # placeholder; t=0 always takes the x path

    # n_steps is a compile-time constant (T = n_obs + n_pred - 1), so this is a
    # static unroll: every load/store index below is static.
    for t in range(n_steps):
        # Observation phase reads x[t]; prediction phase feeds back the
        # previous step's output (held in f32).
        h_in = x_ref[t] if t < n_obs else h                               # (H, N) f32
        h_bf = h_in.astype(bf16)

        # Fused q/k/v projection (labels, biases and 1/sqrt(E) query scale are
        # pre-folded into the bias slab).  bf16 operands, f32 accumulation.
        qkv = jnp.dot(wqkv, h_bf, preferred_element_type=f32) + bqkv      # (3E_pad, N)
        q = qkv[0 * e_pad:1 * e_pad]                                      # (E_pad, N)
        k = qkv[1 * e_pad:2 * e_pad]
        v = qkv[2 * e_pad:3 * e_pad]
        q_bf = q.astype(bf16)
        k_bf = k.astype(bf16)
        v_bf = v.astype(bf16)

        # Center-query gather (neighbour slot 4) as a one-hot matmul:
        # q_c[i, :] = q[:, c(i)].
        q_c = jax.lax.dot_general(cmat, q_bf, _NT_DIMS,
                                  preferred_element_type=f32)             # (N, E_pad)

        # Dense masked attention over the 9 distinct same-batch neighbours.
        s = jnp.dot(q_c.astype(bf16), k_bf,
                    preferred_element_type=f32) + mask                    # (Nq, Nk) f32
        s_max = jnp.max(s, axis=-1, keepdims=True)
        es = jnp.exp(s - s_max)
        denom = jnp.sum(es, axis=-1, keepdims=True)
        p = es * pl.reciprocal(denom, approx=True)                        # (Nq, Nk) f32

        o = jax.lax.dot_general(v_bf, p.astype(bf16), _NT_DIMS,
                                preferred_element_type=f32)               # (E_pad, N)

        # out_proj folded into fc_sa, residual, fc2, LayerNorm (eps = 1e-5).
        sa = jnp.dot(wosa, o.astype(bf16), preferred_element_type=f32) + bosa
        new_h = h_in + sa                                                 # (H, N) f32
        h2 = jnp.dot(w2, new_h.astype(bf16),
                     preferred_element_type=f32) + b2                     # (H, N) f32

        mu = jnp.mean(h2, axis=0, keepdims=True)                          # (1, N)
        d = h2 - mu
        var = jnp.mean(d * d, axis=0, keepdims=True)
        out = d * jax.lax.rsqrt(var + 1e-5) * gamma + beta                # (H, N) f32

        out_ref[t] = out
        h = out


def local_attention_forward(x, kp, *, n_obs, n_pred):
    """x: (n_obs, N, H) float32  ->  (n_obs + n_pred - 1, N, H) float32."""
    _, N, H = x.shape
    E_pad = kp["w_osa"].shape[1]
    T = n_obs + n_pred - 1

    x_t = jnp.transpose(x, (0, 2, 1))                     # (n_obs, H, N) lane-dense

    vmem = lambda: pl.BlockSpec(memory_space=pltpu.MemorySpace.VMEM)

    out_t = pl.pallas_call(
        functools.partial(_fused_local_attn_kernel,
                          n_obs=n_obs, n_steps=T, e_pad=E_pad),
        out_shape=jax.ShapeDtypeStruct((T, H, N), jnp.float32),
        in_specs=[vmem() for _ in range(11)],
        out_specs=vmem(),
    )(x_t, kp["cmat_t"], kp["mask"],
      kp["w_qkv"], kp["b_qkv"],
      kp["w_osa"], kp["b_osa"], kp["w2"], kp["b2"], kp["gamma"], kp["beta"])

    return jnp.transpose(out_t, (0, 2, 1))                # (T, N, H)


# ----------------------------------------------------------------------------
# Static tables (identical to the torch __init__) and parameter preparation.
# ----------------------------------------------------------------------------
def build_neighbor_tables(n_patch):
    S = int(n_patch ** 0.5)
    idx = np.arange(n_patch)
    rows = idx // S
    cols = idx % S
    noff = np.array([[-1, -1], [-1, 0], [-1, 1],
                     [0, -1], [0, 0], [0, 1],
                     [1, -1], [1, 0], [1, 1]])
    nr = rows[:, None] + noff[:, 0][None, :]
    nc = cols[:, None] + noff[:, 1][None, :]
    nr = nr.reshape(S, S, 9)
    nr[0, :, :] += 1
    nr[-1, :, :] -= 1
    nr = nr.reshape(n_patch, 9)
    nc = nc.reshape(S, S, 9)
    nc[:, 0, :] += 1
    nc[:, -1, :] -= 1
    nc = nc.reshape(n_patch, 9)
    flat = (nr * S + nc).astype(np.int32)                 # (P, 9) flat patch ids

    step = 1.0 / S
    lab = np.arange(0.0, 1.0, step)
    plr = np.repeat(lab[:, None], S, axis=1)
    plc = np.repeat(lab[None, :], S, axis=0)
    patch_label = np.stack([plr, plc], axis=0).reshape(2, -1).T.astype(np.float32)
    return flat, patch_label


def init_params(key, H=48, E=50):
    ks = jax.random.split(key, 8)

    def w(k, shape, s=0.05):
        return (s * jax.random.normal(k, shape)).astype(jnp.float32)

    in_w = w(ks[0], (3 * E, E))                           # torch MHA in_proj_weight
    in_b = w(ks[1], (3 * E,))
    return dict(
        wq=in_w[:E], wk=in_w[E:2 * E], wv=in_w[2 * E:],
        bq=in_b[:E], bk=in_b[E:2 * E], bv=in_b[2 * E:],
        wo=w(ks[2], (E, E)), bo=w(ks[3], (E,)),           # out_proj (out, in)
        wsa=w(ks[4], (H, E)), bsa=w(ks[5], (H,)),         # fc_sa: 50 -> 48
        w2=w(ks[6], (H, H)), b2=w(ks[7], (H,)),           # fc2: 48 -> 48
        gamma=jnp.ones((H,), jnp.float32), beta=jnp.zeros((H,), jnp.float32),
    )


def _pad_rows(a, n_rows):
    pad = n_rows - a.shape[0]
    if pad == 0:
        return a
    return jnp.concatenate(
        [a, jnp.zeros((pad,) + a.shape[1:], a.dtype)], axis=0)


def prepare_kernel_params(p, lab_nodes, nbr_full, H, E):
    """Fold labels/scale/out_proj into kernel-ready, lane-dense parameter slabs.

    MXU operands (weights, one-hot gather table) are stored in bf16; bias /
    normalization slabs stay f32 and are pre-broadcast to (H, N).
    """
    N = lab_nodes.shape[0]
    E_pad = ((E + 7) // 8) * 8                            # 50 -> 56 (sublane aligned)
    scale = 1.0 / float(np.sqrt(E))
    lab_t = jnp.asarray(lab_nodes).T                      # (2, N)

    # Per-node bias slabs: label columns of in_proj + in_proj bias (+ q scale).
    qb = (jnp.dot(p["wq"][:, H:], lab_t) + p["bq"][:, None]) * scale   # (E, N)
    kb = jnp.dot(p["wk"][:, H:], lab_t) + p["bk"][:, None]
    vb = jnp.dot(p["wv"][:, H:], lab_t) + p["bv"][:, None]

    # Fused, zero-padded QKV weight / bias (padded rows stay exactly zero so
    # the padded E_pad channels never contribute).
    w_qkv = jnp.concatenate(
        [_pad_rows(p["wq"][:, :H] * scale, E_pad),
         _pad_rows(p["wk"][:, :H], E_pad),
         _pad_rows(p["wv"][:, :H], E_pad)], axis=0).astype(jnp.bfloat16)   # (3E_pad, H)
    b_qkv = jnp.concatenate(
        [_pad_rows(qb, E_pad), _pad_rows(kb, E_pad), _pad_rows(vb, E_pad)],
        axis=0).astype(jnp.float32)                                        # (3E_pad, N)

    # out_proj folded into fc_sa; zero-pad the E axis to E_pad columns.
    w_osa = jnp.dot(p["wsa"], p["wo"])                    # (H, E)
    w_osa = jnp.concatenate(
        [w_osa, jnp.zeros((H, E_pad - E), jnp.float32)], axis=1).astype(jnp.bfloat16)
    b_osa = jnp.broadcast_to(
        (jnp.dot(p["wsa"], p["bo"]) + p["bsa"])[:, None], (H, N)).astype(jnp.float32)

    nbr_full = np.asarray(nbr_full)
    cmat_t = np.zeros((N, N), np.float32)                 # one-hot center gather
    cmat_t[np.arange(N), nbr_full[:, 4]] = 1.0
    mask = np.full((N, N), _NEG_INF, np.float32)          # additive neighbour mask
    mask[np.arange(N)[:, None], nbr_full] = 0.0

    return dict(
        w_qkv=w_qkv, b_qkv=b_qkv,
        w_osa=w_osa, b_osa=b_osa,
        w2=p["w2"].astype(jnp.bfloat16),
        b2=jnp.broadcast_to(p["b2"][:, None], (H, N)).astype(jnp.float32),
        gamma=jnp.broadcast_to(p["gamma"][:, None], (H, N)).astype(jnp.float32),
        beta=jnp.broadcast_to(p["beta"][:, None], (H, N)).astype(jnp.float32),
        cmat_t=jnp.asarray(cmat_t, jnp.bfloat16),         # 0/1 exact in bf16
        mask=jnp.asarray(mask),
    )


# ----------------------------------------------------------------------------
# Pure-JAX reference (mirrors the torch module step by step) for validation.
# ----------------------------------------------------------------------------
def ref_forward(x, p, nbr_full, lab_nodes, n_obs, n_pred):
    E = p["wq"].shape[0]
    scale = 1.0 / float(np.sqrt(E))
    nbr = jnp.asarray(nbr_full)
    lab = jnp.asarray(lab_nodes)
    c_idx = nbr[:, 4]

    def step(h):
        xe = jnp.concatenate([h, lab], axis=-1)           # (N, E)
        q = xe @ p["wq"].T + p["bq"]
        k = xe @ p["wk"].T + p["bk"]
        v = xe @ p["wv"].T + p["bv"]
        qc = q[c_idx] * scale                             # (N, E)
        kg = k[nbr]                                       # (N, 9, E)
        vg = v[nbr]
        s = jnp.einsum("ne,nje->nj", qc, kg)
        w = jax.nn.softmax(s, axis=-1)
        att = jnp.einsum("nj,nje->ne", w, vg)
        o = att @ p["wo"].T + p["bo"]
        sa = o @ p["wsa"].T + p["bsa"]
        nh = h + sa
        h2 = nh @ p["w2"].T + p["b2"]
        mu = h2.mean(axis=-1, keepdims=True)
        var = ((h2 - mu) ** 2).mean(axis=-1, keepdims=True)
        return p["gamma"] * (h2 - mu) / jnp.sqrt(var + 1e-5) + p["beta"]

    outs = []
    for t in range(n_obs):
        outs.append(step(x[t]))
    for _ in range(n_pred - 1):                           # final torch iter never stored
        outs.append(step(outs[-1]))
    return jnp.stack(outs, axis=0)


if __name__ == "__main__":
    # Small, module-consistent shapes: 8x8 patch grid, batch 2, hidden 48.
    H = 48
    E = H + 2
    P = 64            # n_patch (8 x 8)
    B = 2             # batch (deduced from x.shape[1] // n_patch)
    N = B * P         # 128 nodes == one full lane row
    N_OBS = 3
    N_PRED = 4
    T = N_OBS + N_PRED - 1

    nbr_flat, patch_label = build_neighbor_tables(P)
    nbr_full = (np.arange(B, dtype=np.int32)[:, None, None] * P
                + nbr_flat[None, :, :]).reshape(N, 9).astype(np.int32)
    lab_nodes = np.tile(patch_label, (B, 1))              # (N, 2)

    params = init_params(jax.random.PRNGKey(0), H=H, E=E)
    kp = prepare_kernel_params(params, lab_nodes, nbr_full, H, E)

    x = 0.1 * jax.random.normal(jax.random.PRNGKey(0), (N_OBS, N, H),
                                dtype=jnp.float32)

    fwd = jax.jit(functools.partial(local_attention_forward,
                                    n_obs=N_OBS, n_pred=N_PRED))
    out = fwd(x, kp)
    jax.block_until_ready(out)

    assert out.shape == (T, N, H)
    assert bool(jnp.all(jnp.isfinite(out)))

    ref = ref_forward(x, params, nbr_full, lab_nodes, N_OBS, N_PRED)
    # bf16 MXU operands + approximate reciprocal: per-step deviation is ~1e-3
    # and can compound slightly over the T-step LayerNorm'd recurrence.
    err = float(jnp.max(jnp.abs(out - ref)))
    rms = float(jnp.sqrt(jnp.mean((out - ref) ** 2)))
    assert err < 3e-2, f"kernel vs reference mismatch: max abs err = {err}"
    assert rms < 1e-2, f"kernel vs reference mismatch: rms err = {rms}"

    # TODO(synk): on v7x the two TensorCores could each take one batch (64
    # nodes) via pl.core_map / a core_parallel grid axis; kept single-core so
    # the full N = B*P = 128 node axis stays fully lane-dense (per the review,
    # only worth it for large T or B).
    # TODO(synk): attn_weights_list is computed but never returned by the torch
    # module, so attention weights are intentionally not materialized.
    print("KERNEL_OK")
</pallas_src>

<mosaic_0001>
module attributes {stable_mosaic.version = 11 : i64} {
  func.func @_fused_local_attn_kernel(%arg0: memref<3x48x128xf32, #tpu.memory_space<vmem>>, %arg1: memref<128x128xbf16, #tpu.memory_space<vmem>>, %arg2: memref<128x128xf32, #tpu.memory_space<vmem>>, %arg3: memref<168x48xbf16, #tpu.memory_space<vmem>>, %arg4: memref<168x128xf32, #tpu.memory_space<vmem>>, %arg5: memref<48x56xbf16, #tpu.memory_space<vmem>>, %arg6: memref<48x128xf32, #tpu.memory_space<vmem>>, %arg7: memref<48x48xbf16, #tpu.memory_space<vmem>>, %arg8: memref<48x128xf32, #tpu.memory_space<vmem>>, %arg9: memref<48x128xf32, #tpu.memory_space<vmem>>, %arg10: memref<48x128xf32, #tpu.memory_space<vmem>>, %arg11: memref<6x48x128xf32, #tpu.memory_space<vmem>>) attributes {dimension_semantics = [], scalar_prefetch = 0 : i64, scratch_operands = 0 : i64, tpu.core_type = #tpu.core_type<tc>} {
    %c0 = arith.constant 0 : index
    %c0_0 = arith.constant 0 : index
    %0 = vector.load %arg3[%c0, %c0_0] : memref<168x48xbf16, #tpu.memory_space<vmem>>, vector<168x48xbf16>
    %c0_1 = arith.constant 0 : index
    %c0_2 = arith.constant 0 : index
    %1 = vector.load %arg4[%c0_1, %c0_2] : memref<168x128xf32, #tpu.memory_space<vmem>>, vector<168x128xf32>
    %c0_3 = arith.constant 0 : index
    %c0_4 = arith.constant 0 : index
    %2 = vector.load %arg1[%c0_3, %c0_4] : memref<128x128xbf16, #tpu.memory_space<vmem>>, vector<128x128xbf16>
    %c0_5 = arith.constant 0 : index
    %c0_6 = arith.constant 0 : index
    %3 = vector.load %arg2[%c0_5, %c0_6] : memref<128x128xf32, #tpu.memory_space<vmem>>, vector<128x128xf32>
    %c0_7 = arith.constant 0 : index
    %c0_8 = arith.constant 0 : index
    %4 = vector.load %arg5[%c0_7, %c0_8] : memref<48x56xbf16, #tpu.memory_space<vmem>>, vector<48x56xbf16>
    %c0_9 = arith.constant 0 : index
    %c0_10 = arith.constant 0 : index
    %5 = vector.load %arg6[%c0_9, %c0_10] : memref<48x128xf32, #tpu.memory_space<vmem>>, vector<48x128xf32>
    %c0_11 = arith.constant 0 : index
    %c0_12 = arith.constant 0 : index
    %6 = vector.load %arg7[%c0_11, %c0_12] : memref<48x48xbf16, #tpu.memory_space<vmem>>, vector<48x48xbf16>
    %c0_13 = arith.constant 0 : index
    %c0_14 = arith.constant 0 : index
    %7 = vector.load %arg8[%c0_13, %c0_14] : memref<48x128xf32, #tpu.memory_space<vmem>>, vector<48x128xf32>
    %c0_15 = arith.constant 0 : index
    %c0_16 = arith.constant 0 : index
    %8 = vector.load %arg9[%c0_15, %c0_16] : memref<48x128xf32, #tpu.memory_space<vmem>>, vector<48x128xf32>
    %c0_17 = arith.constant 0 : index
    %c0_18 = arith.constant 0 : index
    %9 = vector.load %arg10[%c0_17, %c0_18] : memref<48x128xf32, #tpu.memory_space<vmem>>, vector<48x128xf32>
    %c0_19 = arith.constant 0 : index
    %c0_20 = arith.constant 0 : index
    %c0_21 = arith.constant 0 : index
    %10 = vector.load %arg0[%c0_19, %c0_20, %c0_21] : memref<3x48x128xf32, #tpu.memory_space<vmem>>, vector<1x48x128xf32>
    %11 = vector.shape_cast %10 : vector<1x48x128xf32> to vector<48x128xf32>
    %12 = arith.truncf %11 : vector<48x128xf32> to vector<48x128xbf16>
    %cst = arith.constant dense<0.000000e+00> : vector<168x128xf32>
    %13 = tpu.matmul %0, %12, %cst {dimension_numbers = #tpu.dot_dimension_numbers<[1], [0], [0], [1], [0, 0, 1, 1], [], []>} : vector<168x48xbf16>, vector<48x128xbf16>, vector<168x128xf32> -> vector<168x128xf32>
    %14 = arith.addf %13, %1 : vector<168x128xf32>
    %15 = vector.extract_strided_slice %14 {offsets = [0, 0], sizes = [56, 128], strides = [1, 1]} : vector<168x128xf32> to vector<56x128xf32>
    %16 = vector.extract_strided_slice %14 {offsets = [56, 0], sizes = [56, 128], strides = [1, 1]} : vector<168x128xf32> to vector<56x128xf32>
    %17 = vector.extract_strided_slice %14 {offsets = [112, 0], sizes = [56, 128], strides = [1, 1]} : vector<168x128xf32> to vector<56x128xf32>
    %18 = arith.truncf %15 : vector<56x128xf32> to vector<56x128xbf16>
    %19 = arith.truncf %16 : vector<56x128xf32> to vector<56x128xbf16>
    %20 = arith.truncf %17 : vector<56x128xf32> to vector<56x128xbf16>
    %cst_22 = arith.constant dense<0.000000e+00> : vector<128x56xf32>
    %21 = tpu.matmul %2, %18, %cst_22 {dimension_numbers = #tpu.dot_dimension_numbers<[1], [1], [0], [0], [0, 0, 1, 0], [], []>} : vector<128x128xbf16>, vector<56x128xbf16>, vector<128x56xf32> -> vector<128x56xf32>
    %22 = arith.truncf %21 : vector<128x56xf32> to vector<128x56xbf16>
    %cst_23 = arith.constant dense<0.000000e+00> : vector<128x128xf32>
    %23 = tpu.matmul %22, %19, %cst_23 {dimension_numbers = #tpu.dot_dimension_numbers<[1], [0], [0], [1], [0, 0, 1, 1], [], []>} : vector<128x56xbf16>, vector<56x128xbf16>, vector<128x128xf32> -> vector<128x128xf32>
    %24 = arith.addf %23, %3 : vector<128x128xf32>
    %cst_24 = arith.constant dense<0xFF800000> : vector<128xf32>
    %25 = vector.multi_reduction <maximumf>, %24, %cst_24 [1] : vector<128x128xf32> to vector<128xf32>
    %26 = vector.shape_cast %25 : vector<128xf32> to vector<128x1xf32>
    %27 = vector.broadcast %26 : vector<128x1xf32> to vector<128x128xf32>
    %28 = arith.subf %24, %27 : vector<128x128xf32>
    %29 = math.exp %28 : vector<128x128xf32>
    %cst_25 = arith.constant dense<0.000000e+00> : vector<128xf32>
    %30 = vector.multi_reduction <add>, %29, %cst_25 [1] : vector<128x128xf32> to vector<128xf32>
    %31 = vector.shape_cast %30 : vector<128xf32> to vector<128x1xf32>
    %32 = tpu.reciprocal %31 {approx = true} : vector<128x1xf32> -> vector<128x1xf32>
    %33 = vector.broadcast %32 : vector<128x1xf32> to vector<128x128xf32>
    %34 = arith.mulf %29, %33 : vector<128x128xf32>
    %35 = arith.truncf %34 : vector<128x128xf32> to vector<128x128xbf16>
    %cst_26 = arith.constant dense<0.000000e+00> : vector<56x128xf32>
    %36 = tpu.matmul %20, %35, %cst_26 {dimension_numbers = #tpu.dot_dimension_numbers<[1], [1], [0], [0], [0, 0, 1, 0], [], []>} : vector<56x128xbf16>, vector<128x128xbf16>, vector<56x128xf32> -> vector<56x128xf32>
    %37 = arith.truncf %36 : vector<56x128xf32> to vector<56x128xbf16>
    %cst_27 = arith.constant dense<0.000000e+00> : vector<48x128xf32>
    %38 = tpu.matmul %4, %37, %cst_27 {dimension_numbers = #tpu.dot_dimension_numbers<[1], [0], [0], [1], [0, 0, 1, 1], [], []>} : vector<48x56xbf16>, vector<56x128xbf16>, vector<48x128xf32> -> vector<48x128xf32>
    %39 = arith.addf %38, %5 : vector<48x128xf32>
    %40 = arith.addf %11, %39 : vector<48x128xf32>
    %41 = arith.truncf %40 : vector<48x128xf32> to vector<48x128xbf16>
    %cst_28 = arith.constant dense<0.000000e+00> : vector<48x128xf32>
    %42 = tpu.matmul %6, %41, %cst_28 {dimension_numbers = #tpu.dot_dimension_numbers<[1], [0], [0], [1], [0, 0, 1, 1], [], []>} : vector<48x48xbf16>, vector<48x128xbf16>, vector<48x128xf32> -> vector<48x128xf32>
    %43 = arith.addf %42, %7 : vector<48x128xf32>
    %cst_29 = arith.constant dense<0.000000e+00> : vector<128xf32>
    %44 = vector.multi_reduction <add>, %43, %cst_29 [0] : vector<48x128xf32> to vector<128xf32>
    %45 = vector.shape_cast %44 : vector<128xf32> to vector<1x128xf32>
    %cst_30 = arith.constant 4.800000e+01 : f32
    %46 = vector.broadcast %cst_30 : f32 to vector<1x128xf32>
    %47 = arith.divf %45, %46 : vector<1x128xf32>
    %48 = vector.broadcast %47 : vector<1x128xf32> to vector<48x128xf32>
    %49 = arith.subf %43, %48 : vector<48x128xf32>
    %50 = arith.mulf %49, %49 : vector<48x128xf32>
    %cst_31 = arith.constant dense<0.000000e+00> : vector<128xf32>
    %51 = vector.multi_reduction <add>, %50, %cst_31 [0] : vector<48x128xf32> to vector<128xf32>
    %52 = vector.shape_cast %51 : vector<128xf32> to vector<1x128xf32>
    %cst_32 = arith.constant 4.800000e+01 : f32
    %53 = vector.broadcast %cst_32 : f32 to vector<1x128xf32>
    %54 = arith.divf %52, %53 : vector<1x128xf32>
    %cst_33 = arith.constant 9.99999974E-6 : f32
    %55 = vector.broadcast %cst_33 : f32 to vector<1x128xf32>
    %56 = arith.addf %54, %55 : vector<1x128xf32>
    %57 = math.rsqrt %56 : vector<1x128xf32>
    %58 = vector.broadcast %57 : vector<1x128xf32> to vector<48x128xf32>
    %59 = arith.mulf %49, %58 : vector<48x128xf32>
    %60 = arith.mulf %59, %8 : vector<48x128xf32>
    %61 = arith.addf %60, %9 : vector<48x128xf32>
    %c0_34 = arith.constant 0 : index
    %c0_35 = arith.constant 0 : index
    %c0_36 = arith.constant 0 : index
    %62 = vector.load %arg11[%c0_34, %c0_35, %c0_36] : memref<6x48x128xf32, #tpu.memory_space<vmem>>, vector<1x48x128xf32>
    %63 = vector.shape_cast %62 : vector<1x48x128xf32> to vector<48x128xf32>
    %64 = vector.shape_cast %61 : vector<48x128xf32> to vector<1x48x128xf32>
    tpu.vector_store %arg11[%c0_34, %c0_35, %c0_36], %64 {strides = array<i32>} : memref<6x48x128xf32, #tpu.memory_space<vmem>>, vector<1x48x128xf32>,
    %c1 = arith.constant 1 : index
    %c0_37 = arith.constant 0 : index
    %c0_38 = arith.constant 0 : index
    %65 = vector.load %arg0[%c1, %c0_37, %c0_38] : memref<3x48x128xf32, #tpu.memory_space<vmem>>, vector<1x48x128xf32>
    %66 = vector.shape_cast %65 : vector<1x48x128xf32> to vector<48x128xf32>
    %67 = arith.truncf %66 : vector<48x128xf32> to vector<48x128xbf16>
    %cst_39 = arith.constant dense<0.000000e+00> : vector<168x128xf32>
    %68 = tpu.matmul %0, %67, %cst_39 {dimension_numbers = #tpu.dot_dimension_numbers<[1], [0], [0], [1], [0, 0, 1, 1], [], []>} : vector<168x48xbf16>, vector<48x128xbf16>, vector<168x128xf32> -> vector<168x128xf32>
    %69 = arith.addf %68, %1 : vector<168x128xf32>
    %70 = vector.extract_strided_slice %69 {offsets = [0, 0], sizes = [56, 128], strides = [1, 1]} : vector<168x128xf32> to vector<56x128xf32>
    %71 = vector.extract_strided_slice %69 {offsets = [56, 0], sizes = [56, 128], strides = [1, 1]} : vector<168x128xf32> to vector<56x128xf32>
    %72 = vector.extract_strided_slice %69 {offsets = [112, 0], sizes = [56, 128], strides = [1, 1]} : vector<168x128xf32> to vector<56x128xf32>
    %73 = arith.truncf %70 : vector<56x128xf32> to vector<56x128xbf16>
    %74 = arith.truncf %71 : vector<56x128xf32> to vector<56x128xbf16>
    %75 = arith.truncf %72 : vector<56x128xf32> to vector<56x128xbf16>
    %cst_40 = arith.constant dense<0.000000e+00> : vector<128x56xf32>
    %76 = tpu.matmul %2, %73, %cst_40 {dimension_numbers = #tpu.dot_dimension_numbers<[1], [1], [0], [0], [0, 0, 1, 0], [], []>} : vector<128x128xbf16>, vector<56x128xbf16>, vector<128x56xf32> -> vector<128x56xf32>
    %77 = arith.truncf %76 : vector<128x56xf32> to vector<128x56xbf16>
    %cst_41 = arith.constant dense<0.000000e+00> : vector<128x128xf32>
    %78 = tpu.matmul %77, %74, %cst_41 {dimension_numbers = #tpu.dot_dimension_numbers<[1], [0], [0], [1], [0, 0, 1, 1], [], []>} : vector<128x56xbf16>, vector<56x128xbf16>, vector<128x128xf32> -> vector<128x128xf32>
    %79 = arith.addf %78, %3 : vector<128x128xf32>
    %cst_42 = arith.constant dense<0xFF800000> : vector<128xf32>
    %80 = vector.multi_reduction <maximumf>, %79, %cst_42 [1] : vector<128x128xf32> to vector<128xf32>
    %81 = vector.shape_cast %80 : vector<128xf32> to vector<128x1xf32>
    %82 = vector.broadcast %81 : vector<128x1xf32> to vector<128x128xf32>
    %83 = arith.subf %79, %82 : vector<128x128xf32>
    %84 = math.exp %83 : vector<128x128xf32>
    %cst_43 = arith.constant dense<0.000000e+00> : vector<128xf32>
    %85 = vector.multi_reduction <add>, %84, %cst_43 [1] : vector<128x128xf32> to vector<128xf32>
    %86 = vector.shape_cast %85 : vector<128xf32> to vector<128x1xf32>
    %87 = tpu.reciprocal %86 {approx = true} : vector<128x1xf32> -> vector<128x1xf32>
    %88 = vector.broadcast %87 : vector<128x1xf32> to vector<128x128xf32>
    %89 = arith.mulf %84, %88 : vector<128x128xf32>
    %90 = arith.truncf %89 : vector<128x128xf32> to vector<128x128xbf16>
    %cst_44 = arith.constant dense<0.000000e+00> : vector<56x128xf32>
    %91 = tpu.matmul %75, %90, %cst_44 {dimension_numbers = #tpu.dot_dimension_numbers<[1], [1], [0], [0], [0, 0, 1, 0], [], []>} : vector<56x128xbf16>, vector<128x128xbf16>, vector<56x128xf32> -> vector<56x128xf32>
    %92 = arith.truncf %91 : vector<56x128xf32> to vector<56x128xbf16>
    %cst_45 = arith.constant dense<0.000000e+00> : vector<48x128xf32>
    %93 = tpu.matmul %4, %92, %cst_45 {dimension_numbers = #tpu.dot_dimension_numbers<[1], [0], [0], [1], [0, 0, 1, 1], [], []>} : vector<48x56xbf16>, vector<56x128xbf16>, vector<48x128xf32> -> vector<48x128xf32>
    %94 = arith.addf %93, %5 : vector<48x128xf32>
    %95 = arith.addf %66, %94 : vector<48x128xf32>
    %96 = arith.truncf %95 : vector<48x128xf32> to vector<48x128xbf16>
    %cst_46 = arith.constant dense<0.000000e+00> : vector<48x128xf32>
    %97 = tpu.matmul %6, %96, %cst_46 {dimension_numbers = #tpu.dot_dimension_numbers<[1], [0], [0], [1], [0, 0, 1, 1], [], []>} : vector<48x48xbf16>, vector<48x128xbf16>, vector<48x128xf32> -> vector<48x128xf32>
    %98 = arith.addf %97, %7 : vector<48x128xf32>
    %cst_47 = arith.constant dense<0.000000e+00> : vector<128xf32>
    %99 = vector.multi_reduction <add>, %98, %cst_47 [0] : vector<48x128xf32> to vector<128xf32>
    %100 = vector.shape_cast %99 : vector<128xf32> to vector<1x128xf32>
    %cst_48 = arith.constant 4.800000e+01 : f32
    %101 = vector.broadcast %cst_48 : f32 to vector<1x128xf32>
    %102 = arith.divf %100, %101 : vector<1x128xf32>
    %103 = vector.broadcast %102 : vector<1x128xf32> to vector<48x128xf32>
    %104 = arith.subf %98, %103 : vector<48x128xf32>
    %105 = arith.mulf %104, %104 : vector<48x128xf32>
    %cst_49 = arith.constant dense<0.000000e+00> : vector<128xf32>
    %106 = vector.multi_reduction <add>, %105, %cst_49 [0] : vector<48x128xf32> to vector<128xf32>
    %107 = vector.shape_cast %106 : vector<128xf32> to vector<1x128xf32>
    %cst_50 = arith.constant 4.800000e+01 : f32
    %108 = vector.broadcast %cst_50 : f32 to vector<1x128xf32>
    %109 = arith.divf %107, %108 : vector<1x128xf32>
    %cst_51 = arith.constant 9.99999974E-6 : f32
    %110 = vector.broadcast %cst_51 : f32 to vector<1x128xf32>
    %111 = arith.addf %109, %110 : vector<1x128xf32>
    %112 = math.rsqrt %111 : vector<1x128xf32>
    %113 = vector.broadcast %112 : vector<1x128xf32> to vector<48x128xf32>
    %114 = arith.mulf %104, %113 : vector<48x128xf32>
    %115 = arith.mulf %114, %8 : vector<48x128xf32>
    %116 = arith.addf %115, %9 : vector<48x128xf32>
    %c1_52 = arith.constant 1 : index
    %c0_53 = arith.constant 0 : index
    %c0_54 = arith.constant 0 : index
    %117 = vector.load %arg11[%c1_52, %c0_53, %c0_54] : memref<6x48x128xf32, #tpu.memory_space<vmem>>, vector<1x48x128xf32>
    %118 = vector.shape_cast %117 : vector<1x48x128xf32> to vector<48x128xf32>
    %119 = vector.shape_cast %116 : vector<48x128xf32> to vector<1x48x128xf32>
    tpu.vector_store %arg11[%c1_52, %c0_53, %c0_54], %119 {strides = array<i32>} : memref<6x48x128xf32, #tpu.memory_space<vmem>>, vector<1x48x128xf32>,
    %c2 = arith.constant 2 : index
    %c0_55 = arith.constant 0 : index
    %c0_56 = arith.constant 0 : index
    %120 = vector.load %arg0[%c2, %c0_55, %c0_56] : memref<3x48x128xf32, #tpu.memory_space<vmem>>, vector<1x48x128xf32>
    %121 = vector.shape_cast %120 : vector<1x48x128xf32> to vector<48x128xf32>
    %122 = arith.truncf %121 : vector<48x128xf32> to vector<48x128xbf16>
    %cst_57 = arith.constant dense<0.000000e+00> : vector<168x128xf32>
    %123 = tpu.matmul %0, %122, %cst_57 {dimension_numbers = #tpu.dot_dimension_numbers<[1], [0], [0], [1], [0, 0, 1, 1], [], []>} : vector<168x48xbf16>, vector<48x128xbf16>, vector<168x128xf32> -> vector<168x128xf32>
    %124 = arith.addf %123, %1 : vector<168x128xf32>
    %125 = vector.extract_strided_slice %124 {offsets = [0, 0], sizes = [56, 128], strides = [1, 1]} : vector<168x128xf32> to vector<56x128xf32>
    %126 = vector.extract_strided_slice %124 {offsets = [56, 0], sizes = [56, 128], strides = [1, 1]} : vector<168x128xf32> to vector<56x128xf32>
    %127 = vector.extract_strided_slice %124 {offsets = [112, 0], sizes = [56, 128], strides = [1, 1]} : vector<168x128xf32> to vector<56x128xf32>
    %128 = arith.truncf %125 : vector<56x128xf32> to vector<56x128xbf16>
    %129 = arith.truncf %126 : vector<56x128xf32> to vector<56x128xbf16>
    %130 = arith.truncf %127 : vector<56x128xf32> to vector<56x128xbf16>
    %cst_58 = arith.constant dense<0.000000e+00> : vector<128x56xf32>
    %131 = tpu.matmul %2, %128, %cst_58 {dimension_numbers = #tpu.dot_dimension_numbers<[1], [1], [0], [0], [0, 0, 1, 0], [], []>} : vector<128x128xbf16>, vector<56x128xbf16>, vector<128x56xf32> -> vector<128x56xf32>
    %132 = arith.truncf %131 : vector<128x56xf32> to vector<128x56xbf16>
    %cst_59 = arith.constant dense<0.000000e+00> : vector<128x128xf32>
    %133 = tpu.matmul %132, %129, %cst_59 {dimension_numbers = #tpu.dot_dimension_numbers<[1], [0], [0], [1], [0, 0, 1, 1], [], []>} : vector<128x56xbf16>, vector<56x128xbf16>, vector<128x128xf32> -> vector<128x128xf32>
    %134 = arith.addf %133, %3 : vector<128x128xf32>
    %cst_60 = arith.constant dense<0xFF800000> : vector<128xf32>
    %135 = vector.multi_reduction <maximumf>, %134, %cst_60 [1] : vector<128x128xf32> to vector<128xf32>
    %136 = vector.shape_cast %135 : vector<128xf32> to vector<128x1xf32>
    %137 = vector.broadcast %136 : vector<128x1xf32> to vector<128x128xf32>
    %138 = arith.subf %134, %137 : vector<128x128xf32>
    %139 = math.exp %138 : vector<128x128xf32>
    %cst_61 = arith.constant dense<0.000000e+00> : vector<128xf32>
    %140 = vector.multi_reduction <add>, %139, %cst_61 [1] : vector<128x128xf32> to vector<128xf32>
    %141 = vector.shape_cast %140 : vector<128xf32> to vector<128x1xf32>
    %142 = tpu.reciprocal %141 {approx = true} : vector<128x1xf32> -> vector<128x1xf32>
    %143 = vector.broadcast %142 : vector<128x1xf32> to vector<128x128xf32>
    %144 = arith.mulf %139, %143 : vector<128x128xf32>
    %145 = arith.truncf %144 : vector<128x128xf32> to vector<128x128xbf16>
    %cst_62 = arith.constant dense<0.000000e+00> : vector<56x128xf32>
    %146 = tpu.matmul %130, %145, %cst_62 {dimension_numbers = #tpu.dot_dimension_numbers<[1], [1], [0], [0], [0, 0, 1, 0], [], []>} : vector<56x128xbf16>, vector<128x128xbf16>, vector<56x128xf32> -> vector<56x128xf32>
    %147 = arith.truncf %146 : vector<56x128xf32> to vector<56x128xbf16>
    %cst_63 = arith.constant dense<0.000000e+00> : vector<48x128xf32>
    %148 = tpu.matmul %4, %147, %cst_63 {dimension_numbers = #tpu.dot_dimension_numbers<[1], [0], [0], [1], [0, 0, 1, 1], [], []>} : vector<48x56xbf16>, vector<56x128xbf16>, vector<48x128xf32> -> vector<48x128xf32>
    %149 = arith.addf %148, %5 : vector<48x128xf32>
    %150 = arith.addf %121, %149 : vector<48x128xf32>
    %151 = arith.truncf %150 : vector<48x128xf32> to vector<48x128xbf16>
    %cst_64 = arith.constant dense<0.000000e+00> : vector<48x128xf32>
    %152 = tpu.matmul %6, %151, %cst_64 {dimension_numbers = #tpu.dot_dimension_numbers<[1], [0], [0], [1], [0, 0, 1, 1], [], []>} : vector<48x48xbf16>, vector<48x128xbf16>, vector<48x128xf32> -> vector<48x128xf32>
    %153 = arith.addf %152, %7 : vector<48x128xf32>
    %cst_65 = arith.constant dense<0.000000e+00> : vector<128xf32>
    %154 = vector.multi_reduction <add>, %153, %cst_65 [0] : vector<48x128xf32> to vector<128xf32>
    %155 = vector.shape_cast %154 : vector<128xf32> to vector<1x128xf32>
    %cst_66 = arith.constant 4.800000e+01 : f32
    %156 = vector.broadcast %cst_66 : f32 to vector<1x128xf32>
    %157 = arith.divf %155, %156 : vector<1x128xf32>
    %158 = vector.broadcast %157 : vector<1x128xf32> to vector<48x128xf32>
    %159 = arith.subf %153, %158 : vector<48x128xf32>
    %160 = arith.mulf %159, %159 : vector<48x128xf32>
    %cst_67 = arith.constant dense<0.000000e+00> : vector<128xf32>
    %161 = vector.multi_reduction <add>, %160, %cst_67 [0] : vector<48x128xf32> to vector<128xf32>
    %162 = vector.shape_cast %161 : vector<128xf32> to vector<1x128xf32>
    %cst_68 = arith.constant 4.800000e+01 : f32
    %163 = vector.broadcast %cst_68 : f32 to vector<1x128xf32>
    %164 = arith.divf %162, %163 : vector<1x128xf32>
    %cst_69 = arith.constant 9.99999974E-6 : f32
    %165 = vector.broadcast %cst_69 : f32 to vector<1x128xf32>
    %166 = arith.addf %164, %165 : vector<1x128xf32>
    %167 = math.rsqrt %166 : vector<1x128xf32>
    %168 = vector.broadcast %167 : vector<1x128xf32> to vector<48x128xf32>
    %169 = arith.mulf %159, %168 : vector<48x128xf32>
    %170 = arith.mulf %169, %8 : vector<48x128xf32>
    %171 = arith.addf %170, %9 : vector<48x128xf32>
    %c2_70 = arith.constant 2 : index
    %c0_71 = arith.constant 0 : index
    %c0_72 = arith.constant 0 : index
    %172 = vector.load %arg11[%c2_70, %c0_71, %c0_72] : memref<6x48x128xf32, #tpu.memory_space<vmem>>, vector<1x48x128xf32>
    %173 = vector.shape_cast %172 : vector<1x48x128xf32> to vector<48x128xf32>
    %174 = vector.shape_cast %171 : vector<48x128xf32> to vector<1x48x128xf32>
    tpu.vector_store %arg11[%c2_70, %c0_71, %c0_72], %174 {strides = array<i32>} : memref<6x48x128xf32, #tpu.memory_space<vmem>>, vector<1x48x128xf32>,
    %175 = arith.truncf %171 : vector<48x128xf32> to vector<48x128xbf16>
    %cst_73 = arith.constant dense<0.000000e+00> : vector<168x128xf32>
    %176 = tpu.matmul %0, %175, %cst_73 {dimension_numbers = #tpu.dot_dimension_numbers<[1], [0], [0], [1], [0, 0, 1, 1], [], []>} : vector<168x48xbf16>, vector<48x128xbf16>, vector<168x128xf32> -> vector<168x128xf32>
    %177 = arith.addf %176, %1 : vector<168x128xf32>
    %178 = vector.extract_strided_slice %177 {offsets = [0, 0], sizes = [56, 128], strides = [1, 1]} : vector<168x128xf32> to vector<56x128xf32>
    %179 = vector.extract_strided_slice %177 {offsets = [56, 0], sizes = [56, 128], strides = [1, 1]} : vector<168x128xf32> to vector<56x128xf32>
    %180 = vector.extract_strided_slice %177 {offsets = [112, 0], sizes = [56, 128], strides = [1, 1]} : vector<168x128xf32> to vector<56x128xf32>
    %181 = arith.truncf %178 : vector<56x128xf32> to vector<56x128xbf16>
    %182 = arith.truncf %179 : vector<56x128xf32> to vector<56x128xbf16>
    %183 = arith.truncf %180 : vector<56x128xf32> to vector<56x128xbf16>
    %cst_74 = arith.constant dense<0.000000e+00> : vector<128x56xf32>
    %184 = tpu.matmul %2, %181, %cst_74 {dimension_numbers = #tpu.dot_dimension_numbers<[1], [1], [0], [0], [0, 0, 1, 0], [], []>} : vector<128x128xbf16>, vector<56x128xbf16>, vector<128x56xf32> -> vector<128x56xf32>
    %185 = arith.truncf %184 : vector<128x56xf32> to vector<128x56xbf16>
    %cst_75 = arith.constant dense<0.000000e+00> : vector<128x128xf32>
    %186 = tpu.matmul %185, %182, %cst_75 {dimension_numbers = #tpu.dot_dimension_numbers<[1], [0], [0], [1], [0, 0, 1, 1], [], []>} : vector<128x56xbf16>, vector<56x128xbf16>, vector<128x128xf32> -> vector<128x128xf32>
    %187 = arith.addf %186, %3 : vector<128x128xf32>
    %cst_76 = arith.constant dense<0xFF800000> : vector<128xf32>
    %188 = vector.multi_reduction <maximumf>, %187, %cst_76 [1] : vector<128x128xf32> to vector<128xf32>
    %189 = vector.shape_cast %188 : vector<128xf32> to vector<128x1xf32>
    %190 = vector.broadcast %189 : vector<128x1xf32> to vector<128x128xf32>
    %191 = arith.subf %187, %190 : vector<128x128xf32>
    %192 = math.exp %191 : vector<128x128xf32>
    %cst_77 = arith.constant dense<0.000000e+00> : vector<128xf32>
    %193 = vector.multi_reduction <add>, %192, %cst_77 [1] : vector<128x128xf32> to vector<128xf32>
    %194 = vector.shape_cast %193 : vector<128xf32> to vector<128x1xf32>
    %195 = tpu.reciprocal %194 {approx = true} : vector<128x1xf32> -> vector<128x1xf32>
    %196 = vector.broadcast %195 : vector<128x1xf32> to vector<128x128xf32>
    %197 = arith.mulf %192, %196 : vector<128x128xf32>
    %198 = arith.truncf %197 : vector<128x128xf32> to vector<128x128xbf16>
    %cst_78 = arith.constant dense<0.000000e+00> : vector<56x128xf32>
    %199 = tpu.matmul %183, %198, %cst_78 {dimension_numbers = #tpu.dot_dimension_numbers<[1], [1], [0], [0], [0, 0, 1, 0], [], []>} : vector<56x128xbf16>, vector<128x128xbf16>, vector<56x128xf32> -> vector<56x128xf32>
    %200 = arith.truncf %199 : vector<56x128xf32> to vector<56x128xbf16>
    %cst_79 = arith.constant dense<0.000000e+00> : vector<48x128xf32>
    %201 = tpu.matmul %4, %200, %cst_79 {dimension_numbers = #tpu.dot_dimension_numbers<[1], [0], [0], [1], [0, 0, 1, 1], [], []>} : vector<48x56xbf16>, vector<56x128xbf16>, vector<48x128xf32> -> vector<48x128xf32>
    %202 = arith.addf %201, %5 : vector<48x128xf32>
    %203 = arith.addf %171, %202 : vector<48x128xf32>
    %204 = arith.truncf %203 : vector<48x128xf32> to vector<48x128xbf16>
    %cst_80 = arith.constant dense<0.000000e+00> : vector<48x128xf32>
    %205 = tpu.matmul %6, %204, %cst_80 {dimension_numbers = #tpu.dot_dimension_numbers<[1], [0], [0], [1], [0, 0, 1, 1], [], []>} : vector<48x48xbf16>, vector<48x128xbf16>, vector<48x128xf32> -> vector<48x128xf32>
    %206 = arith.addf %205, %7 : vector<48x128xf32>
    %cst_81 = arith.constant dense<0.000000e+00> : vector<128xf32>
    %207 = vector.multi_reduction <add>, %206, %cst_81 [0] : vector<48x128xf32> to vector<128xf32>
    %208 = vector.shape_cast %207 : vector<128xf32> to vector<1x128xf32>
    %cst_82 = arith.constant 4.800000e+01 : f32
    %209 = vector.broadcast %cst_82 : f32 to vector<1x128xf32>
    %210 = arith.divf %208, %209 : vector<1x128xf32>
    %211 = vector.broadcast %210 : vector<1x128xf32> to vector<48x128xf32>
    %212 = arith.subf %206, %211 : vector<48x128xf32>
    %213 = arith.mulf %212, %212 : vector<48x128xf32>
    %cst_83 = arith.constant dense<0.000000e+00> : vector<128xf32>
    %214 = vector.multi_reduction <add>, %213, %cst_83 [0] : vector<48x128xf32> to vector<128xf32>
    %215 = vector.shape_cast %214 : vector<128xf32> to vector<1x128xf32>
    %cst_84 = arith.constant 4.800000e+01 : f32
    %216 = vector.broadcast %cst_84 : f32 to vector<1x128xf32>
    %217 = arith.divf %215, %216 : vector<1x128xf32>
    %cst_85 = arith.constant 9.99999974E-6 : f32
    %218 = vector.broadcast %cst_85 : f32 to vector<1x128xf32>
    %219 = arith.addf %217, %218 : vector<1x128xf32>
    %220 = math.rsqrt %219 : vector<1x128xf32>
    %221 = vector.broadcast %220 : vector<1x128xf32> to vector<48x128xf32>
    %222 = arith.mulf %212, %221 : vector<48x128xf32>
    %223 = arith.mulf %222, %8 : vector<48x128xf32>
    %224 = arith.addf %223, %9 : vector<48x128xf32>
    %c3 = arith.constant 3 : index
    %c0_86 = arith.constant 0 : index
    %c0_87 = arith.constant 0 : index
    %225 = vector.load %arg11[%c3, %c0_86, %c0_87] : memref<6x48x128xf32, #tpu.memory_space<vmem>>, vector<1x48x128xf32>
    %226 = vector.shape_cast %225 : vector<1x48x128xf32> to vector<48x128xf32>
    %227 = vector.shape_cast %224 : vector<48x128xf32> to vector<1x48x128xf32>
    tpu.vector_store %arg11[%c3, %c0_86, %c0_87], %227 {strides = array<i32>} : memref<6x48x128xf32, #tpu.memory_space<vmem>>, vector<1x48x128xf32>,
    %228 = arith.truncf %224 : vector<48x128xf32> to vector<48x128xbf16>
    %cst_88 = arith.constant dense<0.000000e+00> : vector<168x128xf32>
    %229 = tpu.matmul %0, %228, %cst_88 {dimension_numbers = #tpu.dot_dimension_numbers<[1], [0], [0], [1], [0, 0, 1, 1], [], []>} : vector<168x48xbf16>, vector<48x128xbf16>, vector<168x128xf32> -> vector<168x128xf32>
    %230 = arith.addf %229, %1 : vector<168x128xf32>
    %231 = vector.extract_strided_slice %230 {offsets = [0, 0], sizes = [56, 128], strides = [1, 1]} : vector<168x128xf32> to vector<56x128xf32>
    %232 = vector.extract_strided_slice %230 {offsets = [56, 0], sizes = [56, 128], strides = [1, 1]} : vector<168x128xf32> to vector<56x128xf32>
    %233 = vector.extract_strided_slice %230 {offsets = [112, 0], sizes = [56, 128], strides = [1, 1]} : vector<168x128xf32> to vector<56x128xf32>
    %234 = arith.truncf %231 : vector<56x128xf32> to vector<56x128xbf16>
    %235 = arith.truncf %232 : vector<56x128xf32> to vector<56x128xbf16>
    %236 = arith.truncf %233 : vector<56x128xf32> to vector<56x128xbf16>
    %cst_89 = arith.constant dense<0.000000e+00> : vector<128x56xf32>
    %237 = tpu.matmul %2, %234, %cst_89 {dimension_numbers = #tpu.dot_dimension_numbers<[1], [1], [0], [0], [0, 0, 1, 0], [], []>} : vector<128x128xbf16>, vector<56x128xbf16>, vector<128x56xf32> -> vector<128x56xf32>
    %238 = arith.truncf %237 : vector<128x56xf32> to vector<128x56xbf16>
    %cst_90 = arith.constant dense<0.000000e+00> : vector<128x128xf32>
    %239 = tpu.matmul %238, %235, %cst_90 {dimension_numbers = #tpu.dot_dimension_numbers<[1], [0], [0], [1], [0, 0, 1, 1], [], []>} : vector<128x56xbf16>, vector<56x128xbf16>, vector<128x128xf32> -> vector<128x128xf32>
    %240 = arith.addf %239, %3 : vector<128x128xf32>
    %cst_91 = arith.constant dense<0xFF800000> : vector<128xf32>
    %241 = vector.multi_reduction <maximumf>, %240, %cst_91 [1] : vector<128x128xf32> to vector<128xf32>
    %242 = vector.shape_cast %241 : vector<128xf32> to vector<128x1xf32>
    %243 = vector.broadcast %242 : vector<128x1xf32> to vector<128x128xf32>
    %244 = arith.subf %240, %243 : vector<128x128xf32>
    %245 = math.exp %244 : vector<128x128xf32>
    %cst_92 = arith.constant dense<0.000000e+00> : vector<128xf32>
    %246 = vector.multi_reduction <add>, %245, %cst_92 [1] : vector<128x128xf32> to vector<128xf32>
    %247 = vector.shape_cast %246 : vector<128xf32> to vector<128x1xf32>
    %248 = tpu.reciprocal %247 {approx = true} : vector<128x1xf32> -> vector<128x1xf32>
    %249 = vector.broadcast %248 : vector<128x1xf32> to vector<128x128xf32>
    %250 = arith.mulf %245, %249 : vector<128x128xf32>
    %251 = arith.truncf %250 : vector<128x128xf32> to vector<128x128xbf16>
    %cst_93 = arith.constant dense<0.000000e+00> : vector<56x128xf32>
    %252 = tpu.matmul %236, %251, %cst_93 {dimension_numbers = #tpu.dot_dimension_numbers<[1], [1], [0], [0], [0, 0, 1, 0], [], []>} : vector<56x128xbf16>, vector<128x128xbf16>, vector<56x128xf32> -> vector<56x128xf32>
    %253 = arith.truncf %252 : vector<56x128xf32> to vector<56x128xbf16>
    %cst_94 = arith.constant dense<0.000000e+00> : vector<48x128xf32>
    %254 = tpu.matmul %4, %253, %cst_94 {dimension_numbers = #tpu.dot_dimension_numbers<[1], [0], [0], [1], [0, 0, 1, 1], [], []>} : vector<48x56xbf16>, vector<56x128xbf16>, vector<48x128xf32> -> vector<48x128xf32>
    %255 = arith.addf %254, %5 : vector<48x128xf32>
    %256 = arith.addf %224, %255 : vector<48x128xf32>
    %257 = arith.truncf %256 : vector<48x128xf32> to vector<48x128xbf16>
    %cst_95 = arith.constant dense<0.000000e+00> : vector<48x128xf32>
    %258 = tpu.matmul %6, %257, %cst_95 {dimension_numbers = #tpu.dot_dimension_numbers<[1], [0], [0], [1], [0, 0, 1, 1], [], []>} : vector<48x48xbf16>, vector<48x128xbf16>, vector<48x128xf32> -> vector<48x128xf32>
    %259 = arith.addf %258, %7 : vector<48x128xf32>
    %cst_96 = arith.constant dense<0.000000e+00> : vector<128xf32>
    %260 = vector.multi_reduction <add>, %259, %cst_96 [0] : vector<48x128xf32> to vector<128xf32>
    %261 = vector.shape_cast %260 : vector<128xf32> to vector<1x128xf32>
    %cst_97 = arith.constant 4.800000e+01 : f32
    %262 = vector.broadcast %cst_97 : f32 to vector<1x128xf32>
    %263 = arith.divf %261, %262 : vector<1x128xf32>
    %264 = vector.broadcast %263 : vector<1x128xf32> to vector<48x128xf32>
    %265 = arith.subf %259, %264 : vector<48x128xf32>
    %266 = arith.mulf %265, %265 : vector<48x128xf32>
    %cst_98 = arith.constant dense<0.000000e+00> : vector<128xf32>
    %267 = vector.multi_reduction <add>, %266, %cst_98 [0] : vector<48x128xf32> to vector<128xf32>
    %268 = vector.shape_cast %267 : vector<128xf32> to vector<1x128xf32>
    %cst_99 = arith.constant 4.800000e+01 : f32
    %269 = vector.broadcast %cst_99 : f32 to vector<1x128xf32>
    %270 = arith.divf %268, %269 : vector<1x128xf32>
    %cst_100 = arith.constant 9.99999974E-6 : f32
    %271 = vector.broadcast %cst_100 : f32 to vector<1x128xf32>
    %272 = arith.addf %270, %271 : vector<1x128xf32>
    %273 = math.rsqrt %272 : vector<1x128xf32>
    %274 = vector.broadcast %273 : vector<1x128xf32> to vector<48x128xf32>
    %275 = arith.mulf %265, %274 : vector<48x128xf32>
    %276 = arith.mulf %275, %8 : vector<48x128xf32>
    %277 = arith.addf %276, %9 : vector<48x128xf32>
    %c4 = arith.constant 4 : index
    %c0_101 = arith.constant 0 : index
    %c0_102 = arith.constant 0 : index
    %278 = vector.load %arg11[%c4, %c0_101, %c0_102] : memref<6x48x128xf32, #tpu.memory_space<vmem>>, vector<1x48x128xf32>
    %279 = vector.shape_cast %278 : vector<1x48x128xf32> to vector<48x128xf32>
    %280 = vector.shape_cast %277 : vector<48x128xf32> to vector<1x48x128xf32>
    tpu.vector_store %arg11[%c4, %c0_101, %c0_102], %280 {strides = array<i32>} : memref<6x48x128xf32, #tpu.memory_space<vmem>>, vector<1x48x128xf32>,
    %281 = arith.truncf %277 : vector<48x128xf32> to vector<48x128xbf16>
    %cst_103 = arith.constant dense<0.000000e+00> : vector<168x128xf32>
    %282 = tpu.matmul %0, %281, %cst_103 {dimension_numbers = #tpu.dot_dimension_numbers<[1], [0], [0], [1], [0, 0, 1, 1], [], []>} : vector<168x48xbf16>, vector<48x128xbf16>, vector<168x128xf32> -> vector<168x128xf32>
    %283 = arith.addf %282, %1 : vector<168x128xf32>
    %284 = vector.extract_strided_slice %283 {offsets = [0, 0], sizes = [56, 128], strides = [1, 1]} : vector<168x128xf32> to vector<56x128xf32>
    %285 = vector.extract_strided_slice %283 {offsets = [56, 0], sizes = [56, 128], strides = [1, 1]} : vector<168x128xf32> to vector<56x128xf32>
    %286 = vector.extract_strided_slice %283 {offsets = [112, 0], sizes = [56, 128], strides = [1, 1]} : vector<168x128xf32> to vector<56x128xf32>
    %287 = arith.truncf %284 : vector<56x128xf32> to vector<56x128xbf16>
    %288 = arith.truncf %285 : vector<56x128xf32> to vector<56x128xbf16>
    %289 = arith.truncf %286 : vector<56x128xf32> to vector<56x128xbf16>
    %cst_104 = arith.constant dense<0.000000e+00> : vector<128x56xf32>
    %290 = tpu.matmul %2, %287, %cst_104 {dimension_numbers = #tpu.dot_dimension_numbers<[1], [1], [0], [0], [0, 0, 1, 0], [], []>} : vector<128x128xbf16>, vector<56x128xbf16>, vector<128x56xf32> -> vector<128x56xf32>
    %291 = arith.truncf %290 : vector<128x56xf32> to vector<128x56xbf16>
    %cst_105 = arith.constant dense<0.000000e+00> : vector<128x128xf32>
    %292 = tpu.matmul %291, %288, %cst_105 {dimension_numbers = #tpu.dot_dimension_numbers<[1], [0], [0], [1], [0, 0, 1, 1], [], []>} : vector<128x56xbf16>, vector<56x128xbf16>, vector<128x128xf32> -> vector<128x128xf32>
    %293 = arith.addf %292, %3 : vector<128x128xf32>
    %cst_106 = arith.constant dense<0xFF800000> : vector<128xf32>
    %294 = vector.multi_reduction <maximumf>, %293, %cst_106 [1] : vector<128x128xf32> to vector<128xf32>
    %295 = vector.shape_cast %294 : vector<128xf32> to vector<128x1xf32>
    %296 = vector.broadcast %295 : vector<128x1xf32> to vector<128x128xf32>
    %297 = arith.subf %293, %296 : vector<128x128xf32>
    %298 = math.exp %297 : vector<128x128xf32>
    %cst_107 = arith.constant dense<0.000000e+00> : vector<128xf32>
    %299 = vector.multi_reduction <add>, %298, %cst_107 [1] : vector<128x128xf32> to vector<128xf32>
    %300 = vector.shape_cast %299 : vector<128xf32> to vector<128x1xf32>
    %301 = tpu.reciprocal %300 {approx = true} : vector<128x1xf32> -> vector<128x1xf32>
    %302 = vector.broadcast %301 : vector<128x1xf32> to vector<128x128xf32>
    %303 = arith.mulf %298, %302 : vector<128x128xf32>
    %304 = arith.truncf %303 : vector<128x128xf32> to vector<128x128xbf16>
    %cst_108 = arith.constant dense<0.000000e+00> : vector<56x128xf32>
    %305 = tpu.matmul %289, %304, %cst_108 {dimension_numbers = #tpu.dot_dimension_numbers<[1], [1], [0], [0], [0, 0, 1, 0], [], []>} : vector<56x128xbf16>, vector<128x128xbf16>, vector<56x128xf32> -> vector<56x128xf32>
    %306 = arith.truncf %305 : vector<56x128xf32> to vector<56x128xbf16>
    %cst_109 = arith.constant dense<0.000000e+00> : vector<48x128xf32>
    %307 = tpu.matmul %4, %306, %cst_109 {dimension_numbers = #tpu.dot_dimension_numbers<[1], [0], [0], [1], [0, 0, 1, 1], [], []>} : vector<48x56xbf16>, vector<56x128xbf16>, vector<48x128xf32> -> vector<48x128xf32>
    %308 = arith.addf %307, %5 : vector<48x128xf32>
    %309 = arith.addf %277, %308 : vector<48x128xf32>
    %310 = arith.truncf %309 : vector<48x128xf32> to vector<48x128xbf16>
    %cst_110 = arith.constant dense<0.000000e+00> : vector<48x128xf32>
    %311 = tpu.matmul %6, %310, %cst_110 {dimension_numbers = #tpu.dot_dimension_numbers<[1], [0], [0], [1], [0, 0, 1, 1], [], []>} : vector<48x48xbf16>, vector<48x128xbf16>, vector<48x128xf32> -> vector<48x128xf32>
    %312 = arith.addf %311, %7 : vector<48x128xf32>
    %cst_111 = arith.constant dense<0.000000e+00> : vector<128xf32>
    %313 = vector.multi_reduction <add>, %312, %cst_111 [0] : vector<48x128xf32> to vector<128xf32>
    %314 = vector.shape_cast %313 : vector<128xf32> to vector<1x128xf32>
    %cst_112 = arith.constant 4.800000e+01 : f32
    %315 = vector.broadcast %cst_112 : f32 to vector<1x128xf32>
    %316 = arith.divf %314, %315 : vector<1x128xf32>
    %317 = vector.broadcast %316 : vector<1x128xf32> to vector<48x128xf32>
    %318 = arith.subf %312, %317 : vector<48x128xf32>
    %319 = arith.mulf %318, %318 : vector<48x128xf32>
    %cst_113 = arith.constant dense<0.000000e+00> : vector<128xf32>
    %320 = vector.multi_reduction <add>, %319, %cst_113 [0] : vector<48x128xf32> to vector<128xf32>
    %321 = vector.shape_cast %320 : vector<128xf32> to vector<1x128xf32>
    %cst_114 = arith.constant 4.800000e+01 : f32
    %322 = vector.broadcast %cst_114 : f32 to vector<1x128xf32>
    %323 = arith.divf %321, %322 : vector<1x128xf32>
    %cst_115 = arith.constant 9.99999974E-6 : f32
    %324 = vector.broadcast %cst_115 : f32 to vector<1x128xf32>
    %325 = arith.addf %323, %324 : vector<1x128xf32>
    %326 = math.rsqrt %325 : vector<1x128xf32>
    %327 = vector.broadcast %326 : vector<1x128xf32> to vector<48x128xf32>
    %328 = arith.mulf %318, %327 : vector<48x128xf32>
    %329 = arith.mulf %328, %8 : vector<48x128xf32>
    %330 = arith.addf %329, %9 : vector<48x128xf32>
    %c5 = arith.constant 5 : index
    %c0_116 = arith.constant 0 : index
    %c0_117 = arith.constant 0 : index
    %331 = vector.load %arg11[%c5, %c0_116, %c0_117] : memref<6x48x128xf32, #tpu.memory_space<vmem>>, vector<1x48x128xf32>
    %332 = vector.shape_cast %331 : vector<1x48x128xf32> to vector<48x128xf32>
    %333 = vector.shape_cast %330 : vector<48x128xf32> to vector<1x48x128xf32>
    tpu.vector_store %arg11[%c5, %c0_116, %c0_117], %333 {strides = array<i32>} : memref<6x48x128xf32, #tpu.memory_space<vmem>>, vector<1x48x128xf32>,
    return
  }
}

</mosaic_0001>

<bundles_post_ra>
// kernel: local_attention_forward.1
= control target key start
LH: loop header
LB: loop body
LE: loop exit
PB: predicated region body
PF: predicated region fallthrough
CT: control target
= control target key end

     0   :  { %16 = vsyncpa [#allocation3], 0  ;;  %s7013_s0 = inlined_call_operand.hbm [shape: f32[3,48,128], index: 0, kind: input, shape index: {}]   ;;  %s7014_s1 = inlined_call_operand.hbm [shape: bf16[128,128], index: 1, kind: input, shape index: {}]   ;;  %s7015_s2 = inlined_call_operand.vmem [shape: f32[128,128], index: 2, kind: input, shape index: {}]   ;;  %s7016_s3 = inlined_call_operand.vmem [shape: bf16[168,48], index: 3, kind: input, shape index: {}]   ;;  %s7017_s4 = inlined_call_operand.hbm [shape: f32[168,128], index: 4, kind: input, shape index: {}]   ;;  %s7018_s5 = inlined_call_operand.hbm [shape: bf16[48,56], index: 5, kind: input, shape index: {}]   ;;  %s7019_s6 = inlined_call_operand.hbm [shape: f32[48,128], index: 6, kind: input, shape index: {}]   ;;  %s7020_s7 = inlined_call_operand.hbm [shape: bf16[48,48], index: 7, kind: input, shape index: {}]   ;;  %s7021_s8 = inlined_call_operand.hbm [shape: f32[48,128], index: 8, kind: input, shape index: {}]   ;;  %s7022_s9 = inlined_call_operand.hbm [shape: f32[48,128], index: 9, kind: input, shape index: {}]   ;;  %s7023_s10 = inlined_call_operand.hbm [shape: f32[48,128], index: 10, kind: input, shape index: {}]   ;;  %s7024_s11 = inlined_call_operand.hbm [shape: f32[6,48,128], index: 11, kind: output, shape index: {}]  }
   0x1   :  { %17 = vsyncpa [#allocation6], 0 }
   0x2   :  { %18 = vsyncpa [#allocation9], 0 }
   0x3   :  { %19 = vsyncpa [#allocation12], 0 }
   0x4   :  { %20 = vsyncpa [#allocation15], 0  ;;  %s39_s19 = sshll.u32 %s7014_s1, 4  ;;  %s40_s19 = int_to_ptr.hbm [resolvable:$true] %s39_s19 }
   0x5   :  { %21 = vsyncpa [#allocation4], 0  ;;  %s4881_s20 = smov [#allocation5]   ;;  %s69_s24 = sshll.u32 %s7018_s5, 4  ;;  %s70_s24 = int_to_ptr.hbm [resolvable:$true] %s69_s24 }
   0x6   :  { %s41_s21 = sshll.u32 %s4881_s20, 4  ;;  %s4882_s25 = smov 64   ;;  %s42_s21 = int_to_ptr.vmem [resolvable:$true] %s41_s21 }
   0x7   :  { %s4883_s26 = smov 4   ;;  %s4884_s27 = smov [#allocation8]  }
   0x8   :  { %47 = dma.hbm_to_vmem [thread:$0]  %s40_s19, 1024, %s42_s21, [#allocation6], %s4882_s25, %s4882_s25, %s4883_s26  }
   0x9   :  { %s71_s28 = sshll.u32 %s4884_s27, 4  ;;  %s95_s12 = sshll.u32 %s7020_s7, 4  ;;  %s72_s28 = int_to_ptr.vmem [resolvable:$true] %s71_s28  ;;  %s96_s12 = int_to_ptr.hbm [resolvable:$true] %s95_s12 }
   0xa   :  { %77 = dma.hbm_to_vmem [thread:$0]  %s70_s24, 384, %s72_s28, [#allocation9], %s4882_s25, %s4882_s25, %s4883_s26  }
   0xb   :  { %s4885_s1 = smov [#allocation11]   ;;  %s121_s5 = sshll.u32 %s7022_s9, 4  ;;  %s122_s5 = int_to_ptr.hbm [resolvable:$true] %s121_s5 }
   0xc   :  { %s97_s13 = sshll.u32 %s4885_s1, 4  ;;  %s4886_s16 = smov [#allocation14]   ;;  %s98_s13 = int_to_ptr.vmem [resolvable:$true] %s97_s13 }
   0xd   :  { %103 = dma.hbm_to_vmem [thread:$0]  %s96_s12, 384, %s98_s13, [#allocation12], %s4882_s25, %s4882_s25, %s4883_s26  }
   0xe   :  { %s123_s17 = sshll.u32 %s4886_s16, 4  ;;  %s26_s20 = sshll.u32 %s7013_s0, 4  ;;  %s124_s17 = int_to_ptr.vmem [resolvable:$true] %s123_s17  ;;  %s27_s20 = int_to_ptr.hbm [resolvable:$true] %s26_s20 }
   0xf   :  { %s4887_s7 = smov 128   ;;  %s4888_s21 = smov 8  }
  0x10   :  { %129 = dma.hbm_to_vmem [thread:$0]  %s122_s5, 768, %s124_s17, [#allocation15], %s4887_s7, %s4887_s7, %s4888_s21  }
  0x11   :  { %s56_s9 = sshll.u32 %s7017_s4, 4  ;;  %s4889_s24 = smov [#allocation2]   ;;  %s57_s9 = int_to_ptr.hbm [resolvable:$true] %s56_s9 }
  0x12   :  { %s28_s25 = sshll.u32 %s4889_s24, 4  ;;  %s4890_s0 = smov [#allocation7]   ;;  %s29_s25 = int_to_ptr.vmem [resolvable:$true] %s28_s25 }
  0x13   :  { %34 = dma.hbm_to_vmem [thread:$0]  %s27_s20, 2304, %s29_s25, [#allocation3], %s4887_s7, %s4887_s7, %s4888_s21  }
  0x14   :  { %s58_s26 = sshll.u32 %s4890_s0, 4  ;;  %s82_s29 = sshll.u32 %s7019_s6, 4  ;;  %s59_s26 = int_to_ptr.vmem [resolvable:$true] %s58_s26  ;;  %s83_s29 = int_to_ptr.hbm [resolvable:$true] %s82_s29 }
  0x15   :  { %64 = dma.hbm_to_vmem [thread:$0]  %s57_s9, 2688, %s59_s26, [#allocation6], %s4887_s7, %s4887_s7, %s4888_s21  }
  0x16   :  { %s108_s12 = sshll.u32 %s7021_s8, 4  ;;  %s4891_s1 = smov [#allocation10]   ;;  %s109_s12 = int_to_ptr.hbm [resolvable:$true] %s108_s12 }
  0x17   :  { %s84_s13 = sshll.u32 %s4891_s1, 4  ;;  %s4892_s14 = smov [#allocation13]   ;;  %s85_s13 = int_to_ptr.vmem [resolvable:$true] %s84_s13 }
  0x18   :  { %90 = dma.hbm_to_vmem [thread:$0]  %s83_s29, 768, %s85_s13, [#allocation9], %s4887_s7, %s4887_s7, %s4888_s21  }
  0x19   :  { %s110_s6 = sshll.u32 %s4892_s14, 4  ;;  %s134_s16 = sshll.u32 %s7023_s10, 4  ;;  %s111_s6 = int_to_ptr.vmem [resolvable:$true] %s110_s6  ;;  %s135_s16 = int_to_ptr.hbm [resolvable:$true] %s134_s16 }
  0x1a   :  { %116 = dma.hbm_to_vmem [thread:$0]  %s109_s12, 768, %s111_s6, [#allocation12], %s4887_s7, %s4887_s7, %s4888_s21  }
  0x1b   :  { %s4893_s8 = smov [#allocation16]  }
  0x1c   :  { %s136_s17 = sshll.u32 %s4893_s8, 4  ;;  %s137_s17 = int_to_ptr.vmem [resolvable:$true] %s136_s17 }
  0x1d   :  { %142 = dma.hbm_to_vmem [thread:$0]  %s135_s16, 768, %s137_s17, [#allocation15], %s4887_s7, %s4887_s7, %s4888_s21  }
  0x1e   :  { %4869 = dma.done.wait [#allocation3], 2304  }
  0x1f   :  { %4870 = vsyncadd [#allocation3], 4294964992 }
  0x20   :  { %4871 = dma.done.wait [#allocation6], 3712  }
  0x21   :  { %4872 = vsyncadd [#allocation6], 4294963584 }
  0x22   :  { %4873 = dma.done.wait [#allocation9], 1152  }
  0x23   :  { %4874 = vsyncadd [#allocation9], 4294966144 }
  0x24   :  { %4875 = dma.done.wait [#allocation12], 1152  }
  0x25   :  { %4876 = vsyncadd [#allocation12], 4294966144 }
  0x26   :  { %4877 = dma.done.wait [#allocation15], 1536  }
  0x27   :  { %4878 = vsyncadd [#allocation15], 4294965760  ;;  %v294_v0 = vld [vmem:[#allocation2 + $0x20] sm:$0xff]  ;;  %v295_v1 = vld [vmem:[#allocation2 + $0x28] sm:$0xff]  ;;  %vm352_vm0 = vcmask 392192   ;;  %vm591_vm1 = vcmask 1043456  }
  0x28   :  { %v292_v2 = vld [vmem:[#allocation2 + $0x10] sm:$0xff]  ;;  %v298_v3 = vpack.c.bf16 %v295_v1, %v294_v0  ;;  %v293_v4 = vld [vmem:[#allocation2 + $0x18] sm:$0xff]  ;;  %v290_v6 = vld [vmem:[#allocation2] sm:$0xff]  ;;  %vm566_vm2 = vcmask 457728   ;;  %s3669_s20 = sshll.u32 %s7024_s11, 4  ;;  %s3670_s20 = int_to_ptr.hbm [resolvable:$true] %s3669_s20 }
  0x29   :  { %v297_v5 = vpack.c.bf16 %v293_v4, %v292_v2  ;;  %v291_v7 = vld [vmem:[#allocation2 + $0x8] sm:$0xff]  ;;  %v5004_v9 = vld [vmem:[%s7016_s3] sm:$0xff]  ;;  %v5018_v11 = vld [vmem:[%s7016_s3 + $0x10] sm:$0xff] }
  0x2a   :  { %391 = vmatpush.bf16.msra.mxu0 %v298_v3  ;;  %v296_v8 = vpack.c.bf16 %v291_v7, %v290_v6  ;;  %v5011_v10 = vld [vmem:[%s7016_s3 + $0x8] sm:$0xff]  ;;  %v5025_v12 = vld [vmem:[%s7016_s3 + $0x18] sm:$0xff]  ;;  %v5032_v13 = vld [vmem:[%s7016_s3 + $0x20] sm:$0xff] }
  0x2b   :  { %v5039_v14 = vld [vmem:[%s7016_s3 + $0x28] sm:$0xff]  ;;  %v5046_v15 = vld [vmem:[%s7016_s3 + $0x30] sm:$0xff]  ;;  %v5050_v22 = vld [vmem:[#allocation7 + $0x30] sm:$0xff] }
  0x2c   :  { %v5053_v26 = vld [vmem:[#allocation7 + $0x28] sm:$0xff]  ;;  %v5055_v27 = vld [vmem:[#allocation7 + $0x20] sm:$0xff]  ;;  %v5059_v32 = vld [vmem:[#allocation7 + $0x18] sm:$0xff] }
  0x2d   :  { %v5061_v33 = vld [vmem:[#allocation7 + $0x10] sm:$0xff]  ;;  %v5065_v38 = vld [vmem:[#allocation7 + $0x8] sm:$0xff]  ;;  %v5067_v39 = vld [vmem:[#allocation7] sm:$0xff] }
  0x2e   :  { %392 = vmatpush.bf16.msra.mxu0 %v297_v5  ;;  %v5071_v45 = vld [vmem:[#allocation5] sm:$0xff]  ;;  %v5074_v48 = vld [vmem:[#allocation5 + $0x8] sm:$0xff]  ;;  %v5079_v50 = vld [vmem:[#allocation7 + $0x58] sm:$0xff] }
  0x2f   :  { %v5077_v49 = vld [vmem:[#allocation7 + $0x68] sm:$0xff]  ;;  %v5081_v51 = vld [vmem:[#allocation7 + $0x60] sm:$0xff]  ;;  %v5088_v57 = vld [vmem:[#allocation7 + $0x50] sm:$0xff] }
  0x30   :  { %v5086_v56 = vld [vmem:[#allocation7 + $0x48] sm:$0xff]  ;;  %v5093_v63 = vld [vmem:[#allocation5 + $0x10] sm:$0xff]  ;;  %v5095_v0 = vld [vmem:[#allocation7 + $0x40] sm:$0xff] }
  0x31   :  { %v5097_v2 = vld [vmem:[#allocation7 + $0x38] sm:$0xff]  ;;  %v5105_v7 = vld [vmem:[#allocation5 + $0x20] sm:$0xff] }
  0x32   :  { %393 = vmatpush.bf16.msra.mxu0 %v296_v8  ;;  %v5102_v6 = vld [vmem:[#allocation5 + $0x18] sm:$0xff]  ;;  %v5108_v8 = vld [vmem:[#allocation5 + $0x28] sm:$0xff] }
  0x35   :  { %3726 = vmatmul.msk.bf16.vlgmr.msra.gmra.mxu0 %vm352_vm0, %v5004_v9 }
  0x45   :  { %3727 = vmatmul.msk.bf16.gmra.mxu0 %vm352_vm0, %v5011_v10 }
  0x55   :  { %3728 = vmatmul.msk.bf16.gmra.mxu0 %vm352_vm0, %v5018_v11 }
  0x65   :  { %3729 = vmatmul.msk.bf16.gmra.mxu0 %vm352_vm0, %v5025_v12 }
  0x75   :  { %3730 = vmatmul.msk.bf16.gmra.mxu0 %vm352_vm0, %v5032_v13 }
  0x85   :  { %3731 = vmatmul.msk.bf16.gmra.mxu0 %vm352_vm0, %v5039_v14 }
  0x95   :  { %3732 = vmatmul.msk.bf16.gmra.mxu0 %vm352_vm0, %v5046_v15 }
  0xb2   :  { %v395_v16 = vpop.f32.mrf.mxu0 }
  0xb3   :  { %v396_v42 = vadd.f32 %v395_v16, %v5067_v39  ;;  %v5111_v16 = vld [vmem:[#allocation5 + $0x30] sm:$0xff] }
  0xba   :  { %v397_v17 = vpop.f32.mrf.mxu0 }
  0xbb   :  { %v398_v40 = vadd.f32 %v397_v17, %v5065_v38  ;;  %v5114_v17 = vld [vmem:[#allocation5 + $0x38] sm:$0xff] }
  0xbd   :  { %v449_v43 = vpack.c.bf16 %v398_v40, %v396_v42 }
  0xc2   :  { %v400_v18 = vpop.f32.mrf.mxu0 }
  0xc3   :  { %v401_v36 = vadd.f32 %v400_v18, %v5061_v33 }
  0xca   :  { %v402_v19 = vpop.f32.mrf.mxu0 }
  0xcb   :  { %v403_v34 = vadd.f32 %v402_v19, %v5059_v32 }
  0xcd   :  { %v450_v37 = vpack.c.bf16 %v403_v34, %v401_v36 }
  0xd2   :  { %v405_v20 = vpop.f32.mrf.mxu0 }
  0xd3   :  { %v406_v30 = vadd.f32 %v405_v20, %v5055_v27 }
  0xda   :  { %v407_v21 = vpop.f32.mrf.mxu0 }
  0xdb   :  { %v408_v28 = vadd.f32 %v407_v21, %v5053_v26 }
  0xdd   :  { %v451_v31 = vpack.c.bf16 %v408_v28, %v406_v30 }
  0xe2   :  { %v410_v23 = vpop.f32.mrf.mxu0 }
  0xe3   :  { %v411_v24 = vadd.f32 %v410_v23, %v5050_v22 }
  0xe5   :  { %v452_v25 = vpack.c.bf16 %v411_v24, %v411_v24 }
  0xe7   :  { %513 = vmatpush.bf16.xpose.msra.mxu1 %v452_v25 }
  0xea   :  { %v412_v29 = vpop.f32.mrf.mxu0 }
  0xeb   :  { %v413_v4 = vadd.f32 %v412_v29, %v5097_v2 }
  0xef   :  { %514 = vmatpush.bf16.xpose.msra.mxu1 %v451_v31 }
  0xf2   :  { %v415_v35 = vpop.f32.mrf.mxu0 }
  0xf3   :  { %v416_v3 = vadd.f32 %v415_v35, %v5095_v0 }
  0xf5   :  { %v453_v5 = vpack.c.bf16 %v416_v3, %v413_v4 }
  0xf7   :  { %515 = vmatpush.bf16.xpose.msra.mxu1 %v450_v37 }
  0xfa   :  { %v417_v41 = vpop.f32.mrf.mxu0 }
  0xfb   :  { %v418_v60 = vadd.f32 %v417_v41, %v5086_v56 }
  0xff   :  { %516 = vmatpush.bf16.xpose.msra.mxu1 %v449_v43 }
 0x102   :  { %v420_v44 = vpop.f32.mrf.mxu0 }
 0x103   :  { %v421_v61 = vadd.f32 %v420_v44, %v5088_v57 }
 0x105   :  { %v454_v1 = vpack.c.bf16 %v421_v61, %v418_v60 }
 0x106   :  { %517 = vmatmul.bf16.vlgmr.msra.gmra.mxu1 %v5071_v45 }
 0x10a   :  { %v422_v46 = vpop.f32.mrf.mxu0 }
 0x10b   :  { %v423_v54 = vadd.f32 %v422_v46, %v5079_v50 }
 0x112   :  { %v425_v47 = vpop.f32.mrf.mxu0 }
 0x113   :  { %v426_v55 = vadd.f32 %v425_v47, %v5081_v51 }
 0x115   :  { %v455_v62 = vpack.c.bf16 %v426_v55, %v423_v54 }
 0x116   :  { %522 = vmatmul.bf16.gmra.mxu1 %v5074_v48 }
 0x11a   :  { %v427_v52 = vpop.f32.mrf.mxu0 }
 0x11b   :  { %v428_v53 = vadd.f32 %v427_v52, %v5077_v49 }
 0x11d   :  { %v456_v58 = vpack.c.bf16 %v428_v53, %v428_v53 }
 0x11f   :  { %v593_v59 = vsel %vm591_vm1, %v456_v58, 0 }
 0x120   :  { %599 = vmatpush.bf16.msra.mxu2 %v593_v59 }
 0x124   :  { %600 = vmatpush.bf16.msra.mxu2 %v455_v62 }
 0x126   :  { %527 = vmatmul.bf16.gmra.mxu1 %v5093_v63 }
 0x128   :  { %601 = vmatpush.bf16.msra.mxu2 %v454_v1 }
 0x12c   :  { %602 = vmatpush.bf16.msra.mxu2 %v453_v5  ;;  %v5130_v5 = vld [vmem:[%s7015_s2 + $0x50] sm:$0xff] }
 0x12d   :  { %7084 = vst [vmem:[#allocation24_spill] sm:$0xff] %v5130_v5 }
 0x136   :  { %532 = vmatmul.bf16.gmra.mxu1 %v5102_v6 }
 0x146   :  { %537 = vmatmul.bf16.gmra.mxu1 %v5105_v7 }
 0x156   :  { %542 = vmatmul.bf16.gmra.mxu1 %v5108_v8 }
 0x166   :  { %547 = vmatmul.bf16.gmra.mxu1 %v5111_v16 }
 0x176   :  { %552 = vmatmul.bf16.gmra.mxu1 %v5114_v17 }
 0x183   :  { %v518_v18 = vpop.f32.mrf.mxu1 }
 0x18b   :  { %v520_v19 = vpop.f32.mrf.mxu1 }
 0x18c   :  { %v558_v20 = vpack.c.bf16 %v520_v19, %v518_v18 }
 0x18e   :  { %3769 = vmatmul.msk.bf16.vlgmr.msra.gmra.mxu2 %vm566_vm2, %v558_v20  ;;  %v5139_v20 = vld [vmem:[%s7015_s2 + $0x58] sm:$0xff] }
 0x193   :  { %v523_v21 = vpop.f32.mrf.mxu1 }
 0x19b   :  { %v525_v23 = vpop.f32.mrf.mxu1 }
 0x19c   :  { %v559_v24 = vpack.c.bf16 %v525_v23, %v523_v21 }
 0x19e   :  { %3770 = vmatmul.msk.bf16.gmra.mxu2 %vm566_vm2, %v559_v24  ;;  %v5148_v24 = vld [vmem:[%s7015_s2 + $0x30] sm:$0xff] }
 0x19f   :  { %7085 = vst [vmem:[#allocation25_spill] sm:$0xff] %v5148_v24 }
 0x1a3   :  { %v528_v25 = vpop.f32.mrf.mxu1 }
 0x1ab   :  { %v530_v28 = vpop.f32.mrf.mxu1 }
 0x1ac   :  { %v560_v29 = vpack.c.bf16 %v530_v28, %v528_v25  ;;  %v5153_v25 = vld [vmem:[%s7015_s2 + $0x60] sm:$0xff] }
 0x1ae   :  { %3771 = vmatmul.msk.bf16.gmra.mxu2 %vm566_vm2, %v560_v29 }
 0x1b3   :  { %v533_v30 = vpop.f32.mrf.mxu1 }
 0x1bb   :  { %v535_v31 = vpop.f32.mrf.mxu1 }
 0x1bc   :  { %v561_v34 = vpack.c.bf16 %v535_v31, %v533_v30  ;;  %v5166_v31 = vld [vmem:[%s7015_s2 + $0x28] sm:$0xff] }
 0x1bd   :  { %7086 = vst [vmem:[#allocation26_spill] sm:$0xff] %v5166_v31 }
 0x1be   :  { %3772 = vmatmul.msk.bf16.gmra.mxu2 %vm566_vm2, %v561_v34  ;;  %v5171_v34 = vld [vmem:[%s7015_s2 + $0x68] sm:$0xff] }
 0x1bf   :  { %7087 = vst [vmem:[#allocation27_spill] sm:$0xff] %v5171_v34 }
 0x1c3   :  { %v538_v35 = vpop.f32.mrf.mxu1 }
 0x1cb   :  { %v540_v36 = vpop.f32.mrf.mxu1 }
 0x1cc   :  { %v562_v37 = vpack.c.bf16 %v540_v36, %v538_v35 }
 0x1ce   :  { %3773 = vmatmul.msk.bf16.gmra.mxu2 %vm566_vm2, %v562_v37 }
 0x1d3   :  { %v543_v40 = vpop.f32.mrf.mxu1 }
 0x1db   :  { %v545_v41 = vpop.f32.mrf.mxu1 }
 0x1dc   :  { %v563_v42 = vpack.c.bf16 %v545_v41, %v543_v40  ;;  %v5181_v40 = vld [vmem:[%s7015_s2 + $0x70] sm:$0xff]  ;;  %v5186_v41 = vld [vmem:[%s7015_s2 + $0x48] sm:$0xff] }
 0x1dd   :  { %7088 = vst [vmem:[#allocation28_spill] sm:$0xff] %v5181_v40 }
 0x1de   :  { %3774 = vmatmul.msk.bf16.gmra.mxu2 %vm566_vm2, %v563_v42  ;;  %7089 = vst [vmem:[#allocation29_spill] sm:$0xff] %v5186_v41 }
 0x1e3   :  { %v548_v43 = vpop.f32.mrf.mxu1 }
 0x1eb   :  { %v550_v44 = vpop.f32.mrf.mxu1 }
 0x1ec   :  { %v564_v46 = vpack.c.bf16 %v550_v44, %v548_v43 }
 0x1ee   :  { %3775 = vmatmul.msk.bf16.gmra.mxu2 %vm566_vm2, %v564_v46  ;;  %v5196_v46 = vld [vmem:[%s7015_s2 + $0x20] sm:$0xff] }
 0x1ef   :  { %7090 = vst [vmem:[#allocation30_spill] sm:$0xff] %v5196_v46 }
 0x1f3   :  { %v553_v47 = vpop.f32.mrf.mxu1 }
 0x1fb   :  { %v555_v52 = vpop.f32.mrf.mxu1 }
 0x1fc   :  { %v565_v53 = vpack.c.bf16 %v555_v52, %v553_v47  ;;  %v5201_v47 = vld [vmem:[%s7015_s2 + $0x78] sm:$0xff] }
 0x1fd   :  { %7091 = vst [vmem:[#allocation31_spill] sm:$0xff] %v5201_v47 }
 0x1fe   :  { %3776 = vmatmul.msk.bf16.gmra.mxu2 %vm566_vm2, %v565_v53 }
 0x211   :  { %v604_v54 = vpop.f32.mrf.mxu2 }
 0x219   :  { %v5125_v55 = vpop.f32.mrf.mxu2 }
 0x221   :  { %v609_v58 = vpop.f32.mrf.mxu2 }
 0x229   :  { %v611_v59 = vpop.f32.mrf.mxu2 }
 0x231   :  { %v614_v60 = vpop.f32.mrf.mxu2 }
 0x232   :  { %v5204_v53 = vadd.f32 %v614_v60, %v5196_v46 }
 0x239   :  { %v616_v61 = vpop.f32.mrf.mxu2 }
 0x23a   :  { %v5174_v36 = vadd.f32 %v616_v61, %v5166_v31 }
 0x241   :  { %v619_v62 = vpop.f32.mrf.mxu2 }
 0x242   :  { %v5156_v29 = vadd.f32 %v619_v62, %v5148_v24  ;;  %v5211_v62 = vld [vmem:[%s7015_s2 + $0x40] sm:$0xff] }
 0x243   :  { %7092 = vst [vmem:[#allocation32_spill] sm:$0xff] %v5211_v62 }
 0x249   :  { %v621_v1 = vpop.f32.mrf.mxu2 }
 0x251   :  { %v624_v3 = vpop.f32.mrf.mxu2 }
 0x259   :  { %v626_v4 = vpop.f32.mrf.mxu2 }
 0x25a   :  { %v5190_v44 = vadd.f32 %v626_v4, %v5186_v41  ;;  %v5216_v4 = vld [vmem:[%s7015_s2 + $0x18] sm:$0xff] }
 0x25b   :  { %7093 = vst [vmem:[#allocation33_spill] sm:$0xff] %v5216_v4  ;;  %v5220_v60 = vadd.f32 %v611_v59, %v5216_v4  ;;  %v5241_v59 = vld [vmem:[%s7015_s2 + $0x10] sm:$0xff] }
 0x25c   :  { %7096 = vst [vmem:[#allocation36_spill] sm:$0xff] %v5241_v59 }
 0x261   :  { %v629_v18 = vpop.f32.mrf.mxu2 }
 0x262   :  { %v5133_v19 = vadd.f32 %v629_v18, %v5130_v5  ;;  %v625_v18 = vadd.f32 %v624_v3, %v5211_v62 }
 0x264   :  { %664 = vmax.xlane.f32.xlu2 %v5133_v19 }
 0x269   :  { %v631_v21 = vpop.f32.mrf.mxu2 }
 0x26a   :  { %v5142_v23 = vadd.f32 %v631_v21, %v5139_v20  ;;  %v5226_v21 = vld [vmem:[%s7015_s2] sm:$0xff] }
 0x26b   :  { %7094 = vst [vmem:[#allocation34_spill] sm:$0xff] %v5226_v21 }
 0x26c   :  { %666 = vmax.xlane.f32.xlu2 %v5142_v23 }
 0x271   :  { %v634_v28 = vpop.f32.mrf.mxu2 }
 0x272   :  { %v5159_v30 = vadd.f32 %v634_v28, %v5153_v25  ;;  %v5231_v28 = vld [vmem:[%s7015_s2 + $0x38] sm:$0xff] }
 0x273   :  { %7095 = vst [vmem:[#allocation35_spill] sm:$0xff] %v5231_v28  ;;  %v622_v3 = vadd.f32 %v621_v1, %v5231_v28 }
 0x274   :  { %656 = vmax.xlane.f32.xlu2 %v5156_v29  ;;  %668 = vmax.xlane.f32.xlu1 %v5159_v30 }
 0x279   :  { %v636_v35 = vpop.f32.mrf.mxu2 }
 0x27a   :  { %v637_v37 = vadd.f32 %v636_v35, %v5171_v34  ;;  %v5234_v35 = vadd.f32 %v604_v54, %v5226_v21 }
 0x27c   :  { %654 = vmax.xlane.f32.xlu2 %v5174_v36  ;;  %670 = vmax.xlane.f32.xlu1 %v637_v37 }
 0x281   :  { %v639_v42 = vpop.f32.mrf.mxu2 }
 0x282   :  { %v640_v43 = vadd.f32 %v639_v42, %v5181_v40  ;;  %v5244_v42 = vadd.f32 %v609_v58, %v5241_v59 }
 0x284   :  { %662 = vmax.xlane.f32.xlu1 %v5190_v44  ;;  %672 = vmax.xlane.f32.xlu0 %v640_v43 }
 0x289   :  { %v641_v52 = vpop.f32.mrf.mxu2 }
 0x28a   :  { %v642_v61 = vadd.f32 %v641_v52, %v5201_v47 }
 0x28c   :  { %652 = vmax.xlane.f32.xlu1 %v5204_v53  ;;  %674 = vmax.xlane.f32.xlu0 %v642_v61 }
 0x294   :  { %650 = vmax.xlane.f32.xlu1 %v5220_v60  ;;  %660 = vmax.xlane.f32.xlu0 %v625_v18 }
 0x29c   :  { %644 = vmax.xlane.f32.xlu1 %v5234_v35  ;;  %658 = vmax.xlane.f32.xlu0 %v622_v3 }
 0x2a4   :  { %648 = vmax.xlane.f32.xlu0 %v5244_v42 }
 0x2d7   :  { %v665_v62 = vpop.xlane.xlu2 %664 }
 0x2d8   :  { %v686_v47 = vsub.f32 %v5133_v19, %v665_v62 }
 0x2e7   :  { %v669_v52 = vpop.xlane.xlu1 %668 }
 0x2ef   :  { %v671_v4 = vpop.xlane.xlu1 %670 }
 0x2f0   :  { %v689_v46 = vsub.f32 %v637_v37, %v671_v4  ;;  %v688_v37 = vsub.f32 %v5159_v30, %v669_v52  ;;  %v712_v4 = vmul.f32 1.442695, %v686_v47 }
 0x2f2   :  { %v718_v54 = vmul.f32 1.442695, %v689_v46 }
 0x2f4   :  { %3979 = vpow2.f32 %v718_v54 }
 0x2f7   :  { %v673_v21 = vpop.xlane.xlu0 %672  ;;  %v663_v46 = vpop.xlane.xlu1 %662 }
 0x2f8   :  { %v690_v1 = vsub.f32 %v640_v43, %v673_v21  ;;  %v667_v43 = vpop.xlane.xlu2 %666  ;;  %v685_v47 = vsub.f32 %v5190_v44, %v663_v46  ;;  %v5282_v46 = vld [vmem:[%s7016_s3 + $0x38] sm:$0xff] }
 0x2f9   :  { %v687_v62 = vsub.f32 %v5142_v23, %v667_v43  ;;  %3733 = vmatmul.msk.bf16.gmra.mxu0 %vm352_vm0, %v5282_v46 }
 0x2fa   :  { %v720_v28 = vmul.f32 1.442695, %v690_v1  ;;  %v5247_v41 = vpop.eup %3979 }
 0x2fb   :  { %750 = vadd.xlane.f32.xlu1 %v5247_v41 }
 0x2fc   :  { %3981 = vpow2.f32 %v720_v28  ;;  %v5258_v28 = vld [vmem:[%s7015_s2 + $0x8] sm:$0xff] }
 0x2fd   :  { %7097 = vst [vmem:[#allocation37_spill] sm:$0xff] %v5258_v28  ;;  %v5262_v19 = vadd.f32 %v5125_v55, %v5258_v28 }
 0x2ff   :  { %v675_v5 = vpop.xlane.xlu0 %674  ;;  %v653_v52 = vpop.xlane.xlu1 %652 }
 0x300   :  { %v691_v34 = vsub.f32 %v642_v61, %v675_v5  ;;  %v716_v5 = vmul.f32 1.442695, %v688_v37  ;;  %v657_v54 = vpop.xlane.xlu2 %656 }
 0x301   :  { %v682_v44 = vsub.f32 %v5156_v29, %v657_v54 }
 0x302   :  { %v722_v58 = vmul.f32 1.442695, %v691_v34  ;;  %v5250_v59 = vpop.eup %3981 }
 0x303   :  { %752 = vadd.xlane.f32.xlu2 %v5250_v59  ;;  %v704_v43 = vmul.f32 1.442695, %v682_v44 }
 0x304   :  { %3983 = vpow2.f32 %v722_v58  ;;  %v710_v58 = vmul.f32 1.442695, %v685_v47 }
 0x305   :  { %3985 = vpow2.f32 %v712_v4 }
 0x306   :  { %3987 = vpow2.f32 %v716_v5 }
 0x307   :  { %v661_v21 = vpop.xlane.xlu0 %660  ;;  %v651_v5 = vpop.xlane.xlu1 %650 }
 0x308   :  { %v684_v34 = vsub.f32 %v625_v18, %v661_v21  ;;  %v714_v18 = vmul.f32 1.442695, %v687_v62  ;;  %v655_v62 = vpop.xlane.xlu2 %654 }
 0x30a   :  { %v708_v61 = vmul.f32 1.442695, %v684_v34  ;;  %v5264_v30 = vpop.eup %3983 }
 0x30b   :  { %646 = vmax.xlane.f32.xlu2 %v5262_v19  ;;  %754 = vadd.xlane.f32.xlu0 %v5264_v30  ;;  %v5270_v37 = vpop.eup %3985 }
 0x30c   :  { %3989 = vpow2.f32 %v708_v61  ;;  %v5272_v21 = vpop.eup %3987 }
 0x30d   :  { %3991 = vpow2.f32 %v714_v18 }
 0x30e   :  { %3993 = vpow2.f32 %v710_v58 }
 0x30f   :  { %v659_v1 = vpop.xlane.xlu0 %658  ;;  %v645_v44 = vpop.xlane.xlu1 %644 }
 0x310   :  { %v683_v55 = vsub.f32 %v622_v3, %v659_v1  ;;  %v680_v3 = vsub.f32 %v5204_v53, %v653_v52  ;;  %v681_v53 = vsub.f32 %v5174_v36, %v655_v62  ;;  %v676_v36 = vsub.f32 %v5234_v35, %v645_v44  ;;  %v5322_v35 = vld [vmem:[%s7016_s3 + $0x40] sm:$0xff] }
 0x311   :  { %3734 = vmatmul.msk.bf16.gmra.mxu0 %vm352_vm0, %v5322_v35 }
 0x312   :  { %v706_v4 = vmul.f32 1.442695, %v683_v55  ;;  %v5274_v23 = vpop.eup %3989  ;;  %v700_v47 = vmul.f32 1.442695, %v680_v3  ;;  %v702_v52 = vmul.f32 1.442695, %v681_v53 }
 0x313   :  { %744 = vadd.xlane.f32.xlu2 %v5270_v37  ;;  %748 = vadd.xlane.f32.xlu0 %v5272_v21  ;;  %v5289_v61 = vpop.eup %3991 }
 0x314   :  { %3995 = vpow2.f32 %v706_v4  ;;  %740 = vadd.xlane.f32.xlu1 %v5274_v23  ;;  %v5291_v18 = vpop.eup %3993 }
 0x315   :  { %3997 = vpow2.f32 %v704_v43 }
 0x317   :  { %v649_v29 = vpop.xlane.xlu0 %648 }
 0x318   :  { %v678_v34 = vsub.f32 %v5244_v42, %v649_v29  ;;  %v679_v42 = vsub.f32 %v5220_v60, %v651_v5  ;;  %v692_v60 = vmul.f32 1.442695, %v676_v36 }
 0x31a   :  { %v696_v54 = vmul.f32 1.442695, %v678_v34  ;;  %v5293_v1 = vpop.eup %3995  ;;  %v698_v55 = vmul.f32 1.442695, %v679_v42  ;;  %v5329_v34 = vld [vmem:[%s7016_s3 + $0x48] sm:$0xff] }
 0x31b   :  { %742 = vadd.xlane.f32.xlu2 %v5291_v18  ;;  %746 = vadd.xlane.f32.xlu0 %v5289_v61  ;;  %v5300_v58 = vpop.eup %3997 }
 0x31c   :  { %3999 = vpow2.f32 %v696_v54  ;;  %738 = vadd.xlane.f32.xlu1 %v5293_v1 }
 0x31d   :  { %4001 = vpow2.f32 %v700_v47 }
 0x31e   :  { %4003 = vpow2.f32 %v702_v52 }
 0x31f   :  { %4005 = vpow2.f32 %v698_v55  ;;  %v200_v55 = vld [vmem:[%s7016_s3 + $0x50] sm:$0xf] }
 0x320   :  { %4007 = vpow2.f32 %v692_v60  ;;  %v340_v36 = vunpack.c.l.b16 %v200_v55 }
 0x321   :  { %3735 = vmatmul.msk.bf16.gmra.mxu0 %vm352_vm0, %v5329_v34 }
 0x322   :  { %v5302_v4 = vpop.eup %3999  ;;  %v5339_v40 = vpack.c.b16 %v340_v36, %v340_v36 }
 0x323   :  { %v5304_v3 = vpop.eup %4001  ;;  %736 = vadd.xlane.f32.xlu0 %v5300_v58 }
 0x324   :  { %732 = vadd.xlane.f32.xlu2 %v5304_v3  ;;  %728 = vadd.xlane.f32.xlu1 %v5302_v4  ;;  %v5310_v43 = vpop.eup %4003  ;;  %7098 = vst [vmem:[#allocation38_spill] sm:$0xff] %v5339_v40 }
 0x325   :  { %v5312_v29 = vpop.eup %4005 }
 0x326   :  { %v5316_v5 = vpop.eup %4007 }
 0x32b   :  { %734 = vadd.xlane.f32.xlu0 %v5310_v43 }
 0x32c   :  { %730 = vadd.xlane.f32.xlu2 %v5312_v29 }
 0x331   :  { %3736 = vmatmul.msk.bf16.gmra.mxu0 %vm352_vm0, %v5339_v40 }
 0x333   :  { %724 = vadd.xlane.f32.xlu0 %v5316_v5 }
 0x36e   :  { %v751_v44 = vpop.xlane.xlu1 %750 }
 0x376   :  { %v753_v62 = vpop.xlane.xlu2 %752 }
 0x377   :  { %4009 = vrcp.f32 %v753_v62 }
 0x37d   :  { %v4010_v52 = vpop.eup %4009 }
 0x37e   :  { %v647_v47 = vpop.xlane.xlu2 %646  ;;  %v755_v54 = vpop.xlane.xlu0 %754  ;;  %v786_v31 = vmul.f32 %v4010_v52, %v5250_v59 }
 0x37f   :  { %v677_v53 = vsub.f32 %v5262_v19, %v647_v47  ;;  %4011 = vrcp.f32 %v755_v54 }
 0x381   :  { %v694_v42 = vmul.f32 1.442695, %v677_v53 }
 0x383   :  { %4013 = vpow2.f32 %v694_v42 }
 0x384   :  { %4015 = vrcp.f32 %v751_v44 }
 0x385   :  { %v4012_v60 = vpop.eup %4011 }
 0x386   :  { %v749_v28 = vpop.xlane.xlu0 %748  ;;  %v787_v62 = vmul.f32 %v4012_v60, %v5264_v30  ;;  %v745_v19 = vpop.xlane.xlu2 %744 }
 0x387   :  { %4017 = vrcp.f32 %v749_v28 }
 0x388   :  { %v795_v47 = vpack.c.bf16 %v787_v62, %v786_v31  ;;  %4019 = vrcp.f32 %v745_v19  ;;  %v741_v31 = vpop.xlane.xlu1 %740 }
 0x389   :  { %v5343_v54 = vpop.eup %4013 }
 0x38a   :  { %726 = vadd.xlane.f32.xlu1 %v5343_v54  ;;  %796 = vmatpush.bf16.xpose.msrb.mxu0 %v795_v47  ;;  %v4016_v53 = vpop.eup %4015 }
 0x38b   :  { %3956 = vmatpush.bf16.xpose.msra.mxu3 %v795_v47  ;;  %v785_v52 = vmul.f32 %v4016_v53, %v5247_v41  ;;  %v1019_v41 = vld [vmem:[#allocation2 + $0x50] sm:$0xff]  ;;  %v1020_v53 = vld [vmem:[#allocation2 + $0x58] sm:$0xff] }
 0x38d   :  { %v4018_v59 = vpop.eup %4017 }
 0x38e   :  { %v747_v42 = vpop.xlane.xlu0 %746  ;;  %v784_v30 = vmul.f32 %v4018_v59, %v5272_v21  ;;  %v743_v55 = vpop.xlane.xlu2 %742 }
 0x38f   :  { %4021 = vrcp.f32 %v747_v42  ;;  %v4020_v36 = vpop.eup %4019  ;;  %v1017_v42 = vld [vmem:[#allocation2 + $0x40] sm:$0xff] }
 0x390   :  { %v794_v44 = vpack.c.bf16 %v785_v52, %v784_v30  ;;  %4023 = vrcp.f32 %v743_v55  ;;  %v782_v62 = vmul.f32 %v4020_v36, %v5270_v37  ;;  %v739_v21 = vpop.xlane.xlu1 %738  ;;  %v1023_v30 = vpack.c.bf16 %v1020_v53, %v1019_v41  ;;  %v1018_v52 = vld [vmem:[#allocation2 + $0x48] sm:$0xff]  ;;  %v1016_v36 = vld [vmem:[#allocation2 + $0x38] sm:$0xff] }
 0x391   :  { %4025 = vrcp.f32 %v741_v31  ;;  %v1022_v31 = vpack.c.bf16 %v1018_v52, %v1017_v42 }
 0x392   :  { %797 = vmatpush.bf16.xpose.msrb.mxu0 %v794_v44  ;;  %1029 = vmatpush.bf16.msrb.mxu1 %v1023_v30 }
 0x393   :  { %3957 = vmatpush.bf16.xpose.msra.mxu3 %v794_v44  ;;  %v1015_v44 = vld [vmem:[#allocation2 + $0x30] sm:$0xff] }
 0x395   :  { %v4022_v28 = vpop.eup %4021 }
 0x396   :  { %v737_v60 = vpop.xlane.xlu0 %736  ;;  %v783_v47 = vmul.f32 %v4022_v28, %v5289_v61  ;;  %v4024_v24 = vpop.eup %4023  ;;  %1030 = vmatpush.bf16.msrb.mxu1 %v1022_v31 }
 0x397   :  { %v4026_v59 = vpop.eup %4025  ;;  %4027 = vrcp.f32 %v737_v60  ;;  %v781_v55 = vmul.f32 %v4024_v24, %v5291_v18  ;;  %v733_v37 = vpop.xlane.xlu2 %732 }
 0x398   :  { %v793_v19 = vpack.c.bf16 %v783_v47, %v782_v62  ;;  %4029 = vrcp.f32 %v739_v21  ;;  %v780_v61 = vmul.f32 %v4026_v59, %v5274_v23  ;;  %v729_v53 = vpop.xlane.xlu1 %728 }
 0x39a   :  { %798 = vmatpush.bf16.xpose.msrb.mxu0 %v793_v19  ;;  %v792_v62 = vpack.c.bf16 %v781_v55, %v780_v61 }
 0x39b   :  { %3958 = vmatpush.bf16.xpose.msra.mxu3 %v793_v19  ;;  %v1021_v19 = vpack.c.bf16 %v1016_v36, %v1015_v44 }
 0x39d   :  { %v4028_v47 = vpop.eup %4027  ;;  %1031 = vmatpush.bf16.msrb.mxu1 %v1021_v19  ;;  %v5374_v19 = vld [vmem:[#allocation7 + $0x78] sm:$0xff] }
 0x39e   :  { %v735_v28 = vpop.xlane.xlu0 %734  ;;  %v4030_v60 = vpop.eup %4029  ;;  %v778_v41 = vmul.f32 %v4028_v47, %v5300_v58  ;;  %v5372_v47 = vld [vmem:[#allocation7 + $0x70] sm:$0xff] }
 0x39f   :  { %4031 = vrcp.f32 %v735_v28  ;;  %v779_v24 = vmul.f32 %v4030_v60, %v5293_v1  ;;  %v731_v18 = vpop.xlane.xlu2 %730  ;;  %v5378_v60 = vld [vmem:[#allocation7 + $0x88] sm:$0xff] }
 0x3a0   :  { %4033 = vrcp.f32 %v733_v37  ;;  %3807 = vmatmul.msk.bf16.vlgmr.msrb.gmra.mxu1 %vm352_vm0, %v5004_v9 }
 0x3a1   :  { %v791_v21 = vpack.c.bf16 %v779_v24, %v778_v41  ;;  %4035 = vrcp.f32 %v731_v18 }
 0x3a2   :  { %799 = vmatpush.bf16.xpose.msrb.mxu0 %v792_v62  ;;  %4037 = vrcp.f32 %v729_v53  ;;  %v5386_v53 = vld [vmem:[#allocation7 + $0x90] sm:$0xff] }
 0x3a3   :  { %3959 = vmatpush.bf16.xpose.msra.mxu3 %v792_v62 }
 0x3a5   :  { %v4032_v23 = vpop.eup %4031 }
 0x3a6   :  { %v4034_v42 = vpop.eup %4033  ;;  %v777_v59 = vmul.f32 %v4032_v23, %v5310_v43  ;;  %v430_v43 = vpop.f32.mrf.mxu0 }
 0x3a7   :  { %v776_v58 = vmul.f32 %v4034_v42, %v5304_v3  ;;  %v4036_v52 = vpop.eup %4035  ;;  %v431_v41 = vadd.f32 %v430_v43, %v5372_v47  ;;  %v5388_v42 = vld [vmem:[#allocation7 + $0x98] sm:$0xff] }
 0x3a8   :  { %v4038_v1 = vpop.eup %4037  ;;  %v775_v55 = vmul.f32 %v4036_v52, %v5312_v29  ;;  %v725_v29 = vpop.xlane.xlu0 %724  ;;  %v5394_v52 = vld [vmem:[#allocation7 + $0xa0] sm:$0xff] }
 0x3a9   :  { %v790_v30 = vpack.c.bf16 %v777_v59, %v776_v58  ;;  %v774_v9 = vmul.f32 %v4038_v1, %v5302_v4  ;;  %4039 = vrcp.f32 %v725_v29 }
 0x3aa   :  { %800 = vmatpush.bf16.xpose.msrb.mxu0 %v791_v21 }
 0x3ab   :  { %3960 = vmatpush.bf16.xpose.msra.mxu3 %v791_v21  ;;  %v789_v31 = vpack.c.bf16 %v775_v55, %v774_v9 }
 0x3ae   :  { %v432_v3 = vpop.f32.mrf.mxu0 }
 0x3af   :  { %v433_v24 = vadd.f32 %v432_v3, %v5374_v19 }
 0x3b0   :  { %3808 = vmatmul.msk.bf16.gmra.mxu1 %vm352_vm0, %v5011_v10 }
 0x3b1   :  { %v457_v21 = vpack.c.bf16 %v433_v24, %v431_v41 }
 0x3b2   :  { %801 = vmatpush.bf16.xpose.msrb.mxu0 %v790_v30 }
 0x3b3   :  { %3961 = vmatpush.bf16.xpose.msra.mxu3 %v790_v30 }
 0x3b6   :  { %v435_v37 = vpop.f32.mrf.mxu0 }
 0x3ba   :  { %802 = vmatpush.bf16.xpose.msrb.mxu0 %v789_v31 }
 0x3bb   :  { %3962 = vmatpush.bf16.xpose.msra.mxu3 %v789_v31 }
 0x3be   :  { %v437_v61 = vpop.f32.mrf.mxu0 }
 0x3c0   :  { %3809 = vmatmul.msk.bf16.gmra.mxu1 %vm352_vm0, %v5018_v11  ;;  %v4040_v11 = vpop.eup %4039 }
 0x3c1   :  { %v772_v28 = vmul.f32 %v4040_v11, %v5316_v5 }
 0x3c6   :  { %v440_v4 = vpop.f32.mrf.mxu0 }
 0x3c7   :  { %v441_v59 = vadd.f32 %v440_v4, %v5386_v53 }
 0x3ce   :  { %v442_v44 = vpop.f32.mrf.mxu0 }
 0x3cf   :  { %v443_v58 = vadd.f32 %v442_v44, %v5388_v42 }
 0x3d0   :  { %3810 = vmatmul.msk.bf16.gmra.mxu1 %vm352_vm0, %v5025_v12 }
 0x3d1   :  { %v459_v30 = vpack.c.bf16 %v443_v58, %v441_v59 }
 0x3d6   :  { %v445_v62 = vpop.f32.mrf.mxu0 }
 0x3de   :  { %v447_v18 = vpop.f32.mrf.mxu0 }
 0x3e0   :  { %3811 = vmatmul.msk.bf16.gmra.mxu1 %vm352_vm0, %v5032_v13  ;;  %v5376_v13 = vld [vmem:[#allocation7 + $0x80] sm:$0xff] }
 0x3e1   :  { %v436_v5 = vadd.f32 %v435_v37, %v5376_v13 }
 0x3f0   :  { %3812 = vmatmul.msk.bf16.gmra.mxu1 %vm352_vm0, %v5039_v14 }
 0x3fd   :  { %v727_v10 = vpop.xlane.xlu1 %726 }
 0x3fe   :  { %4041 = vrcp.f32 %v727_v10 }
 0x400   :  { %3813 = vmatmul.msk.bf16.gmra.mxu1 %vm352_vm0, %v5046_v15  ;;  %v446_v15 = vadd.f32 %v445_v62, %v5394_v52 }
 0x402   :  { %v460_v1 = vpack.c.bf16 %v446_v15, %v446_v15 }
 0x404   :  { %v4042_v36 = vpop.eup %4041 }
 0x405   :  { %v773_v12 = vmul.f32 %v4042_v36, %v5343_v54  ;;  %v438_v54 = vadd.f32 %v437_v61, %v5378_v60 }
 0x407   :  { %v788_v14 = vpack.c.bf16 %v773_v12, %v772_v28  ;;  %v458_v23 = vpack.c.bf16 %v438_v54, %v436_v5 }
 0x409   :  { %803 = vmatpush.bf16.xpose.msrb.mxu0 %v788_v14  ;;  %3963 = vmatpush.bf16.xpose.msra.mxu3 %v788_v14 }
 0x410   :  { %804 = vmatmul.bf16.vlgmr.msrb.gmra.mxu0 %v457_v21  ;;  %809 = vmatmul.bf16.vlgmr.msra.gmra.mxu3 %v458_v23 }
 0x411   :  { %3814 = vmatmul.msk.bf16.gmra.mxu1 %vm352_vm0, %v5282_v46 }
 0x41d   :  { %v5399_v55 = vpop.f32.mrf.mxu1 }
 0x420   :  { %814 = vmatmul.bf16.gmra.mxu3 %v459_v30 }
 0x421   :  { %3815 = vmatmul.msk.bf16.gmra.mxu1 %vm352_vm0, %v5322_v35 }
 0x425   :  { %v1035_v9 = vpop.f32.mrf.mxu1 }
 0x42d   :  { %v1038_v31 = vpop.f32.mrf.mxu1 }
 0x430   :  { %819 = vmatmul.bf16.gmra.mxu3 %v460_v1 }
 0x431   :  { %3816 = vmatmul.msk.bf16.gmra.mxu1 %vm352_vm0, %v5329_v34 }
 0x435   :  { %v1040_v46 = vpop.f32.mrf.mxu1 }
 0x43d   :  { %v1043_v43 = vpop.f32.mrf.mxu1 }
 0x441   :  { %3817 = vmatmul.msk.bf16.gmra.mxu1 %vm352_vm0, %v5339_v40 }
 0x445   :  { %v1045_v3 = vpop.f32.mrf.mxu1 }
 0x44d   :  { %v1048_v37 = vpop.f32.mrf.mxu1 }
 0x455   :  { %v1050_v61 = vpop.f32.mrf.mxu1 }
 0x456   :  { %v1051_v23 = vadd.f32 %v1050_v61, %v5097_v2 }
 0x45d   :  { %v1053_v4 = vpop.f32.mrf.mxu1 }
 0x45e   :  { %v1054_v59 = vadd.f32 %v1053_v4, %v5095_v0  ;;  %v3950_v4 = vld [vmem:[#allocation8] sm:$0xff] }
 0x465   :  { %v1055_v29 = vpop.f32.mrf.mxu1 }
 0x466   :  { %v1056_v5 = vadd.f32 %v1055_v29, %v5086_v56 }
 0x46d   :  { %v1058_v35 = vpop.f32.mrf.mxu1 }
 0x46e   :  { %v1059_v18 = vadd.f32 %v1058_v35, %v5088_v57  ;;  %v1049_v57 = vadd.f32 %v1048_v37, %v5050_v22  ;;  %v1044_v35 = vadd.f32 %v1043_v43, %v5055_v27  ;;  %v1041_v22 = vadd.f32 %v1040_v46, %v5059_v32 }
 0x470   :  { %v1092_v58 = vpack.c.bf16 %v1059_v18, %v1056_v5  ;;  %v1090_v0 = vpack.c.bf16 %v1049_v57, %v1049_v57  ;;  %v4379_v5 = vld [vmem:[#allocation2 + $0x18] sm:$0xff]  ;;  %v4380_v18 = vld [vmem:[#allocation2 + $0x10] sm:$0xff] }
 0x475   :  { %v1060_v44 = vpop.f32.mrf.mxu1 }
 0x476   :  { %v1061_v62 = vadd.f32 %v1060_v44, %v5079_v50  ;;  %v1046_v44 = vadd.f32 %v1045_v3, %v5053_v26  ;;  %v3952_v26 = vld [vmem:[#allocation8 + $0x10] sm:$0xff] }
 0x47d   :  { %v1063_v36 = vpop.f32.mrf.mxu1 }
 0x47e   :  { %v1064_v14 = vadd.f32 %v1063_v36, %v5081_v51  ;;  %v1089_v36 = vpack.c.bf16 %v1046_v44, %v1044_v35 }
 0x480   :  { %v1093_v21 = vpack.c.bf16 %v1064_v14, %v1061_v62  ;;  %v4378_v62 = vld [vmem:[#allocation2 + $0x28] sm:$0xff] }
 0x485   :  { %v1065_v12 = vpop.f32.mrf.mxu1 }
 0x486   :  { %v1066_v34 = vadd.f32 %v1065_v12, %v5077_v49  ;;  %v1091_v49 = vpack.c.bf16 %v1054_v59, %v1051_v23  ;;  %v1036_v12 = vadd.f32 %v1035_v9, %v5065_v38  ;;  %v263_v9 = vld [vmem:[#allocation10 + $0x18] sm:$0xff] }
 0x488   :  { %v1094_v41 = vpack.c.bf16 %v1066_v34, %v1066_v34 }
 0x48a   :  { %v1181_v24 = vsel %vm591_vm1, %v1094_v41, 0 }
 0x48b   :  { %1187 = vmatpush.bf16.msra.mxu0 %v1181_v24 }
 0x48d   :  { %v805_v51 = vpop.f32.mrf.mxu0 }
 0x48f   :  { %1188 = vmatpush.bf16.msra.mxu0 %v1093_v21 }
 0x493   :  { %v810_v10 = vpop.f32.mrf.mxu3  ;;  %1189 = vmatpush.bf16.msra.mxu0 %v1092_v58  ;;  %v4381_v58 = vld [vmem:[#allocation2 + $0x8] sm:$0xff] }
 0x495   :  { %v807_v2 = vpop.f32.mrf.mxu0 }
 0x496   :  { %v824_v61 = vpack.c.bf16 %v807_v2, %v805_v51 }
 0x497   :  { %1190 = vmatpush.bf16.msra.mxu0 %v1091_v49 }
 0x49b   :  { %v812_v11 = vpop.f32.mrf.mxu3 }
 0x49c   :  { %v825_v29 = vpack.c.bf16 %v812_v11, %v810_v10  ;;  %v3951_v10 = vld [vmem:[#allocation8 + $0x8] sm:$0xff]  ;;  %v1034_v11 = vadd.f32 %v5399_v55, %v5067_v39 }
 0x49e   :  { %v1087_v27 = vpack.c.bf16 %v1036_v12, %v1034_v11 }
 0x4a3   :  { %v815_v28 = vpop.f32.mrf.mxu3 }
 0x4ab   :  { %v817_v54 = vpop.f32.mrf.mxu3 }
 0x4ac   :  { %v826_v56 = vpack.c.bf16 %v817_v54, %v815_v28  ;;  %v1039_v28 = vadd.f32 %v1038_v31, %v5061_v33 }
 0x4ae   :  { %v1088_v37 = vpack.c.bf16 %v1041_v22, %v1039_v28 }
 0x4b3   :  { %v820_v50 = vpop.f32.mrf.mxu3 }
 0x4b4   :  { %v827_v30 = vpack.c.bf16 %v820_v50, %v820_v50  ;;  %v4382_v50 = vld [vmem:[#allocation2] sm:$0xff] }
 0x4b6   :  { %v853_v15 = vsel %vm591_vm1, %v827_v30, 0 }
 0x4b7   :  { %859 = vmatpush.bf16.msrb.mxu3 %v853_v15 }
 0x4bb   :  { %v822_v1 = vpop.f32.mrf.mxu3  ;;  %860 = vmatpush.bf16.msrb.mxu3 %v826_v56 }
 0x4bf   :  { %861 = vmatpush.bf16.msrb.mxu3 %v825_v29 }
 0x4c3   :  { %862 = vmatpush.bf16.msrb.mxu3 %v824_v61 }
 0x4c6   :  { %3789 = vmatmul.msk.bf16.vlgmr.msrb.gmra.mxu3 %vm566_vm2, %v3950_v4 }
 0x4c7   :  { %1103 = vmatpush.bf16.xpose.msra.mxu3 %v1090_v0 }
 0x4cf   :  { %1104 = vmatpush.bf16.xpose.msra.mxu3 %v1089_v36 }
 0x4d6   :  { %3790 = vmatmul.msk.bf16.gmra.mxu3 %vm566_vm2, %v3951_v10 }
 0x4d7   :  { %1105 = vmatpush.bf16.xpose.msra.mxu3 %v1088_v37 }
 0x4df   :  { %1106 = vmatpush.bf16.xpose.msra.mxu3 %v1087_v27 }
 0x4e6   :  { %3791 = vmatmul.msk.bf16.gmra.mxu3 %vm566_vm2, %v3952_v26 }
 0x4f6   :  { %1107 = vmatmul.bf16.vlgmr.msra.gmra.mxu3 %v5071_v45  ;;  %v264_v45 = vld [vmem:[#allocation10 + $0x20] sm:$0xff] }
 0x506   :  { %1112 = vmatmul.bf16.gmra.mxu3 %v5074_v48  ;;  %v265_v48 = vld [vmem:[#allocation10 + $0x28] sm:$0xff] }
 0x516   :  { %1117 = vmatmul.bf16.gmra.mxu3 %v5093_v63  ;;  %v262_v63 = vld [vmem:[#allocation10 + $0x10] sm:$0xff] }
 0x526   :  { %1122 = vmatmul.bf16.gmra.mxu3 %v5102_v6 }
 0x536   :  { %1127 = vmatmul.bf16.gmra.mxu3 %v5105_v7  ;;  %v261_v7 = vld [vmem:[#allocation10 + $0x8] sm:$0xff] }
 0x546   :  { %1132 = vmatmul.bf16.gmra.mxu3 %v5108_v8  ;;  %v4377_v8 = vld [vmem:[#allocation2 + $0x20] sm:$0xff] }
 0x549   :  { %v864_v32 = vpop.f32.mrf.mxu3 }
 0x551   :  { %v866_v33 = vpop.f32.mrf.mxu3 }
 0x552   :  { %v867_v41 = vadd.f32 %v866_v33, %v261_v7 }
 0x554   :  { %v880_v49 = vadd.f32 %v4381_v58, %v867_v41  ;;  %v7099_v41 = vld [vmem:[#allocation25_spill] sm:$0xff]  ;;  %v7104_v58 = vld [vmem:[#allocation24_spill] sm:$0xff] }
 0x556   :  { %1137 = vmatmul.bf16.gmra.mxu3 %v5111_v16  ;;  %v260_v16 = vld [vmem:[#allocation10] sm:$0xff] }
 0x557   :  { %v865_v54 = vadd.f32 %v864_v32, %v260_v16 }
 0x559   :  { %v869_v38 = vpop.f32.mrf.mxu3  ;;  %v879_v51 = vadd.f32 %v4382_v50, %v865_v54  ;;  %v7105_v50 = vld [vmem:[#allocation32_spill] sm:$0xff] }
 0x55a   :  { %v870_v3 = vadd.f32 %v869_v38, %v262_v63 }
 0x55b   :  { %v885_v30 = vpack.c.bf16 %v880_v49, %v879_v51 }
 0x55c   :  { %v881_v21 = vadd.f32 %v4380_v18, %v870_v3  ;;  %v7101_v18 = vld [vmem:[#allocation26_spill] sm:$0xff] }
 0x561   :  { %v871_v39 = vpop.f32.mrf.mxu3 }
 0x562   :  { %v872_v6 = vadd.f32 %v871_v39, %v263_v9 }
 0x566   :  { %1142 = vmatmul.bf16.gmra.mxu3 %v5114_v17  ;;  %v882_v17 = vadd.f32 %v4379_v5, %v872_v6  ;;  %v7100_v5 = vld [vmem:[#allocation28_spill] sm:$0xff] }
 0x568   :  { %v886_v59 = vpack.c.bf16 %v882_v17, %v881_v21 }
 0x569   :  { %v874_v55 = vpop.f32.mrf.mxu3 }
 0x56a   :  { %v875_v31 = vadd.f32 %v874_v55, %v264_v45 }
 0x56c   :  { %v883_v34 = vadd.f32 %v4377_v8, %v875_v31 }
 0x571   :  { %v876_v46 = vpop.f32.mrf.mxu3 }
 0x572   :  { %v877_v43 = vadd.f32 %v876_v46, %v265_v48 }
 0x574   :  { %v884_v14 = vadd.f32 %v4378_v62, %v877_v43 }
 0x576   :  { %v887_v24 = vpack.c.bf16 %v884_v14, %v883_v34 }
 0x578   :  { %917 = vmatpush.bf16.msrb.mxu2 %v887_v24 }
 0x579   :  { %v1108_v23 = vpop.f32.mrf.mxu3 }
 0x57c   :  { %918 = vmatpush.bf16.msrb.mxu2 %v886_v59  ;;  %v7103_v59 = vld [vmem:[#allocation27_spill] sm:$0xff] }
 0x580   :  { %919 = vmatpush.bf16.msrb.mxu2 %v885_v30  ;;  %v7106_v30 = vld [vmem:[#allocation29_spill] sm:$0xff] }
 0x581   :  { %v1110_v15 = vpop.f32.mrf.mxu3 }
 0x582   :  { %v1148_v56 = vpack.c.bf16 %v1110_v15, %v1108_v23 }
 0x584   :  { %3818 = vmatmul.msk.bf16.vlgmr.msra.gmra.mxu0 %vm566_vm2, %v1148_v56  ;;  %v7107_v56 = vld [vmem:[#allocation35_spill] sm:$0xff] }
 0x589   :  { %v1113_v1 = vpop.f32.mrf.mxu3 }
 0x591   :  { %v1115_v57 = vpop.f32.mrf.mxu3 }
 0x592   :  { %v1149_v29 = vpack.c.bf16 %v1115_v57, %v1113_v1  ;;  %v7108_v57 = vld [vmem:[#allocation30_spill] sm:$0xff] }
 0x594   :  { %3819 = vmatmul.msk.bf16.gmra.mxu0 %vm566_vm2, %v1149_v29 }
 0x599   :  { %v1118_v2 = vpop.f32.mrf.mxu3 }
 0x5a1   :  { %v1120_v0 = vpop.f32.mrf.mxu3 }
 0x5a2   :  { %v1150_v61 = vpack.c.bf16 %v1120_v0, %v1118_v2  ;;  %v7109_v2 = vld [vmem:[#allocation36_spill] sm:$0xff] }
 0x5a4   :  { %3820 = vmatmul.msk.bf16.gmra.mxu0 %vm566_vm2, %v1150_v61  ;;  %v7110_v61 = vld [vmem:[#allocation33_spill] sm:$0xff] }
 0x5a9   :  { %v1123_v4 = vpop.f32.mrf.mxu3 }
 0x5b1   :  { %v1125_v35 = vpop.f32.mrf.mxu3 }
 0x5b2   :  { %v1151_v44 = vpack.c.bf16 %v1125_v35, %v1123_v4  ;;  %v7111_v35 = vld [vmem:[#allocation34_spill] sm:$0xff] }
 0x5b4   :  { %3821 = vmatmul.msk.bf16.gmra.mxu0 %vm566_vm2, %v1151_v44 }
 0x5b9   :  { %v1128_v36 = vpop.f32.mrf.mxu3 }
 0x5c1   :  { %v1130_v28 = vpop.f32.mrf.mxu3 }
 0x5c2   :  { %v1152_v22 = vpack.c.bf16 %v1130_v28, %v1128_v36 }
 0x5c4   :  { %3822 = vmatmul.msk.bf16.gmra.mxu0 %vm566_vm2, %v1152_v22 }
 0x5c9   :  { %v1133_v37 = vpop.f32.mrf.mxu3 }
 0x5d1   :  { %v1135_v10 = vpop.f32.mrf.mxu3 }
 0x5d2   :  { %v1153_v11 = vpack.c.bf16 %v1135_v10, %v1133_v37 }
 0x5d4   :  { %3823 = vmatmul.msk.bf16.gmra.mxu0 %vm566_vm2, %v1153_v11 }
 0x5d9   :  { %v1138_v12 = vpop.f32.mrf.mxu3 }
 0x5e1   :  { %v1140_v27 = vpop.f32.mrf.mxu3 }
 0x5e2   :  { %v1154_v26 = vpack.c.bf16 %v1140_v27, %v1138_v12 }
 0x5e4   :  { %3824 = vmatmul.msk.bf16.gmra.mxu0 %vm566_vm2, %v1154_v26 }
 0x5e9   :  { %v1143_v32 = vpop.f32.mrf.mxu3 }
 0x5f1   :  { %v1145_v33 = vpop.f32.mrf.mxu3 }
 0x5f2   :  { %v1155_v38 = vpack.c.bf16 %v1145_v33, %v1143_v32 }
 0x5f4   :  { %3825 = vmatmul.msk.bf16.gmra.mxu0 %vm566_vm2, %v1155_v38 }
 0x601   :  { %v1192_v39 = vpop.f32.mrf.mxu0 }
 0x602   :  { %v5476_v44 = vadd.f32 %v1192_v39, %v7111_v35 }
 0x609   :  { %v5441_v55 = vpop.f32.mrf.mxu0 }
 0x611   :  { %v1197_v45 = vpop.f32.mrf.mxu0 }
 0x612   :  { %v5467_v0 = vadd.f32 %v1197_v45, %v7109_v2 }
 0x619   :  { %v1199_v9 = vpop.f32.mrf.mxu0 }
 0x61a   :  { %v5472_v4 = vadd.f32 %v1199_v9, %v7110_v61 }
 0x621   :  { %v1202_v48 = vpop.f32.mrf.mxu0 }
 0x622   :  { %v5464_v29 = vadd.f32 %v1202_v48, %v7108_v57 }
 0x629   :  { %v1204_v31 = vpop.f32.mrf.mxu0 }
 0x62a   :  { %v5454_v21 = vadd.f32 %v1204_v31, %v7101_v18 }
 0x631   :  { %v1207_v63 = vpop.f32.mrf.mxu0 }
 0x632   :  { %v5449_v24 = vadd.f32 %v1207_v63, %v7099_v41 }
 0x639   :  { %v1209_v46 = vpop.f32.mrf.mxu0 }
 0x63a   :  { %v1210_v1 = vadd.f32 %v1209_v46, %v7107_v56 }
 0x641   :  { %v1212_v6 = vpop.f32.mrf.mxu0 }
 0x642   :  { %v1213_v51 = vadd.f32 %v1212_v6, %v7105_v50  ;;  %v7112_v6 = vld [vmem:[#allocation37_spill] sm:$0xff] }
 0x649   :  { %v1214_v43 = vpop.f32.mrf.mxu0 }
 0x64a   :  { %v1215_v15 = vadd.f32 %v1214_v43, %v7106_v30  ;;  %v5484_v43 = vadd.f32 %v5441_v55, %v7112_v6 }
 0x651   :  { %v1217_v7 = vpop.f32.mrf.mxu0 }
 0x652   :  { %v1218_v49 = vadd.f32 %v1217_v7, %v7104_v58 }
 0x659   :  { %v1219_v3 = vpop.f32.mrf.mxu0 }
 0x65a   :  { %v5445_v14 = vadd.f32 %v1219_v3, %v5139_v20 }
 0x661   :  { %v1222_v8 = vpop.f32.mrf.mxu0 }
 0x662   :  { %v1223_v34 = vadd.f32 %v1222_v8, %v5153_v25  ;;  %v7102_v25 = vld [vmem:[#allocation31_spill] sm:$0xff] }
 0x664   :  { %1256 = vmax.xlane.f32.xlu1 %v1223_v34 }
 0x669   :  { %v1224_v62 = vpop.f32.mrf.mxu0 }
 0x66a   :  { %v1225_v20 = vadd.f32 %v1224_v62, %v7103_v59 }
 0x66c   :  { %1254 = vmax.xlane.f32.xlu1 %v5445_v14 }
 0x671   :  { %v1227_v16 = vpop.f32.mrf.mxu0 }
 0x672   :  { %v1228_v17 = vadd.f32 %v1227_v16, %v7100_v5 }
 0x674   :  { %1244 = vmax.xlane.f32.xlu1 %v5449_v24  ;;  %1260 = vmax.xlane.f32.xlu2 %v1228_v17 }
 0x679   :  { %v1229_v54 = vpop.f32.mrf.mxu0 }
 0x67a   :  { %v1230_v23 = vadd.f32 %v1229_v54, %v7102_v25 }
 0x67c   :  { %1242 = vmax.xlane.f32.xlu1 %v5454_v21  ;;  %1262 = vmax.xlane.f32.xlu0 %v1230_v23 }
 0x67d   :  { %1258 = vmax.xlane.f32.xlu2 %v1225_v20 }
 0x684   :  { %1252 = vmax.xlane.f32.xlu0 %v1218_v49 }
 0x685   :  { %1248 = vmax.xlane.f32.xlu2 %v1213_v51 }
 0x68c   :  { %1250 = vmax.xlane.f32.xlu0 %v1215_v15 }
 0x68d   :  { %1246 = vmax.xlane.f32.xlu2 %v1210_v1 }
 0x694   :  { %1240 = vmax.xlane.f32.xlu0 %v5464_v29 }
 0x695   :  { %1236 = vmax.xlane.f32.xlu2 %v5467_v0 }
 0x69c   :  { %1238 = vmax.xlane.f32.xlu0 %v5472_v4 }
 0x6a4   :  { %1232 = vmax.xlane.f32.xlu0 %v5476_v44 }
 0x6d7   :  { %v1257_v37 = vpop.xlane.xlu1 %1256 }
 0x6d8   :  { %v1276_v33 = vsub.f32 %v1223_v34, %v1257_v37 }
 0x6da   :  { %v1304_v45 = vmul.f32 1.442695, %v1276_v33  ;;  %v5544_v33 = vld [vmem:[#allocation11 + $0x10] sm:$0xff] }
 0x6df   :  { %v1255_v39 = vpop.xlane.xlu1 %1254 }
 0x6e0   :  { %v1275_v3 = vsub.f32 %v5445_v14, %v1255_v39 }
 0x6e2   :  { %v1302_v62 = vmul.f32 1.442695, %v1275_v3 }
 0x6e7   :  { %v1261_v36 = vpop.xlane.xlu2 %1260  ;;  %v1245_v55 = vpop.xlane.xlu1 %1244 }
 0x6e8   :  { %v1278_v28 = vsub.f32 %v1228_v17, %v1261_v36 }
 0x6ea   :  { %v1308_v22 = vmul.f32 1.442695, %v1278_v28 }
 0x6ec   :  { %4043 = vpow2.f32 %v1308_v22 }
 0x6ef   :  { %v1263_v10 = vpop.xlane.xlu0 %1262 }
 0x6f0   :  { %v1279_v11 = vsub.f32 %v1230_v23, %v1263_v10  ;;  %v1259_v12 = vpop.xlane.xlu2 %1258  ;;  %v1270_v23 = vsub.f32 %v5449_v24, %v1245_v55  ;;  %v1243_v24 = vpop.xlane.xlu1 %1242 }
 0x6f1   :  { %v1277_v27 = vsub.f32 %v1225_v20, %v1259_v12 }
 0x6f2   :  { %v1310_v26 = vmul.f32 1.442695, %v1279_v11  ;;  %v5479_v32 = vpop.eup %4043  ;;  %v1292_v20 = vmul.f32 1.442695, %v1270_v23 }
 0x6f3   :  { %v1306_v38 = vmul.f32 1.442695, %v1277_v27  ;;  %1340 = vadd.xlane.f32.xlu1 %v5479_v32  ;;  %v5536_v27 = vld [vmem:[#allocation11] sm:$0xff] }
 0x6f4   :  { %4045 = vpow2.f32 %v1310_v26  ;;  %3804 = vmatmul.msk.bf16.vlgmr.msrb.gmra.mxu2 %vm352_vm0, %v5536_v27 }
 0x6f5   :  { %4047 = vpow2.f32 %v1306_v38 }
 0x6f6   :  { %4049 = vpow2.f32 %v1304_v45 }
 0x6f7   :  { %v1253_v9 = vpop.xlane.xlu0 %1252 }
 0x6f8   :  { %v1274_v48 = vsub.f32 %v1218_v49, %v1253_v9  ;;  %v1249_v31 = vpop.xlane.xlu2 %1248 }
 0x6f9   :  { %v1272_v63 = vsub.f32 %v1213_v51, %v1249_v31 }
 0x6fa   :  { %v1300_v46 = vmul.f32 1.442695, %v1274_v48  ;;  %v5486_v7 = vpop.eup %4045 }
 0x6fb   :  { %v1296_v8 = vmul.f32 1.442695, %v1272_v63  ;;  %v5489_v34 = vpop.eup %4047  ;;  %1342 = vadd.xlane.f32.xlu2 %v5486_v7  ;;  %1234 = vmax.xlane.f32.xlu1 %v5484_v43 }
 0x6fc   :  { %4051 = vpow2.f32 %v1300_v46  ;;  %1338 = vadd.xlane.f32.xlu0 %v5489_v34  ;;  %v5494_v17 = vpop.eup %4049 }
 0x6fd   :  { %4053 = vpow2.f32 %v1296_v8 }
 0x6fe   :  { %4055 = vpow2.f32 %v1302_v62 }
 0x6ff   :  { %v1251_v16 = vpop.xlane.xlu0 %1250 }
 0x700   :  { %v1273_v41 = vsub.f32 %v1215_v15, %v1251_v16  ;;  %v1247_v5 = vpop.xlane.xlu2 %1246 }
 0x701   :  { %v1271_v54 = vsub.f32 %v1210_v1, %v1247_v5 }
 0x702   :  { %v5496_v14 = vpop.eup %4051  ;;  %v1298_v18 = vmul.f32 1.442695, %v1273_v41 }
 0x703   :  { %v5498_v25 = vpop.eup %4053  ;;  %v1294_v59 = vmul.f32 1.442695, %v1271_v54  ;;  %1336 = vadd.xlane.f32.xlu2 %v5494_v17  ;;  %1332 = vadd.xlane.f32.xlu1 %v5496_v14 }
 0x704   :  { %4057 = vpow2.f32 %v1298_v18  ;;  %1328 = vadd.xlane.f32.xlu0 %v5498_v25  ;;  %v5505_v51 = vpop.eup %4055 }
 0x705   :  { %4059 = vpow2.f32 %v1294_v59 }
 0x706   :  { %4061 = vpow2.f32 %v1292_v20 }
 0x707   :  { %v1241_v58 = vpop.xlane.xlu0 %1240 }
 0x708   :  { %v1268_v49 = vsub.f32 %v5464_v29, %v1241_v58  ;;  %v1237_v50 = vpop.xlane.xlu2 %1236  ;;  %v1269_v29 = vsub.f32 %v5454_v21, %v1243_v24 }
 0x709   :  { %v1266_v30 = vsub.f32 %v5467_v0, %v1237_v50 }
 0x70a   :  { %v5508_v15 = vpop.eup %4057  ;;  %v1288_v56 = vmul.f32 1.442695, %v1268_v49  ;;  %v1290_v35 = vmul.f32 1.442695, %v1269_v29 }
 0x70b   :  { %v5510_v1 = vpop.eup %4059  ;;  %v1284_v57 = vmul.f32 1.442695, %v1266_v30  ;;  %1334 = vadd.xlane.f32.xlu2 %v5505_v51  ;;  %1330 = vadd.xlane.f32.xlu1 %v5508_v15 }
 0x70c   :  { %4063 = vpow2.f32 %v1288_v56  ;;  %1326 = vadd.xlane.f32.xlu0 %v5510_v1  ;;  %v5517_v61 = vpop.eup %4061  ;;  %v1551_v56 = vld [vmem:[#allocation2 + $0x70] sm:$0xff] }
 0x70d   :  { %4065 = vpow2.f32 %v1284_v57 }
 0x70f   :  { %v1239_v2 = vpop.xlane.xlu0 %1238 }
 0x710   :  { %v1267_v0 = vsub.f32 %v5472_v4, %v1239_v2  ;;  %v1552_v2 = vld [vmem:[#allocation2 + $0x78] sm:$0xff] }
 0x712   :  { %v5519_v36 = vpop.eup %4063  ;;  %v1286_v28 = vmul.f32 1.442695, %v1267_v0 }
 0x713   :  { %v5521_v22 = vpop.eup %4065  ;;  %1324 = vadd.xlane.f32.xlu2 %v5517_v61  ;;  %1320 = vadd.xlane.f32.xlu1 %v5519_v36 }
 0x714   :  { %4067 = vpow2.f32 %v1286_v28  ;;  %1316 = vadd.xlane.f32.xlu0 %v5521_v22 }
 0x715   :  { %4069 = vpow2.f32 %v1290_v35  ;;  %v1556_v35 = vpack.c.bf16 %v1552_v2, %v1551_v56  ;;  %v4388_v56 = vld [vmem:[%s7016_s3 + $0x28] sm:$0xff] }
 0x717   :  { %v1233_v21 = vpop.xlane.xlu0 %1232 }
 0x718   :  { %v1264_v37 = vsub.f32 %v5476_v44, %v1233_v21  ;;  %v5540_v44 = vld [vmem:[#allocation11 + $0x8] sm:$0xff] }
 0x719   :  { %3805 = vmatmul.msk.bf16.gmra.mxu2 %vm352_vm0, %v5540_v44  ;;  %v1550_v21 = vld [vmem:[#allocation2 + $0x68] sm:$0xff] }
 0x71a   :  { %v5527_v4 = vpop.eup %4067  ;;  %v1280_v10 = vmul.f32 1.442695, %v1264_v37 }
 0x71b   :  { %v5529_v11 = vpop.eup %4069  ;;  %1318 = vadd.xlane.f32.xlu1 %v5527_v4 }
 0x71c   :  { %4071 = vpow2.f32 %v1280_v10  ;;  %1322 = vadd.xlane.f32.xlu2 %v5529_v11 }
 0x722   :  { %v5533_v12 = vpop.eup %4071 }
 0x724   :  { %1312 = vadd.xlane.f32.xlu2 %v5533_v12 }
 0x729   :  { %3806 = vmatmul.msk.bf16.gmra.mxu2 %vm352_vm0, %v5544_v33 }
 0x766   :  { %v1341_v26 = vpop.xlane.xlu1 %1340 }
 0x767   :  { %4073 = vrcp.f32 %v1341_v26 }
 0x76d   :  { %v4074_v48 = vpop.eup %4073 }
 0x76e   :  { %v1235_v38 = vpop.xlane.xlu1 %1234  ;;  %v1343_v39 = vpop.xlane.xlu2 %1342  ;;  %v1374_v46 = vmul.f32 %v4074_v48, %v5479_v32 }
 0x76f   :  { %v1265_v45 = vsub.f32 %v5484_v43, %v1235_v38  ;;  %4075 = vrcp.f32 %v1343_v39  ;;  %v1339_v31 = vpop.xlane.xlu0 %1338 }
 0x771   :  { %v1282_v9 = vmul.f32 1.442695, %v1265_v45 }
 0x773   :  { %4077 = vpow2.f32 %v1282_v9 }
 0x774   :  { %4079 = vrcp.f32 %v1339_v31 }
 0x775   :  { %v4076_v63 = vpop.eup %4075 }
 0x776   :  { %v1375_v6 = vmul.f32 %v4076_v63, %v5486_v7  ;;  %v1337_v3 = vpop.xlane.xlu2 %1336  ;;  %v1333_v8 = vpop.xlane.xlu1 %1332 }
 0x777   :  { %4081 = vrcp.f32 %v1337_v3  ;;  %v1329_v7 = vpop.xlane.xlu0 %1328 }
 0x778   :  { %v1383_v62 = vpack.c.bf16 %v1375_v6, %v1374_v46  ;;  %4083 = vrcp.f32 %v1333_v8 }
 0x779   :  { %v5551_v16 = vpop.eup %4077 }
 0x77a   :  { %1314 = vadd.xlane.f32.xlu0 %v5551_v16  ;;  %1384 = vmatpush.bf16.xpose.msra.mxu2 %v1383_v62  ;;  %v4080_v43 = vpop.eup %4079 }
 0x77b   :  { %v1373_v32 = vmul.f32 %v4080_v43, %v5489_v34  ;;  %v1554_v34 = vld [vmem:[#allocation2 + $0x88] sm:$0xff] }
 0x77d   :  { %v4082_v41 = vpop.eup %4081 }
 0x77e   :  { %v1335_v55 = vpop.xlane.xlu2 %1334  ;;  %v1372_v5 = vmul.f32 %v4082_v41, %v5494_v17  ;;  %v1331_v54 = vpop.xlane.xlu1 %1330  ;;  %v1553_v17 = vld [vmem:[#allocation2 + $0x80] sm:$0xff]  ;;  %v4384_v41 = vld [vmem:[%s7016_s3 + $0x8] sm:$0xff] }
 0x77f   :  { %4085 = vrcp.f32 %v1335_v55  ;;  %v4084_v23 = vpop.eup %4083  ;;  %v1327_v24 = vpop.xlane.xlu0 %1326  ;;  %v1557_v29 = vpack.c.bf16 %v1554_v34, %v1553_v17 }
 0x780   :  { %v1382_v18 = vpack.c.bf16 %v1373_v32, %v1372_v5  ;;  %4087 = vrcp.f32 %v1331_v54  ;;  %v1370_v58 = vmul.f32 %v4084_v23, %v5496_v14  ;;  %v5586_v23 = vld [vmem:[#allocation13] sm:$0xff] }
 0x781   :  { %4089 = vrcp.f32 %v1329_v7  ;;  %1563 = vmatpush.bf16.msrb.mxu0 %v1557_v29  ;;  %v4387_v7 = vld [vmem:[%s7016_s3 + $0x20] sm:$0xff] }
 0x782   :  { %1385 = vmatpush.bf16.xpose.msra.mxu2 %v1382_v18 }
 0x785   :  { %v4086_v59 = vpop.eup %4085  ;;  %1564 = vmatpush.bf16.msrb.mxu0 %v1556_v35  ;;  %v5602_v35 = vld [vmem:[#allocation13 + $0x20] sm:$0xff] }
 0x786   :  { %v1325_v20 = vpop.xlane.xlu2 %1324  ;;  %v1371_v49 = vmul.f32 %v4086_v59, %v5505_v51  ;;  %v4088_v30 = vpop.eup %4087  ;;  %v1549_v51 = vld [vmem:[#allocation2 + $0x60] sm:$0xff] }
 0x787   :  { %v4090_v57 = vpop.eup %4089  ;;  %4091 = vrcp.f32 %v1325_v20  ;;  %v1369_v0 = vmul.f32 %v4088_v30, %v5508_v15  ;;  %v1321_v28 = vpop.xlane.xlu1 %1320  ;;  %v1555_v38 = vpack.c.bf16 %v1550_v21, %v1549_v51  ;;  %v5588_v59 = vld [vmem:[#allocation13 + $0x8] sm:$0xff] }
 0x788   :  { %v1381_v50 = vpack.c.bf16 %v1371_v49, %v1370_v58  ;;  %4093 = vrcp.f32 %v1327_v24  ;;  %v1368_v14 = vmul.f32 %v4090_v57, %v5498_v25  ;;  %v4383_v25 = vld [vmem:[%s7016_s3] sm:$0xff]  ;;  %v1317_v63 = vpop.xlane.xlu0 %1316  ;;  %v5592_v49 = vld [vmem:[#allocation13 + $0x10] sm:$0xff]  ;;  %v5599_v57 = vld [vmem:[#allocation13 + $0x18] sm:$0xff] }
 0x789   :  { %1565 = vmatpush.bf16.msrb.mxu0 %v1555_v38 }
 0x78a   :  { %1386 = vmatpush.bf16.xpose.msra.mxu2 %v1381_v50  ;;  %v1380_v10 = vpack.c.bf16 %v1369_v0, %v1368_v14  ;;  %v4894_v14 = vmov 48.0  }
 0x78c   :  { %3832 = vmatmul.msk.bf16.vlgmr.msrb.gmra.mxu0 %vm352_vm0, %v4383_v25 }
 0x78d   :  { %v4092_v26 = vpop.eup %4091 }
 0x78e   :  { %v4094_v39 = vpop.eup %4093  ;;  %v1366_v45 = vmul.f32 %v4092_v26, %v5517_v61 }
 0x78f   :  { %v1323_v37 = vpop.xlane.xlu2 %1322  ;;  %v1367_v15 = vmul.f32 %v4094_v39, %v5510_v1  ;;  %v1319_v9 = vpop.xlane.xlu1 %1318 }
 0x790   :  { %4095 = vrcp.f32 %v1323_v37 }
 0x791   :  { %4097 = vrcp.f32 %v1321_v28  ;;  %v1379_v48 = vpack.c.bf16 %v1367_v15, %v1366_v45  ;;  %v5607_v45 = vld [vmem:[#allocation13 + $0x28] sm:$0xff] }
 0x792   :  { %1387 = vmatpush.bf16.xpose.msra.mxu2 %v1380_v10  ;;  %4099 = vrcp.f32 %v1319_v9 }
 0x793   :  { %4101 = vrcp.f32 %v1317_v63 }
 0x796   :  { %v4096_v31 = vpop.eup %4095 }
 0x797   :  { %v4098_v46 = vpop.eup %4097  ;;  %v1365_v6 = vmul.f32 %v4096_v31, %v5529_v11  ;;  %v921_v11 = vpop.f32.mrf.mxu2 }
 0x798   :  { %v1364_v61 = vmul.f32 %v4098_v46, %v5519_v36  ;;  %v4100_v1 = vpop.eup %4099  ;;  %v4385_v36 = vld [vmem:[%s7016_s3 + $0x10] sm:$0xff]  ;;  %v922_v20 = vadd.f32 %v921_v11, %v5586_v23  ;;  %v1313_v30 = vpop.xlane.xlu2 %1312 }
 0x799   :  { %v4102_v8 = vpop.eup %4101  ;;  %v1363_v62 = vmul.f32 %v4100_v1, %v5527_v4  ;;  %v4386_v4 = vld [vmem:[%s7016_s3 + $0x18] sm:$0xff]  ;;  %4103 = vrcp.f32 %v1313_v30 }
 0x79a   :  { %1388 = vmatpush.bf16.xpose.msra.mxu2 %v1379_v48  ;;  %v1378_v3 = vpack.c.bf16 %v1365_v6, %v1364_v61  ;;  %v1362_v43 = vmul.f32 %v4102_v8, %v5521_v22  ;;  %v1068_v22 = vpop.f32.mrf.mxu1 }
 0x79b   :  { %v1069_v46 = vadd.f32 %v1068_v22, %v5372_v47 }
 0x79c   :  { %v1377_v55 = vpack.c.bf16 %v1363_v62, %v1362_v43  ;;  %3833 = vmatmul.msk.bf16.gmra.mxu0 %vm352_vm0, %v4384_v41 }
 0x79f   :  { %v923_v32 = vpop.f32.mrf.mxu2  ;;  %v4104_v51 = vpop.eup %4103 }
 0x7a0   :  { %v924_v58 = vadd.f32 %v923_v32, %v5588_v59  ;;  %v1360_v38 = vmul.f32 %v4104_v51, %v5533_v12  ;;  %v4389_v12 = vld [vmem:[%s7016_s3 + $0x30] sm:$0xff] }
 0x7a2   :  { %1389 = vmatpush.bf16.xpose.msra.mxu2 %v1378_v3  ;;  %v1070_v5 = vpop.f32.mrf.mxu1  ;;  %v936_v17 = vadd.f32 %v924_v58, %v922_v20 }
 0x7a3   :  { %v1071_v6 = vadd.f32 %v1070_v5, %v5374_v19 }
 0x7a5   :  { %v1095_v62 = vpack.c.bf16 %v1071_v6, %v1069_v46 }
 0x7a7   :  { %v926_v18 = vpop.f32.mrf.mxu2 }
 0x7a8   :  { %v927_v34 = vadd.f32 %v926_v18, %v5592_v49 }
 0x7aa   :  { %1390 = vmatpush.bf16.xpose.msra.mxu2 %v1377_v55  ;;  %v1073_v54 = vpop.f32.mrf.mxu1  ;;  %v937_v2 = vadd.f32 %v936_v17, %v927_v34  ;;  %v4390_v17 = vld [vmem:[%s7016_s3 + $0x38] sm:$0xff] }
 0x7ab   :  { %v1074_v5 = vadd.f32 %v1073_v54, %v5376_v13 }
 0x7ac   :  { %3834 = vmatmul.msk.bf16.gmra.mxu0 %vm352_vm0, %v4385_v36 }
 0x7af   :  { %v928_v50 = vpop.f32.mrf.mxu2 }
 0x7b0   :  { %v929_v0 = vadd.f32 %v928_v50, %v5599_v57 }
 0x7b2   :  { %v1075_v24 = vpop.f32.mrf.mxu1  ;;  %v938_v21 = vadd.f32 %v937_v2, %v929_v0 }
 0x7b3   :  { %v1076_v32 = vadd.f32 %v1075_v24, %v5378_v60 }
 0x7b5   :  { %v1096_v60 = vpack.c.bf16 %v1076_v32, %v1074_v5  ;;  %v5657_v5 = vld [vmem:[#allocation16 + $0x28] sm:$0xff] }
 0x7b7   :  { %v931_v28 = vpop.f32.mrf.mxu2 }
 0x7b8   :  { %v932_v37 = vadd.f32 %v931_v28, %v5602_v35 }
 0x7ba   :  { %v1078_v10 = vpop.f32.mrf.mxu1  ;;  %v939_v15 = vadd.f32 %v938_v21, %v932_v37 }
 0x7bc   :  { %3835 = vmatmul.msk.bf16.gmra.mxu0 %vm352_vm0, %v4386_v4 }
 0x7bf   :  { %v933_v25 = vpop.f32.mrf.mxu2 }
 0x7c0   :  { %v934_v31 = vadd.f32 %v933_v25, %v5607_v45 }
 0x7c2   :  { %v940_v61 = vadd.f32 %v939_v15, %v934_v31  ;;  %v1080_v1 = vpop.f32.mrf.mxu1  ;;  %v4391_v15 = vld [vmem:[%s7016_s3 + $0x40] sm:$0xff] }
 0x7ca   :  { %v1083_v4 = vpop.f32.mrf.mxu1 }
 0x7cc   :  { %3836 = vmatmul.msk.bf16.gmra.mxu0 %vm352_vm0, %v4387_v7 }
 0x7d2   :  { %v1085_v54 = vpop.f32.mrf.mxu1 }
 0x7d3   :  { %v5669_v54 = vld [vmem:[#allocation16] sm:$0xff] }
 0x7dc   :  { %3837 = vmatmul.msk.bf16.gmra.mxu0 %vm352_vm0, %v4388_v56 }
 0x7ec   :  { %3838 = vmatmul.msk.bf16.gmra.mxu0 %vm352_vm0, %v4389_v12 }
 0x7ed   :  { %v1315_v29 = vpop.xlane.xlu0 %1314 }
 0x7ee   :  { %4105 = vrcp.f32 %v1315_v29 }
 0x7ef   :  { %4107 = vrcp.f32 %v4894_v14 }
 0x7f4   :  { %v4106_v26 = vpop.eup %4105 }
 0x7f5   :  { %v1361_v39 = vmul.f32 %v4106_v26, %v5551_v16  ;;  %v4108_v9 = vpop.eup %4107  ;;  %v941_v16 = vrot.slane %v940_v61, 4  ;;  %v1079_v26 = vadd.f32 %v1078_v10, %v5386_v53  ;;  %v1084_v53 = vadd.f32 %v1083_v4, %v5394_v52 }
 0x7f6   :  { %v948_v63 = vmul.f32 48.0, %v4108_v9  ;;  %vm952_vm3 = vweird.f32 %v4108_v9 }
 0x7f7   :  { %v1376_v48 = vpack.c.bf16 %v1361_v39, %v1360_v38  ;;  %v942_v43 = vadd.f32 %v941_v16, %v940_v61  ;;  %v1081_v38 = vadd.f32 %v1080_v1, %v5388_v42  ;;  %v4392_v42 = vld [vmem:[%s7016_s3 + $0x48] sm:$0xff]  ;;  %v1098_v10 = vpack.c.bf16 %v1084_v53, %v1084_v53 }
 0x7f8   :  { %v949_v3 = vsub.f32 1.0, %v948_v63 }
 0x7f9   :  { %1391 = vmatpush.bf16.xpose.msra.mxu2 %v1376_v48  ;;  %v943_v55 = vrot.slane %v942_v43, 2  ;;  %v1097_v48 = vpack.c.bf16 %v1081_v38, %v1079_v26  ;;  %v5687_v26 = vld [vmem:[#allocation16 + $0x18] sm:$0xff] }
 0x7fa   :  { %v950_v8 = vmul.f32 %v4108_v9, %v949_v3 }
 0x7fb   :  { %v944_v36 = vadd.f32 %v943_v55, %v942_v43  ;;  %v5647_v43 = vld [vmem:[#allocation14 + $0x20] sm:$0xff]  ;;  %v5649_v55 = vld [vmem:[#allocation14 + $0x28] sm:$0xff] }
 0x7fc   :  { %v951_v41 = vadd.f32 %v4108_v9, %v950_v8  ;;  %3839 = vmatmul.msk.bf16.gmra.mxu0 %vm352_vm0, %v4390_v17 }
 0x7fd   :  { %v945_v47 = vrot.slane %v944_v36, 1 }
 0x7fe   :  { %v5616_v19 = vsel %vm952_vm3, %v4108_v9, %v951_v41 }
 0x7ff   :  { %v946_v22 = vadd.f32 %v945_v47, %v944_v36 }
 0x800   :  { %1392 = vmatmul.bf16.vlgmr.msra.gmra.mxu2 %v1095_v62 }
 0x801   :  { %v954_v11 = vmul.f32 %v5616_v19, %v946_v22 }
 0x803   :  { %v955_v7 = vsub.f32 %v922_v20, %v954_v11  ;;  %v956_v18 = vsub.f32 %v924_v58, %v954_v11  ;;  %v5621_v50 = vsub.f32 %v927_v34, %v954_v11  ;;  %v5623_v30 = vsub.f32 %v929_v0, %v954_v11 }
 0x804   :  { %v959_v56 = vsub.f32 %v932_v37, %v954_v11  ;;  %v960_v20 = vsub.f32 %v934_v31, %v954_v11  ;;  %v5655_v11 = vld [vmem:[#allocation16 + $0x20] sm:$0xff] }
 0x805   :  { %v961_v29 = vmul.f32 %v955_v7, %v955_v7  ;;  %v962_v2 = vmul.f32 %v956_v18, %v956_v18  ;;  %v963_v13 = vmul.f32 %v5621_v50, %v5621_v50  ;;  %v964_v58 = vmul.f32 %v5623_v30, %v5623_v30 }
 0x806   :  { %v965_v34 = vmul.f32 %v959_v56, %v959_v56  ;;  %v966_v28 = vmul.f32 %v960_v20, %v960_v20 }
 0x807   :  { %v967_v24 = vadd.f32 %v962_v2, %v961_v29  ;;  %v5661_v29 = vld [vmem:[#allocation14] sm:$0xff]  ;;  %v5663_v2 = vld [vmem:[#allocation14 + $0x8] sm:$0xff] }
 0x809   :  { %v968_v0 = vadd.f32 %v967_v24, %v963_v13  ;;  %v5645_v16 = vpop.f32.mrf.mxu0 }
 0x80b   :  { %v969_v14 = vadd.f32 %v968_v0, %v964_v58 }
 0x80c   :  { %3840 = vmatmul.msk.bf16.gmra.mxu0 %vm352_vm0, %v4391_v15 }
 0x80d   :  { %v970_v51 = vadd.f32 %v969_v14, %v965_v34  ;;  %v5681_v14 = vld [vmem:[#allocation14 + $0x18] sm:$0xff] }
 0x80f   :  { %v971_v21 = vadd.f32 %v970_v51, %v966_v28  ;;  %v5679_v28 = vld [vmem:[#allocation14 + $0x10] sm:$0xff] }
 0x810   :  { %1397 = vmatmul.bf16.gmra.mxu2 %v1096_v60  ;;  %v5671_v60 = vld [vmem:[#allocation16 + $0x8] sm:$0xff] }
 0x811   :  { %v972_v37 = vrot.slane %v971_v21, 4  ;;  %v5653_v22 = vpop.f32.mrf.mxu0 }
 0x813   :  { %v973_v39 = vadd.f32 %v972_v37, %v971_v21  ;;  %v5685_v37 = vld [vmem:[#allocation16 + $0x10] sm:$0xff] }
 0x815   :  { %v974_v9 = vrot.slane %v973_v39, 2 }
 0x817   :  { %v975_v25 = vadd.f32 %v974_v9, %v973_v39 }
 0x819   :  { %v976_v31 = vrot.slane %v975_v25, 1  ;;  %v5675_v24 = vpop.f32.mrf.mxu0 }
 0x81b   :  { %v977_v63 = vadd.f32 %v976_v31, %v975_v25 }
 0x81c   :  { %3841 = vmatmul.msk.bf16.gmra.mxu0 %vm352_vm0, %v4392_v42 }
 0x81d   :  { %v978_v46 = vmul.f32 %v977_v63, %v5616_v19 }
 0x81f   :  { %v979_v6 = vadd.f32 1e-05, %v978_v46 }
 0x820   :  { %1402 = vmatmul.bf16.gmra.mxu2 %v1097_v48 }
 0x821   :  { %4109 = vrsqrt.f32 %v979_v6  ;;  %vm986_vm4 = vweird.f32 %v979_v6  ;;  %v5689_v38 = vpop.f32.mrf.mxu0 }
 0x827   :  { %v4110_v61 = vpop.eup %4109 }
 0x828   :  { %v981_v3 = vmul.f32 %v4110_v61, %v979_v6  ;;  %vm987_vm5 = vweird.f32 %v4110_v61 }
 0x829   :  { %vm988_vm6 = vmor %vm986_vm4, %vm987_vm5 }
 0x82a   :  { %v982_v12 = vmul.f32 %v4110_v61, %v981_v3 }
 0x82c   :  { %v983_v1 = vmul.f32 0.5, %v982_v12  ;;  %3842 = vmatmul.msk.bf16.gmra.mxu0 %vm352_vm0, %v5339_v40 }
 0x82e   :  { %v984_v8 = vsub.f32 1.5, %v983_v1  ;;  %v4393_v1 = vld [vmem:[#allocation7 + $0x68] sm:$0xff] }
 0x830   :  { %1407 = vmatmul.bf16.gmra.mxu2 %v1098_v10  ;;  %v985_v62 = vmul.f32 %v4110_v61, %v984_v8 }
 0x832   :  { %v989_v52 = vsel %vm988_vm6, %v4110_v61, %v985_v62  ;;  %v4394_v62 = vld [vmem:[#allocation7 + $0x58] sm:$0xff] }
 0x833   :  { %v990_v41 = vmul.f32 %v989_v52, %v955_v7  ;;  %v991_v36 = vmul.f32 %v989_v52, %v956_v18  ;;  %v994_v47 = vmul.f32 %v989_v52, %v959_v56  ;;  %v995_v4 = vmul.f32 %v989_v52, %v960_v20 }
 0x834   :  { %v992_v34 = vmul.f32 %v989_v52, %v5621_v50  ;;  %v993_v0 = vmul.f32 %v989_v52, %v5623_v30  ;;  %v1577_v30 = vpop.f32.mrf.mxu0 }
 0x835   :  { %v1000_v32 = vmul.f32 %v994_v47, %v5647_v43  ;;  %v1001_v17 = vmul.f32 %v995_v4, %v5649_v55  ;;  %v996_v7 = vmul.f32 %v990_v41, %v5661_v29  ;;  %v997_v18 = vmul.f32 %v991_v36, %v5663_v2  ;;  %v4395_v41 = vld [vmem:[#allocation7 + $0x60] sm:$0xff] }
 0x836   :  { %v998_v51 = vmul.f32 %v992_v34, %v5679_v28  ;;  %v999_v21 = vmul.f32 %v993_v0, %v5681_v14  ;;  %v4399_v34 = vld [vmem:[#allocation7 + $0x40] sm:$0xff] }
 0x837   :  { %v1006_v56 = vadd.f32 %v1000_v32, %v5655_v11  ;;  %v1007_v13 = vadd.f32 %v1001_v17, %v5657_v5  ;;  %v1002_v20 = vadd.f32 %v996_v7, %v5669_v54  ;;  %v1003_v58 = vadd.f32 %v997_v18, %v5671_v60  ;;  %v4396_v17 = vld [vmem:[#allocation7 + $0x48] sm:$0xff]  ;;  %v4397_v18 = vld [vmem:[#allocation7 + $0x50] sm:$0xff] }
 0x838   :  { %v1004_v39 = vadd.f32 %v998_v51, %v5685_v37  ;;  %v1005_v50 = vadd.f32 %v999_v21, %v5687_v26 }
 0x839   :  { %1012 = vst [vmem:[#allocation17 + $0x20] sm:$0xff] %v1006_v56 }
 0x83a   :  { %1013 = vst [vmem:[#allocation17 + $0x28] sm:$0xff] %v1007_v13 }
 0x83b   :  { %1008 = vst [vmem:[#allocation17] sm:$0xff] %v1002_v20  ;;  %v4398_v20 = vld [vmem:[#allocation7 + $0x38] sm:$0xff] }
 0x83c   :  { %1009 = vst [vmem:[#allocation17 + $0x8] sm:$0xff] %v1003_v58  ;;  %v1579_v15 = vpop.f32.mrf.mxu0 }
 0x83d   :  { %1010 = vst [vmem:[#allocation17 + $0x10] sm:$0xff] %v1004_v39 }
 0x83e   :  { %1011 = vst [vmem:[#allocation17 + $0x18] sm:$0xff] %v1005_v50 }
 0x844   :  { %v1582_v9 = vpop.f32.mrf.mxu0 }
 0x84c   :  { %v1584_v48 = vpop.f32.mrf.mxu0 }
 0x84d   :  { %v1585_v58 = vadd.f32 %v4398_v20, %v1584_v48 }
 0x854   :  { %v1587_v25 = vpop.f32.mrf.mxu0 }
 0x855   :  { %v1588_v0 = vadd.f32 %v4399_v34, %v1587_v25  ;;  %v4401_v25 = vld [vmem:[#allocation7 + $0x20] sm:$0xff] }
 0x857   :  { %v1625_v39 = vpack.c.bf16 %v1588_v0, %v1585_v58  ;;  %v4416_v58 = vld [vmem:[#allocation5 + $0x30] sm:$0xff] }
 0x85c   :  { %v1589_v63 = vpop.f32.mrf.mxu0 }
 0x85d   :  { %v1590_v7 = vadd.f32 %v4396_v17, %v1589_v63 }
 0x864   :  { %v1592_v6 = vpop.f32.mrf.mxu0 }
 0x865   :  { %v1593_v56 = vadd.f32 %v4397_v18, %v1592_v6  ;;  %v4400_v6 = vld [vmem:[#allocation7 + $0x30] sm:$0xff]  ;;  %v4413_v18 = vld [vmem:[#allocation5 + $0x18] sm:$0xff] }
 0x867   :  { %v1626_v51 = vpack.c.bf16 %v1593_v56, %v1590_v7  ;;  %v5707_v7 = vld [vmem:[#allocation8 + $0x10] sm:$0xff]  ;;  %v4415_v56 = vld [vmem:[#allocation5 + $0x28] sm:$0xff] }
 0x86c   :  { %v1594_v42 = vpop.f32.mrf.mxu0 }
 0x86d   :  { %v1595_v52 = vadd.f32 %v4394_v62, %v1594_v42  ;;  %v1578_v62 = vadd.f32 %v4401_v25, %v1577_v30 }
 0x874   :  { %v1597_v61 = vpop.f32.mrf.mxu0 }
 0x875   :  { %v1598_v36 = vadd.f32 %v4395_v41, %v1597_v61 }
 0x877   :  { %v1627_v13 = vpack.c.bf16 %v1598_v36, %v1595_v52  ;;  %v4402_v52 = vld [vmem:[#allocation7 + $0x28] sm:$0xff] }
 0x878   :  { %v1580_v41 = vadd.f32 %v4402_v52, %v1579_v15  ;;  %v5695_v36 = vld [vmem:[#allocation8] sm:$0xff] }
 0x87c   :  { %v1599_v12 = vpop.f32.mrf.mxu0 }
 0x87d   :  { %v1600_v8 = vadd.f32 %v4393_v1, %v1599_v12  ;;  %v1583_v12 = vadd.f32 %v4400_v6, %v1582_v9  ;;  %v5717_v6 = vld [vmem:[#allocation10 + $0x28] sm:$0xff] }
 0x87f   :  { %v1628_v47 = vpack.c.bf16 %v1600_v8, %v1600_v8  ;;  %v1624_v48 = vpack.c.bf16 %v1583_v12, %v1583_v12 }
 0x881   :  { %v1715_v32 = vsel %vm591_vm1, %v1628_v47, 0  ;;  %v4404_v47 = vld [vmem:[#allocation7 + $0x10] sm:$0xff] }
 0x882   :  { %1721 = vmatpush.bf16.msra.mxu1 %v1715_v32  ;;  %v1573_v9 = vadd.f32 %v4404_v47, %v5675_v24  ;;  %v5703_v32 = vld [vmem:[#allocation8 + $0x8] sm:$0xff]  ;;  %v4410_v24 = vld [vmem:[#allocation5] sm:$0xff]  ;;  %v4425_v47 = vld [vmem:[#allocation2 + $0x48] sm:$0xff] }
 0x883   :  { %v1393_v31 = vpop.f32.mrf.mxu2 }
 0x886   :  { %1722 = vmatpush.bf16.msra.mxu1 %v1627_v13 }
 0x88a   :  { %1723 = vmatpush.bf16.msra.mxu1 %v1626_v51  ;;  %v4417_v51 = vld [vmem:[#allocation5 + $0x38] sm:$0xff] }
 0x88b   :  { %v1395_v46 = vpop.f32.mrf.mxu2 }
 0x88c   :  { %v1412_v8 = vpack.c.bf16 %v1395_v46, %v1393_v31  ;;  %v4406_v46 = vld [vmem:[#allocation7] sm:$0xff] }
 0x88d   :  { %v1568_v30 = vadd.f32 %v4406_v46, %v5645_v16  ;;  %v4412_v16 = vld [vmem:[#allocation5 + $0x10] sm:$0xff] }
 0x88e   :  { %1724 = vmatpush.bf16.msra.mxu1 %v1625_v39  ;;  %v5711_v39 = vld [vmem:[#allocation10 + $0x20] sm:$0xff]  ;;  %v4427_v46 = vld [vmem:[#allocation2 + $0x40] sm:$0xff] }
 0x893   :  { %v1398_v53 = vpop.f32.mrf.mxu2 }
 0x89b   :  { %v1400_v10 = vpop.f32.mrf.mxu2 }
 0x89c   :  { %v1413_v1 = vpack.c.bf16 %v1400_v10, %v1398_v53  ;;  %v4405_v53 = vld [vmem:[#allocation7 + $0x18] sm:$0xff] }
 0x89d   :  { %v1575_v10 = vadd.f32 %v4405_v53, %v5689_v38  ;;  %v4411_v38 = vld [vmem:[#allocation5 + $0x8] sm:$0xff] }
 0x89f   :  { %v1622_v31 = vpack.c.bf16 %v1575_v10, %v1573_v9  ;;  %v5726_v10 = vld [vmem:[#allocation10] sm:$0xff] }
 0x8a3   :  { %v1403_v3 = vpop.f32.mrf.mxu2 }
 0x8ab   :  { %v1405_v4 = vpop.f32.mrf.mxu2 }
 0x8ac   :  { %v1414_v61 = vpack.c.bf16 %v1405_v4, %v1403_v3  ;;  %v1623_v3 = vpack.c.bf16 %v1580_v41, %v1578_v62  ;;  %v4407_v4 = vld [vmem:[#allocation7 + $0x8] sm:$0xff] }
 0x8ad   :  { %v1570_v15 = vadd.f32 %v4407_v4, %v5653_v22  ;;  %v4414_v22 = vld [vmem:[#allocation5 + $0x20] sm:$0xff]  ;;  %v4423_v62 = vld [vmem:[#allocation2 + $0x58] sm:$0xff] }
 0x8ae   :  { %v5723_v41 = vld [vmem:[#allocation10 + $0x8] sm:$0xff] }
 0x8af   :  { %v1621_v17 = vpack.c.bf16 %v1570_v15, %v1568_v30  ;;  %v4428_v15 = vld [vmem:[#allocation2 + $0x38] sm:$0xff] }
 0x8b3   :  { %v1408_v21 = vpop.f32.mrf.mxu2 }
 0x8b4   :  { %v1415_v50 = vpack.c.bf16 %v1408_v21, %v1408_v21 }
 0x8b6   :  { %v1417_v42 = vsel %vm591_vm1, %v1415_v50, 0 }
 0x8b7   :  { %1423 = vmatpush.bf16.msrb.mxu2 %v1417_v42 }
 0x8bb   :  { %v1410_v63 = vpop.f32.mrf.mxu2  ;;  %1424 = vmatpush.bf16.msrb.mxu2 %v1414_v61  ;;  %v5714_v61 = vld [vmem:[#allocation10 + $0x18] sm:$0xff] }
 0x8bf   :  { %1425 = vmatpush.bf16.msrb.mxu2 %v1413_v1  ;;  %v5720_v1 = vld [vmem:[#allocation10 + $0x10] sm:$0xff] }
 0x8c3   :  { %1426 = vmatpush.bf16.msrb.mxu2 %v1412_v8  ;;  %v4422_v8 = vld [vmem:[#allocation2 + $0x50] sm:$0xff] }
 0x8c6   :  { %3826 = vmatmul.msk.bf16.vlgmr.msrb.gmra.mxu2 %vm566_vm2, %v5695_v36 }
 0x8c7   :  { %1637 = vmatpush.bf16.xpose.msra.mxu2 %v1624_v48 }
 0x8cf   :  { %1638 = vmatpush.bf16.xpose.msra.mxu2 %v1623_v3 }
 0x8d6   :  { %3827 = vmatmul.msk.bf16.gmra.mxu2 %vm566_vm2, %v5703_v32 }
 0x8d7   :  { %1639 = vmatpush.bf16.xpose.msra.mxu2 %v1622_v31 }
 0x8df   :  { %1640 = vmatpush.bf16.xpose.msra.mxu2 %v1621_v17 }
 0x8e6   :  { %3828 = vmatmul.msk.bf16.gmra.mxu2 %vm566_vm2, %v5707_v7 }
 0x8f6   :  { %1641 = vmatmul.bf16.vlgmr.msra.gmra.mxu2 %v4410_v24 }
 0x906   :  { %1646 = vmatmul.bf16.gmra.mxu2 %v4411_v38  ;;  %v4429_v38 = vld [vmem:[#allocation2 + $0x30] sm:$0xff] }
 0x916   :  { %1651 = vmatmul.bf16.gmra.mxu2 %v4412_v16 }
 0x926   :  { %1656 = vmatmul.bf16.gmra.mxu2 %v4413_v18 }
 0x936   :  { %1661 = vmatmul.bf16.gmra.mxu2 %v4414_v22 }
 0x946   :  { %1666 = vmatmul.bf16.gmra.mxu2 %v4415_v56 }
 0x949   :  { %v1428_v13 = vpop.f32.mrf.mxu2 }
 0x94a   :  { %v1429_v31 = vadd.f32 %v5726_v10, %v1428_v13 }
 0x94c   :  { %v1443_v16 = vadd.f32 %v4429_v38, %v1429_v31 }
 0x951   :  { %v1430_v20 = vpop.f32.mrf.mxu2 }
 0x952   :  { %v1431_v3 = vadd.f32 %v5723_v41, %v1430_v20 }
 0x954   :  { %v1444_v17 = vadd.f32 %v4428_v15, %v1431_v3 }
 0x956   :  { %1671 = vmatmul.bf16.gmra.mxu2 %v4416_v58  ;;  %v1449_v18 = vpack.c.bf16 %v1444_v17, %v1443_v16 }
 0x959   :  { %v1433_v34 = vpop.f32.mrf.mxu2 }
 0x95a   :  { %v1434_v48 = vadd.f32 %v5720_v1, %v1433_v34 }
 0x95c   :  { %v1445_v30 = vadd.f32 %v4427_v46, %v1434_v48 }
 0x961   :  { %v1435_v0 = vpop.f32.mrf.mxu2 }
 0x962   :  { %v1436_v63 = vadd.f32 %v5714_v61, %v1435_v0 }
 0x964   :  { %v1446_v9 = vadd.f32 %v4425_v47, %v1436_v63 }
 0x966   :  { %1676 = vmatmul.bf16.gmra.mxu2 %v4417_v51  ;;  %v1450_v24 = vpack.c.bf16 %v1446_v9, %v1445_v30 }
 0x969   :  { %v1438_v21 = vpop.f32.mrf.mxu2 }
 0x96a   :  { %v1439_v50 = vadd.f32 %v5711_v39, %v1438_v21 }
 0x96c   :  { %v1447_v25 = vadd.f32 %v4422_v8, %v1439_v50 }
 0x971   :  { %v1440_v42 = vpop.f32.mrf.mxu2 }
 0x972   :  { %v1441_v12 = vadd.f32 %v5717_v6, %v1440_v42 }
 0x974   :  { %v1448_v52 = vadd.f32 %v4423_v62, %v1441_v12 }
 0x976   :  { %v1451_v53 = vpack.c.bf16 %v1448_v52, %v1447_v25 }
 0x978   :  { %1457 = vmatpush.bf16.msrb.mxu3 %v1451_v53 }
 0x979   :  { %v1642_v4 = vpop.f32.mrf.mxu2 }
 0x97c   :  { %1458 = vmatpush.bf16.msrb.mxu3 %v1450_v24 }
 0x980   :  { %1459 = vmatpush.bf16.msrb.mxu3 %v1449_v18 }
 0x981   :  { %v1644_v22 = vpop.f32.mrf.mxu2 }
 0x982   :  { %v1682_v56 = vpack.c.bf16 %v1644_v22, %v1642_v4 }
 0x983   :  { %3829 = vmatmul.msk.bf16.vlgmr.msrb.gmra.mxu3 %vm352_vm0, %v5536_v27 }
 0x984   :  { %3843 = vmatmul.msk.bf16.vlgmr.msra.gmra.mxu1 %vm566_vm2, %v1682_v56  ;;  %v4430_v56 = vld [vmem:[%s7015_s2 + $0x60] sm:$0xff] }
 0x989   :  { %v1647_v13 = vpop.f32.mrf.mxu2 }
 0x991   :  { %v1649_v20 = vpop.f32.mrf.mxu2 }
 0x992   :  { %v1683_v58 = vpack.c.bf16 %v1649_v20, %v1647_v13 }
 0x993   :  { %3830 = vmatmul.msk.bf16.gmra.mxu3 %vm352_vm0, %v5540_v44 }
 0x994   :  { %3844 = vmatmul.msk.bf16.gmra.mxu1 %vm566_vm2, %v1683_v58  ;;  %v4431_v58 = vld [vmem:[%s7015_s2 + $0x58] sm:$0xff] }
 0x999   :  { %v1652_v34 = vpop.f32.mrf.mxu2 }
 0x9a1   :  { %v1654_v0 = vpop.f32.mrf.mxu2 }
 0x9a2   :  { %v1684_v51 = vpack.c.bf16 %v1654_v0, %v1652_v34 }
 0x9a3   :  { %3831 = vmatmul.msk.bf16.gmra.mxu3 %vm352_vm0, %v5544_v33 }
 0x9a4   :  { %3845 = vmatmul.msk.bf16.gmra.mxu1 %vm566_vm2, %v1684_v51  ;;  %v4432_v51 = vld [vmem:[%s7015_s2 + $0x30] sm:$0xff] }
 0x9a9   :  { %v1657_v21 = vpop.f32.mrf.mxu2 }
 0x9b1   :  { %v1659_v27 = vpop.f32.mrf.mxu2 }
 0x9b2   :  { %v1685_v50 = vpack.c.bf16 %v1659_v27, %v1657_v21  ;;  %v4433_v27 = vld [vmem:[%s7015_s2 + $0x70] sm:$0xff] }
 0x9b4   :  { %3846 = vmatmul.msk.bf16.gmra.mxu1 %vm566_vm2, %v1685_v50 }
 0x9b9   :  { %v1662_v42 = vpop.f32.mrf.mxu2 }
 0x9c1   :  { %v1664_v63 = vpop.f32.mrf.mxu2 }
 0x9c2   :  { %v1686_v12 = vpack.c.bf16 %v1664_v63, %v1662_v42  ;;  %v4434_v63 = vld [vmem:[%s7015_s2 + $0x28] sm:$0xff] }
 0x9c4   :  { %3847 = vmatmul.msk.bf16.gmra.mxu1 %vm566_vm2, %v1686_v12 }
 0x9c9   :  { %v1667_v44 = vpop.f32.mrf.mxu2 }
 0x9d1   :  { %v1669_v48 = vpop.f32.mrf.mxu2 }
 0x9d2   :  { %v1687_v8 = vpack.c.bf16 %v1669_v48, %v1667_v44  ;;  %v4435_v44 = vld [vmem:[%s7015_s2 + $0x78] sm:$0xff] }
 0x9d4   :  { %3848 = vmatmul.msk.bf16.gmra.mxu1 %vm566_vm2, %v1687_v8  ;;  %v4436_v8 = vld [vmem:[%s7015_s2 + $0x68] sm:$0xff] }
 0x9d9   :  { %v1672_v25 = vpop.f32.mrf.mxu2 }
 0x9e1   :  { %v1674_v62 = vpop.f32.mrf.mxu2 }
 0x9e2   :  { %v1688_v33 = vpack.c.bf16 %v1674_v62, %v1672_v25  ;;  %v4437_v62 = vld [vmem:[%s7015_s2 + $0x50] sm:$0xff] }
 0x9e4   :  { %3849 = vmatmul.msk.bf16.gmra.mxu1 %vm566_vm2, %v1688_v33 }
 0x9e9   :  { %v1677_v52 = vpop.f32.mrf.mxu2 }
 0x9f1   :  { %v1679_v3 = vpop.f32.mrf.mxu2 }
 0x9f2   :  { %v1689_v47 = vpack.c.bf16 %v1679_v3, %v1677_v52  ;;  %v4438_v52 = vld [vmem:[%s7015_s2 + $0x40] sm:$0xff] }
 0x9f4   :  { %3850 = vmatmul.msk.bf16.gmra.mxu1 %vm566_vm2, %v1689_v47  ;;  %v4439_v47 = vld [vmem:[%s7015_s2 + $0x48] sm:$0xff] }
 0xa01   :  { %v1726_v9 = vpop.f32.mrf.mxu1 }
 0xa09   :  { %v5743_v53 = vpop.f32.mrf.mxu1 }
 0xa11   :  { %v1731_v31 = vpop.f32.mrf.mxu1 }
 0xa19   :  { %v1733_v46 = vpop.f32.mrf.mxu1 }
 0xa21   :  { %v1736_v30 = vpop.f32.mrf.mxu1 }
 0xa29   :  { %v1738_v4 = vpop.f32.mrf.mxu1 }
 0xa2a   :  { %v5769_v12 = vadd.f32 %v4434_v63, %v1738_v4 }
 0xa31   :  { %v1741_v15 = vpop.f32.mrf.mxu1 }
 0xa32   :  { %v5760_v21 = vadd.f32 %v4432_v51, %v1741_v15  ;;  %v4440_v15 = vld [vmem:[%s7015_s2 + $0x38] sm:$0xff] }
 0xa39   :  { %v1743_v17 = vpop.f32.mrf.mxu1 }
 0xa41   :  { %v1746_v24 = vpop.f32.mrf.mxu1 }
 0xa42   :  { %v1747_v3 = vadd.f32 %v4438_v52, %v1746_v24  ;;  %v4442_v24 = vld [vmem:[%s7015_s2 + $0x10] sm:$0xff] }
 0xa49   :  { %v1748_v38 = vpop.f32.mrf.mxu1 }
 0xa4a   :  { %v1749_v4 = vadd.f32 %v4439_v47, %v1748_v38 }
 0xa51   :  { %v1751_v16 = vpop.f32.mrf.mxu1 }
 0xa52   :  { %v1752_v33 = vadd.f32 %v4437_v62, %v1751_v16  ;;  %v4441_v16 = vld [vmem:[%s7015_s2 + $0x20] sm:$0xff] }
 0xa59   :  { %v1753_v18 = vpop.f32.mrf.mxu1 }
 0xa5a   :  { %v5754_v34 = vadd.f32 %v4431_v58, %v1753_v18  ;;  %v1744_v18 = vadd.f32 %v4440_v15, %v1743_v17  ;;  %v4443_v17 = vld [vmem:[%s7015_s2 + $0x18] sm:$0xff] }
 0xa5b   :  { %v5805_v38 = vadd.f32 %v4443_v17, %v1733_v46 }
 0xa61   :  { %v1756_v22 = vpop.f32.mrf.mxu1 }
 0xa62   :  { %v5748_v13 = vadd.f32 %v4430_v56, %v1756_v22  ;;  %v5793_v22 = vadd.f32 %v4441_v16, %v1736_v30  ;;  %v5798_v56 = vadd.f32 %v4442_v24, %v1731_v31  ;;  %v4444_v30 = vld [vmem:[%s7015_s2] sm:$0xff] }
 0xa64   :  { %1790 = vmax.xlane.f32.xlu0 %v5748_v13 }
 0xa69   :  { %v1758_v20 = vpop.f32.mrf.mxu1 }
 0xa6a   :  { %v1759_v25 = vadd.f32 %v4436_v8, %v1758_v20  ;;  %v5811_v20 = vadd.f32 %v4444_v30, %v1726_v9 }
 0xa6c   :  { %1788 = vmax.xlane.f32.xlu0 %v5754_v34 }
 0xa71   :  { %v1761_v0 = vpop.f32.mrf.mxu1 }
 0xa72   :  { %v1762_v50 = vadd.f32 %v4433_v27, %v1761_v0 }
 0xa74   :  { %1778 = vmax.xlane.f32.xlu0 %v5760_v21  ;;  %1794 = vmax.xlane.f32.xlu1 %v1762_v50 }
 0xa79   :  { %v1763_v42 = vpop.f32.mrf.mxu1 }
 0xa7a   :  { %v1764_v48 = vadd.f32 %v4435_v44, %v1763_v42 }
 0xa7c   :  { %1776 = vmax.xlane.f32.xlu0 %v5769_v12  ;;  %1796 = vmax.xlane.f32.xlu2 %v1764_v48 }
 0xa7d   :  { %1792 = vmax.xlane.f32.xlu1 %v1759_v25 }
 0xa84   :  { %1786 = vmax.xlane.f32.xlu2 %v1752_v33 }
 0xa85   :  { %1782 = vmax.xlane.f32.xlu1 %v1747_v3 }
 0xa8c   :  { %1784 = vmax.xlane.f32.xlu2 %v1749_v4 }
 0xa8d   :  { %1780 = vmax.xlane.f32.xlu1 %v1744_v18 }
 0xa94   :  { %1774 = vmax.xlane.f32.xlu2 %v5793_v22 }
 0xa95   :  { %1770 = vmax.xlane.f32.xlu1 %v5798_v56 }
 0xa9c   :  { %1772 = vmax.xlane.f32.xlu2 %v5805_v38 }
 0xaa4   :  { %1766 = vmax.xlane.f32.xlu2 %v5811_v20 }
 0xad7   :  { %v1791_v51 = vpop.xlane.xlu0 %1790 }
 0xad8   :  { %v1810_v62 = vsub.f32 %v5748_v13, %v1791_v51 }
 0xada   :  { %v1838_v47 = vmul.f32 1.442695, %v1810_v62 }
 0xadf   :  { %v1789_v9 = vpop.xlane.xlu0 %1788 }
 0xae0   :  { %v1809_v30 = vsub.f32 %v5754_v34, %v1789_v9 }
 0xae7   :  { %v1795_v31 = vpop.xlane.xlu1 %1794 }
 0xae8   :  { %v1812_v58 = vsub.f32 %v1762_v50, %v1795_v31 }
 0xaea   :  { %v1842_v0 = vmul.f32 1.442695, %v1812_v58 }
 0xaec   :  { %4111 = vpow2.f32 %v1842_v0 }
 0xaef   :  { %v1797_v27 = vpop.xlane.xlu2 %1796 }
 0xaf0   :  { %v1813_v42 = vsub.f32 %v1764_v48, %v1797_v27  ;;  %v1793_v63 = vpop.xlane.xlu1 %1792  ;;  %v4445_v48 = vld [vmem:[%s7015_s2 + $0x8] sm:$0xff] }
 0xaf1   :  { %v1811_v46 = vsub.f32 %v1759_v25, %v1793_v63  ;;  %v5822_v25 = vadd.f32 %v4445_v48, %v5743_v53  ;;  %v1779_v53 = vpop.xlane.xlu0 %1778 }
 0xaf2   :  { %v1844_v44 = vmul.f32 1.442695, %v1813_v42  ;;  %v5814_v8 = vpop.eup %4111 }
 0xaf3   :  { %v1840_v52 = vmul.f32 1.442695, %v1811_v46  ;;  %1874 = vadd.xlane.f32.xlu0 %v5814_v8 }
 0xaf4   :  { %4113 = vpow2.f32 %v1844_v44  ;;  %v1804_v44 = vsub.f32 %v5760_v21, %v1779_v53 }
 0xaf5   :  { %4115 = vpow2.f32 %v1840_v52 }
 0xaf6   :  { %4117 = vpow2.f32 %v1838_v47 }
 0xaf7   :  { %v1787_v50 = vpop.xlane.xlu2 %1786 }
 0xaf8   :  { %v1808_v15 = vsub.f32 %v1752_v33, %v1787_v50  ;;  %v1783_v16 = vpop.xlane.xlu1 %1782  ;;  %v1836_v33 = vmul.f32 1.442695, %v1809_v30 }
 0xaf9   :  { %v1806_v24 = vsub.f32 %v1747_v3, %v1783_v16  ;;  %v1777_v21 = vpop.xlane.xlu0 %1776 }
 0xafa   :  { %v1834_v17 = vmul.f32 1.442695, %v1808_v15  ;;  %v5824_v13 = vpop.eup %4113 }
 0xafb   :  { %v1830_v31 = vmul.f32 1.442695, %v1806_v24  ;;  %v5827_v58 = vpop.eup %4115  ;;  %1876 = vadd.xlane.f32.xlu1 %v5824_v13  ;;  %1768 = vmax.xlane.f32.xlu0 %v5822_v25 }
 0xafc   :  { %4119 = vpow2.f32 %v1834_v17  ;;  %1872 = vadd.xlane.f32.xlu2 %v5827_v58  ;;  %v5832_v27 = vpop.eup %4117 }
 0xafd   :  { %4121 = vpow2.f32 %v1830_v31 }
 0xafe   :  { %4123 = vpow2.f32 %v1836_v33 }
 0xaff   :  { %v1785_v3 = vpop.xlane.xlu2 %1784 }
 0xb00   :  { %v1807_v0 = vsub.f32 %v1749_v4, %v1785_v3  ;;  %v1781_v51 = vpop.xlane.xlu1 %1780  ;;  %v1826_v4 = vmul.f32 1.442695, %v1804_v44 }
 0xb01   :  { %v1805_v42 = vsub.f32 %v1744_v18, %v1781_v51 }
 0xb02   :  { %v5834_v34 = vpop.eup %4119  ;;  %v1832_v63 = vmul.f32 1.442695, %v1807_v0 }
 0xb03   :  { %v5836_v46 = vpop.eup %4121  ;;  %v1828_v62 = vmul.f32 1.442695, %v1805_v42  ;;  %1870 = vadd.xlane.f32.xlu1 %v5832_v27  ;;  %1866 = vadd.xlane.f32.xlu0 %v5834_v34 }
 0xb04   :  { %4125 = vpow2.f32 %v1832_v63  ;;  %1862 = vadd.xlane.f32.xlu2 %v5836_v46  ;;  %v5843_v47 = vpop.eup %4123 }
 0xb05   :  { %4127 = vpow2.f32 %v1828_v62 }
 0xb06   :  { %4129 = vpow2.f32 %v1826_v4 }
 0xb07   :  { %v1775_v52 = vpop.xlane.xlu2 %1774 }
 0xb08   :  { %v1802_v18 = vsub.f32 %v5793_v22, %v1775_v52  ;;  %v1771_v9 = vpop.xlane.xlu1 %1770  ;;  %v1803_v22 = vsub.f32 %v5769_v12, %v1777_v21 }
 0xb09   :  { %v1800_v50 = vsub.f32 %v5798_v56, %v1771_v9 }
 0xb0a   :  { %v5846_v15 = vpop.eup %4125  ;;  %v1822_v16 = vmul.f32 1.442695, %v1802_v18  ;;  %v1824_v31 = vmul.f32 1.442695, %v1803_v22 }
 0xb0b   :  { %v5848_v24 = vpop.eup %4127  ;;  %v1818_v17 = vmul.f32 1.442695, %v1800_v50  ;;  %1868 = vadd.xlane.f32.xlu1 %v5843_v47  ;;  %1864 = vadd.xlane.f32.xlu0 %v5846_v15 }
 0xb0c   :  { %4131 = vpow2.f32 %v1822_v16  ;;  %1860 = vadd.xlane.f32.xlu2 %v5848_v24  ;;  %v5855_v30 = vpop.eup %4129 }
 0xb0d   :  { %4133 = vpow2.f32 %v1818_v17 }
 0xb0f   :  { %v1773_v48 = vpop.xlane.xlu2 %1772 }
 0xb10   :  { %v1801_v56 = vsub.f32 %v5805_v38, %v1773_v48 }
 0xb12   :  { %v5857_v33 = vpop.eup %4131  ;;  %v1820_v3 = vmul.f32 1.442695, %v1801_v56 }
 0xb13   :  { %v5859_v53 = vpop.eup %4133  ;;  %1858 = vadd.xlane.f32.xlu1 %v5855_v30  ;;  %1854 = vadd.xlane.f32.xlu0 %v5857_v33 }
 0xb14   :  { %4135 = vpow2.f32 %v1820_v3  ;;  %1850 = vadd.xlane.f32.xlu2 %v5859_v53 }
 0xb15   :  { %4137 = vpow2.f32 %v1824_v31 }
 0xb17   :  { %v1767_v12 = vpop.xlane.xlu2 %1766 }
 0xb18   :  { %v1798_v0 = vsub.f32 %v5811_v20, %v1767_v12 }
 0xb1a   :  { %v5865_v38 = vpop.eup %4135  ;;  %v1814_v51 = vmul.f32 1.442695, %v1798_v0 }
 0xb1b   :  { %v5867_v42 = vpop.eup %4137  ;;  %1852 = vadd.xlane.f32.xlu0 %v5865_v38 }
 0xb1c   :  { %4139 = vpow2.f32 %v1814_v51  ;;  %1856 = vadd.xlane.f32.xlu1 %v5867_v42 }
 0xb22   :  { %v5871_v63 = vpop.eup %4139 }
 0xb24   :  { %1846 = vadd.xlane.f32.xlu1 %v5871_v63 }
 0xb66   :  { %v1875_v44 = vpop.xlane.xlu0 %1874 }
 0xb67   :  { %4141 = vrcp.f32 %v1875_v44 }
 0xb6d   :  { %v4142_v18 = vpop.eup %4141 }
 0xb6e   :  { %v1769_v62 = vpop.xlane.xlu0 %1768  ;;  %v1877_v4 = vpop.xlane.xlu1 %1876  ;;  %v1908_v21 = vmul.f32 %v4142_v18, %v5814_v8 }
 0xb6f   :  { %v1799_v20 = vsub.f32 %v5822_v25, %v1769_v62  ;;  %4143 = vrcp.f32 %v1877_v4  ;;  %v1873_v9 = vpop.xlane.xlu2 %1872 }
 0xb71   :  { %v1816_v52 = vmul.f32 1.442695, %v1799_v20 }
 0xb73   :  { %4145 = vpow2.f32 %v1816_v52 }
 0xb74   :  { %4147 = vrcp.f32 %v1873_v9 }
 0xb75   :  { %v4144_v50 = vpop.eup %4143 }
 0xb76   :  { %v1909_v16 = vmul.f32 %v4144_v50, %v5824_v13  ;;  %v1871_v17 = vpop.xlane.xlu1 %1870  ;;  %v1867_v22 = vpop.xlane.xlu0 %1866 }
 0xb77   :  { %4149 = vrcp.f32 %v1871_v17  ;;  %v1863_v13 = vpop.xlane.xlu2 %1862 }
 0xb78   :  { %v1917_v48 = vpack.c.bf16 %v1909_v16, %v1908_v21  ;;  %4151 = vrcp.f32 %v1867_v22 }
 0xb79   :  { %v5877_v56 = vpop.eup %4145 }
 0xb7a   :  { %1848 = vadd.xlane.f32.xlu2 %v5877_v56  ;;  %1918 = vmatpush.bf16.xpose.msra.mxu3 %v1917_v48  ;;  %v4148_v25 = vpop.eup %4147 }
 0xb7b   :  { %v1907_v8 = vmul.f32 %v4148_v25, %v5827_v58 }
 0xb7d   :  { %v4150_v3 = vpop.eup %4149 }
 0xb7e   :  { %v1869_v31 = vpop.xlane.xlu1 %1868  ;;  %v1906_v12 = vmul.f32 %v4150_v3, %v5832_v27  ;;  %v1865_v0 = vpop.xlane.xlu0 %1864 }
 0xb7f   :  { %4153 = vrcp.f32 %v1869_v31  ;;  %v4152_v44 = vpop.eup %4151  ;;  %v1861_v50 = vpop.xlane.xlu2 %1860 }
 0xb80   :  { %v1916_v51 = vpack.c.bf16 %v1907_v8, %v1906_v12  ;;  %4155 = vrcp.f32 %v1865_v0  ;;  %v1904_v20 = vmul.f32 %v4152_v44, %v5834_v34 }
 0xb81   :  { %4157 = vrcp.f32 %v1863_v13 }
 0xb82   :  { %1919 = vmatpush.bf16.xpose.msra.mxu3 %v1916_v51 }
 0xb85   :  { %v4154_v62 = vpop.eup %4153 }
 0xb86   :  { %v1859_v4 = vpop.xlane.xlu1 %1858  ;;  %v1905_v52 = vmul.f32 %v4154_v62, %v5843_v47  ;;  %v4156_v9 = vpop.eup %4155 }
 0xb87   :  { %v4158_v27 = vpop.eup %4157  ;;  %4159 = vrcp.f32 %v1859_v4  ;;  %v1903_v58 = vmul.f32 %v4156_v9, %v5846_v15  ;;  %v1855_v21 = vpop.xlane.xlu0 %1854 }
 0xb88   :  { %v1915_v18 = vpack.c.bf16 %v1905_v52, %v1904_v20  ;;  %4161 = vrcp.f32 %v1861_v50  ;;  %v1902_v16 = vmul.f32 %v4158_v27, %v5836_v46  ;;  %v1851_v8 = vpop.xlane.xlu2 %1850  ;;  %v1602_v4 = vpop.f32.mrf.mxu0 }
 0xb89   :  { %v1461_v20 = vpop.f32.mrf.mxu3 }
 0xb8a   :  { %1920 = vmatpush.bf16.xpose.msra.mxu3 %v1915_v18  ;;  %v1914_v22 = vpack.c.bf16 %v1903_v58, %v1902_v16 }
 0xb8d   :  { %v4160_v48 = vpop.eup %4159 }
 0xb8e   :  { %v4162_v25 = vpop.eup %4161  ;;  %v1900_v34 = vmul.f32 %v4160_v48, %v5855_v30 }
 0xb8f   :  { %v1857_v17 = vpop.xlane.xlu1 %1856  ;;  %v1901_v47 = vmul.f32 %v4162_v25, %v5848_v24  ;;  %v1853_v31 = vpop.xlane.xlu0 %1852 }
 0xb90   :  { %4163 = vrcp.f32 %v1857_v17  ;;  %v1604_v52 = vpop.f32.mrf.mxu0 }
 0xb91   :  { %4165 = vrcp.f32 %v1855_v21  ;;  %v1913_v3 = vpack.c.bf16 %v1901_v47, %v1900_v34  ;;  %v1463_v18 = vpop.f32.mrf.mxu3 }
 0xb92   :  { %1921 = vmatpush.bf16.xpose.msra.mxu3 %v1914_v22  ;;  %4167 = vrcp.f32 %v1853_v31 }
 0xb93   :  { %4169 = vrcp.f32 %v1851_v8 }
 0xb96   :  { %v4164_v12 = vpop.eup %4163 }
 0xb97   :  { %v4166_v15 = vpop.eup %4165  ;;  %v1899_v46 = vmul.f32 %v4164_v12, %v5867_v42  ;;  %v1462_v42 = vadd.f32 %v1461_v20, %v5586_v23  ;;  %v1847_v58 = vpop.xlane.xlu1 %1846 }
 0xb98   :  { %v1898_v13 = vmul.f32 %v4166_v15, %v5857_v33  ;;  %v4168_v51 = vpop.eup %4167  ;;  %v1607_v50 = vpop.f32.mrf.mxu0  ;;  %v1464_v33 = vadd.f32 %v1463_v18, %v5588_v59  ;;  %4171 = vrcp.f32 %v1847_v58 }
 0xb99   :  { %v4170_v44 = vpop.eup %4169  ;;  %v1897_v30 = vmul.f32 %v4168_v51, %v5865_v38  ;;  %v1466_v9 = vpop.f32.mrf.mxu3 }
 0xb9a   :  { %1922 = vmatpush.bf16.xpose.msra.mxu3 %v1913_v3  ;;  %v1912_v0 = vpack.c.bf16 %v1899_v46, %v1898_v13  ;;  %v1896_v24 = vmul.f32 %v4170_v44, %v5859_v53  ;;  %v1476_v21 = vadd.f32 %v1464_v33, %v1462_v42  ;;  %v1467_v16 = vadd.f32 %v1466_v9, %v5592_v49 }
 0xb9c   :  { %v1911_v62 = vpack.c.bf16 %v1897_v30, %v1896_v24  ;;  %v1477_v17 = vadd.f32 %v1476_v21, %v1467_v16 }
 0xb9e   :  { %v4172_v47 = vpop.eup %4171 }
 0xb9f   :  { %v1894_v59 = vmul.f32 %v4172_v47, %v5871_v63 }
 0xba0   :  { %v1609_v38 = vpop.f32.mrf.mxu0 }
 0xba1   :  { %v1468_v27 = vpop.f32.mrf.mxu3 }
 0xba2   :  { %1923 = vmatpush.bf16.xpose.msra.mxu3 %v1912_v0  ;;  %v1469_v22 = vadd.f32 %v1468_v27, %v5599_v57  ;;  %v4446_v57 = vld [vmem:[#allocation7 + $0x70] sm:$0xff]  ;;  %v4447_v0 = vld [vmem:[#allocation7 + $0x78] sm:$0xff] }
 0xba3   :  { %v1603_v13 = vadd.f32 %v4446_v57, %v1602_v4  ;;  %v1605_v51 = vadd.f32 %v4447_v0, %v1604_v52  ;;  %v4448_v4 = vld [vmem:[#allocation7 + $0x80] sm:$0xff]  ;;  %v4450_v57 = vld [vmem:[#allocation7 + $0x90] sm:$0xff]  ;;  %v4451_v0 = vld [vmem:[#allocation7 + $0x98] sm:$0xff] }
 0xba4   :  { %v1478_v25 = vadd.f32 %v1477_v17, %v1469_v22  ;;  %v1608_v52 = vadd.f32 %v4448_v4, %v1607_v50 }
 0xba5   :  { %v1629_v24 = vpack.c.bf16 %v1605_v51, %v1603_v13 }
 0xba8   :  { %v1612_v23 = vpop.f32.mrf.mxu0 }
 0xba9   :  { %v1471_v48 = vpop.f32.mrf.mxu3  ;;  %v1613_v13 = vadd.f32 %v4450_v57, %v1612_v23 }
 0xbaa   :  { %1924 = vmatpush.bf16.xpose.msra.mxu3 %v1911_v62  ;;  %v1472_v34 = vadd.f32 %v1471_v48, %v5602_v35 }
 0xbac   :  { %v1479_v12 = vadd.f32 %v1478_v25, %v1472_v34 }
 0xbb0   :  { %v1614_v35 = vpop.f32.mrf.mxu0 }
 0xbb1   :  { %v1473_v49 = vpop.f32.mrf.mxu3  ;;  %v1615_v51 = vadd.f32 %v4451_v0, %v1614_v35 }
 0xbb2   :  { %v1474_v15 = vadd.f32 %v1473_v49, %v5607_v45 }
 0xbb4   :  { %v1480_v46 = vadd.f32 %v1479_v12, %v1474_v15 }
 0xbb6   :  { %v1481_v44 = vrot.slane %v1480_v46, 4 }
 0xbb8   :  { %v1482_v30 = vadd.f32 %v1481_v44, %v1480_v46  ;;  %v1617_v18 = vpop.f32.mrf.mxu0 }
 0xbba   :  { %v1483_v62 = vrot.slane %v1482_v30, 2 }
 0xbbc   :  { %v1484_v63 = vadd.f32 %v1483_v62, %v1482_v30  ;;  %v1631_v30 = vpack.c.bf16 %v1615_v51, %v1613_v13 }
 0xbbe   :  { %v1485_v20 = vrot.slane %v1484_v63, 1 }
 0xbed   :  { %v1849_v53 = vpop.xlane.xlu2 %1848 }
 0xbee   :  { %4173 = vrcp.f32 %v1849_v53  ;;  %v4449_v53 = vld [vmem:[#allocation7 + $0x88] sm:$0xff] }
 0xbef   :  { %v1610_v17 = vadd.f32 %v4449_v53, %v1609_v38 }
 0xbf4   :  { %v4174_v31 = vpop.eup %4173 }
 0xbf5   :  { %v1895_v3 = vmul.f32 %v4174_v31, %v5877_v56  ;;  %v1486_v56 = vadd.f32 %v1485_v20, %v1484_v63 }
 0xbf7   :  { %v1910_v8 = vpack.c.bf16 %v1895_v3, %v1894_v59  ;;  %v1487_v9 = vmul.f32 %v1486_v56, %v5616_v19  ;;  %v4452_v56 = vld [vmem:[#allocation7 + $0xa0] sm:$0xff] }
 0xbf9   :  { %1925 = vmatpush.bf16.xpose.msra.mxu3 %v1910_v8  ;;  %v1488_v27 = vsub.f32 %v1462_v42, %v1487_v9  ;;  %v1489_v45 = vsub.f32 %v1464_v33, %v1487_v9  ;;  %v5901_v58 = vsub.f32 %v1467_v16, %v1487_v9  ;;  %v5903_v21 = vsub.f32 %v1469_v22, %v1487_v9  ;;  %v1619_v33 = vpop.f32.mrf.mxu0 }
 0xbfa   :  { %v1492_v48 = vsub.f32 %v1472_v34, %v1487_v9  ;;  %v1493_v59 = vsub.f32 %v1474_v15, %v1487_v9  ;;  %v1630_v16 = vpack.c.bf16 %v1610_v17, %v1608_v52  ;;  %v1618_v9 = vadd.f32 %v4452_v56, %v1617_v18  ;;  %v4455_v56 = vld [vmem:[#allocation2 + $0x78] sm:$0xff] }
 0xbfb   :  { %v1494_v25 = vmul.f32 %v1488_v27, %v1488_v27  ;;  %v1495_v47 = vmul.f32 %v1489_v45, %v1489_v45  ;;  %v1496_v31 = vmul.f32 %v5901_v58, %v5901_v58  ;;  %v1497_v3 = vmul.f32 %v5903_v21, %v5903_v21 }
 0xbfc   :  { %v1498_v12 = vmul.f32 %v1492_v48, %v1492_v48  ;;  %v1499_v49 = vmul.f32 %v1493_v59, %v1493_v59  ;;  %v1632_v4 = vpack.c.bf16 %v1618_v9, %v1618_v9 }
 0xbfd   :  { %v1500_v42 = vadd.f32 %v1495_v47, %v1494_v25 }
 0xbff   :  { %v1501_v22 = vadd.f32 %v1500_v42, %v1496_v31 }
 0xc00   :  { %1926 = vmatmul.bf16.vlgmr.msra.gmra.mxu3 %v1629_v24 }
 0xc01   :  { %v1502_v50 = vadd.f32 %v1501_v22, %v1497_v3 }
 0xc03   :  { %v1503_v8 = vadd.f32 %v1502_v50, %v1498_v12 }
 0xc05   :  { %v1504_v38 = vadd.f32 %v1503_v8, %v1499_v49 }
 0xc07   :  { %v1505_v34 = vrot.slane %v1504_v38, 4 }
 0xc09   :  { %v1506_v46 = vadd.f32 %v1505_v34, %v1504_v38 }
 0xc0b   :  { %v1507_v15 = vrot.slane %v1506_v46, 2 }
 0xc0d   :  { %v1508_v44 = vadd.f32 %v1507_v15, %v1506_v46 }
 0xc0f   :  { %v1509_v24 = vrot.slane %v1508_v44, 1 }
 0xc10   :  { %1931 = vmatmul.bf16.gmra.mxu3 %v1630_v16 }
 0xc11   :  { %v1510_v62 = vadd.f32 %v1509_v24, %v1508_v44 }
 0xc13   :  { %v1511_v63 = vmul.f32 %v1510_v62, %v5616_v19  ;;  %v4453_v62 = vld [vmem:[#allocation2 + $0x80] sm:$0xff] }
 0xc15   :  { %v1512_v20 = vadd.f32 1e-05, %v1511_v63 }
 0xc17   :  { %4175 = vrsqrt.f32 %v1512_v20  ;;  %vm1519_vm7 = vweird.f32 %v1512_v20 }
 0xc1d   :  { %v4176_v52 = vpop.eup %4175 }
 0xc1e   :  { %v1514_v53 = vmul.f32 %v4176_v52, %v1512_v20  ;;  %vm1520_vm8 = vweird.f32 %v4176_v52 }
 0xc1f   :  { %vm1521_vm9 = vmor %vm1519_vm7, %vm1520_vm8 }
 0xc20   :  { %1936 = vmatmul.bf16.gmra.mxu3 %v1631_v30  ;;  %v1515_v17 = vmul.f32 %v4176_v52, %v1514_v53  ;;  %v4456_v53 = vld [vmem:[#allocation2 + $0x70] sm:$0xff] }
 0xc22   :  { %v1516_v23 = vmul.f32 0.5, %v1515_v17  ;;  %v4457_v17 = vld [vmem:[#allocation2 + $0x68] sm:$0xff] }
 0xc24   :  { %v1517_v35 = vsub.f32 1.5, %v1516_v23 }
 0xc26   :  { %v1518_v25 = vmul.f32 %v4176_v52, %v1517_v35 }
 0xc28   :  { %v1522_v47 = vsel %vm1521_vm9, %v4176_v52, %v1518_v25  ;;  %v5937_v25 = vld [vmem:[#allocation11] sm:$0xff] }
 0xc29   :  { %v1523_v31 = vmul.f32 %v1522_v47, %v1488_v27  ;;  %v1524_v3 = vmul.f32 %v1522_v47, %v1489_v45  ;;  %v1527_v42 = vmul.f32 %v1522_v47, %v1492_v48  ;;  %v1528_v33 = vmul.f32 %v1522_v47, %v1493_v59 }
 0xc2b   :  { %v1533_v16 = vmul.f32 %v1527_v42, %v5647_v43  ;;  %v1534_v18 = vmul.f32 %v1528_v33, %v5649_v55  ;;  %v1529_v12 = vmul.f32 %v1523_v31, %v5661_v29  ;;  %v1530_v22 = vmul.f32 %v1524_v3, %v5663_v2  ;;  %v5949_v33 = vld [vmem:[#allocation13 + $0x8] sm:$0xff] }
 0xc2c   :  { %v1525_v43 = vmul.f32 %v1522_v47, %v5901_v58  ;;  %v1526_v55 = vmul.f32 %v1522_v47, %v5903_v21 }
 0xc2d   :  { %v1539_v49 = vadd.f32 %v1533_v16, %v5655_v11  ;;  %v1540_v50 = vadd.f32 %v1534_v18, %v5657_v5  ;;  %v1535_v8 = vadd.f32 %v1529_v12, %v5669_v54  ;;  %v1536_v38 = vadd.f32 %v1530_v22, %v5671_v60  ;;  %v5952_v12 = vld [vmem:[#allocation13] sm:$0xff] }
 0xc2e   :  { %v1531_v29 = vmul.f32 %v1525_v43, %v5679_v28  ;;  %v1532_v2 = vmul.f32 %v1526_v55, %v5681_v14 }
 0xc2f   :  { %1546 = vst [vmem:[#allocation17 + $0x50] sm:$0xff] %v1539_v49  ;;  %v5955_v49 = vld [vmem:[#allocation13 + $0x10] sm:$0xff] }
 0xc30   :  { %1941 = vmatmul.bf16.gmra.mxu3 %v1632_v4  ;;  %1547 = vst [vmem:[#allocation17 + $0x58] sm:$0xff] %v1540_v50  ;;  %v1537_v11 = vadd.f32 %v1531_v29, %v5685_v37  ;;  %v1538_v5 = vadd.f32 %v1532_v2, %v5687_v26  ;;  %v5961_v29 = vld [vmem:[#allocation13 + $0x20] sm:$0xff] }
 0xc31   :  { %1542 = vst [vmem:[#allocation17 + $0x30] sm:$0xff] %v1535_v8 }
 0xc32   :  { %1543 = vst [vmem:[#allocation17 + $0x38] sm:$0xff] %v1536_v38  ;;  %v5958_v38 = vld [vmem:[#allocation13 + $0x18] sm:$0xff] }
 0xc33   :  { %1544 = vst [vmem:[#allocation17 + $0x40] sm:$0xff] %v1537_v11 }
 0xc34   :  { %1545 = vst [vmem:[#allocation17 + $0x48] sm:$0xff] %v1538_v5 }
 0xc83   :  { %v1927_v54 = vpop.f32.mrf.mxu3 }
 0xc8b   :  { %v1929_v60 = vpop.f32.mrf.mxu3 }
 0xc8c   :  { %v1946_v37 = vpack.c.bf16 %v1929_v60, %v1927_v54  ;;  %v5964_v60 = vld [vmem:[#allocation13 + $0x28] sm:$0xff] }
 0xc93   :  { %v1932_v27 = vpop.f32.mrf.mxu3 }
 0xc9b   :  { %v1934_v45 = vpop.f32.mrf.mxu3 }
 0xc9c   :  { %v1947_v14 = vpack.c.bf16 %v1934_v45, %v1932_v27 }
 0xca3   :  { %v1937_v48 = vpop.f32.mrf.mxu3 }
 0xcab   :  { %v1939_v59 = vpop.f32.mrf.mxu3 }
 0xcac   :  { %v1948_v28 = vpack.c.bf16 %v1939_v59, %v1937_v48 }
 0xcb3   :  { %v1942_v34 = vpop.f32.mrf.mxu3 }
 0xcb4   :  { %v1949_v58 = vpack.c.bf16 %v1942_v34, %v1942_v34 }
 0xcb6   :  { %v1951_v21 = vsel %vm591_vm1, %v1949_v58, 0 }
 0xcb7   :  { %1957 = vmatpush.bf16.msrb.mxu3 %v1951_v21 }
 0xcbb   :  { %v1944_v46 = vpop.f32.mrf.mxu3  ;;  %1958 = vmatpush.bf16.msrb.mxu3 %v1948_v28 }
 0xcbf   :  { %1959 = vmatpush.bf16.msrb.mxu3 %v1947_v14 }
 0xcc3   :  { %1960 = vmatpush.bf16.msrb.mxu3 %v1946_v37 }
 0xcc6   :  { %3851 = vmatmul.msk.bf16.vlgmr.msrb.gmra.mxu3 %vm566_vm2, %v5695_v36 }
 0xcd6   :  { %3852 = vmatmul.msk.bf16.gmra.mxu3 %vm566_vm2, %v5703_v32  ;;  %v4454_v32 = vld [vmem:[#allocation2 + $0x88] sm:$0xff] }
 0xce6   :  { %3853 = vmatmul.msk.bf16.gmra.mxu3 %vm566_vm2, %v5707_v7 }
 0xd49   :  { %v1962_v26 = vpop.f32.mrf.mxu3 }
 0xd4a   :  { %v1963_v52 = vadd.f32 %v5726_v10, %v1962_v26  ;;  %v5945_v10 = vld [vmem:[#allocation11 + $0x10] sm:$0xff] }
 0xd51   :  { %v1964_v57 = vpop.f32.mrf.mxu3 }
 0xd52   :  { %v1965_v7 = vadd.f32 %v5723_v41, %v1964_v57  ;;  %v5941_v41 = vld [vmem:[#allocation11 + $0x8] sm:$0xff] }
 0xd59   :  { %v1967_v13 = vpop.f32.mrf.mxu3 }
 0xd5a   :  { %v1968_v36 = vadd.f32 %v5720_v1, %v1967_v13 }
 0xd61   :  { %v1969_v0 = vpop.f32.mrf.mxu3 }
 0xd62   :  { %v1970_v30 = vadd.f32 %v5714_v61, %v1969_v0  ;;  %v1978_v61 = vadd.f32 %v4457_v17, %v1965_v7 }
 0xd64   :  { %v1980_v9 = vadd.f32 %v4455_v56, %v1970_v30 }
 0xd69   :  { %v1972_v51 = vpop.f32.mrf.mxu3 }
 0xd6a   :  { %v1973_v15 = vadd.f32 %v5711_v39, %v1972_v51  ;;  %v1979_v39 = vadd.f32 %v4456_v53, %v1968_v36 }
 0xd6c   :  { %v1981_v63 = vadd.f32 %v4453_v62, %v1973_v15  ;;  %v1984_v23 = vpack.c.bf16 %v1980_v9, %v1979_v39 }
 0xd71   :  { %v1974_v44 = vpop.f32.mrf.mxu3 }
 0xd72   :  { %v1975_v24 = vadd.f32 %v5717_v6, %v1974_v44  ;;  %v4458_v6 = vld [vmem:[#allocation2 + $0x60] sm:$0xff] }
 0xd73   :  { %v1977_v35 = vadd.f32 %v4458_v6, %v1963_v52 }
 0xd74   :  { %v1982_v20 = vadd.f32 %v4454_v32, %v1975_v24 }
 0xd75   :  { %v1983_v1 = vpack.c.bf16 %v1978_v61, %v1977_v35 }
 0xd76   :  { %v1985_v4 = vpack.c.bf16 %v1982_v20, %v1981_v63 }
 0xd78   :  { %1991 = vmatpush.bf16.msrb.mxu2 %v1985_v4 }
 0xd7c   :  { %1992 = vmatpush.bf16.msrb.mxu2 %v1984_v23 }
 0xd80   :  { %1993 = vmatpush.bf16.msrb.mxu2 %v1983_v1 }
 0xd83   :  { %3854 = vmatmul.msk.bf16.vlgmr.msrb.gmra.mxu2 %vm352_vm0, %v5937_v25 }
 0xd93   :  { %3855 = vmatmul.msk.bf16.gmra.mxu2 %vm352_vm0, %v5941_v41 }
 0xda3   :  { %3856 = vmatmul.msk.bf16.gmra.mxu2 %vm352_vm0, %v5945_v10 }
 0xe06   :  { %v1995_v47 = vpop.f32.mrf.mxu2 }
 0xe07   :  { %v1996_v22 = vadd.f32 %v5952_v12, %v1995_v47 }
 0xe0e   :  { %v1997_v31 = vpop.f32.mrf.mxu2 }
 0xe0f   :  { %v1998_v16 = vadd.f32 %v5949_v33, %v1997_v31 }
 0xe11   :  { %v2010_v8 = vadd.f32 %v1998_v16, %v1996_v22 }
 0xe16   :  { %v2000_v3 = vpop.f32.mrf.mxu2 }
 0xe17   :  { %v2001_v50 = vadd.f32 %v5955_v49, %v2000_v3 }
 0xe19   :  { %v2011_v55 = vadd.f32 %v2010_v8, %v2001_v50 }
 0xe1e   :  { %v2002_v42 = vpop.f32.mrf.mxu2 }
 0xe1f   :  { %v2003_v43 = vadd.f32 %v5958_v38, %v2002_v42 }
 0xe21   :  { %v2012_v11 = vadd.f32 %v2011_v55, %v2003_v43 }
 0xe26   :  { %v2005_v18 = vpop.f32.mrf.mxu2 }
 0xe27   :  { %v2006_v2 = vadd.f32 %v5961_v29, %v2005_v18 }
 0xe29   :  { %v2013_v54 = vadd.f32 %v2012_v11, %v2006_v2 }
 0xe2e   :  { %v2007_v5 = vpop.f32.mrf.mxu2 }
 0xe2f   :  { %v2008_v27 = vadd.f32 %v5964_v60, %v2007_v5  ;;  %v5975_v5 = vld [vmem:[#allocation14 + $0x10] sm:$0xff] }
 0xe31   :  { %v2014_v45 = vadd.f32 %v2013_v54, %v2008_v27 }
 0xe33   :  { %v2015_v48 = vrot.slane %v2014_v45, 4 }
 0xe35   :  { %v2016_v59 = vadd.f32 %v2015_v48, %v2014_v45  ;;  %v5981_v48 = vld [vmem:[#allocation14] sm:$0xff] }
 0xe37   :  { %v2017_v34 = vrot.slane %v2016_v59, 2 }
 0xe39   :  { %v2018_v58 = vadd.f32 %v2017_v34, %v2016_v59  ;;  %v5984_v34 = vld [vmem:[#allocation14 + $0x8] sm:$0xff] }
 0xe3b   :  { %v2019_v21 = vrot.slane %v2018_v58, 1 }
 0xe3d   :  { %v2020_v28 = vadd.f32 %v2019_v21, %v2018_v58  ;;  %v5987_v21 = vld [vmem:[#allocation16 + $0x28] sm:$0xff] }
 0xe3f   :  { %v2021_v46 = vmul.f32 %v2020_v28, %v5616_v19 }
 0xe41   :  { %v2022_v14 = vsub.f32 %v1996_v22, %v2021_v46  ;;  %v2023_v37 = vsub.f32 %v1998_v16, %v2021_v46  ;;  %v2024_v26 = vsub.f32 %v2001_v50, %v2021_v46  ;;  %v2025_v57 = vsub.f32 %v2003_v43, %v2021_v46  ;;  %v5969_v43 = vld [vmem:[#allocation14 + $0x28] sm:$0xff] }
 0xe42   :  { %v2026_v51 = vsub.f32 %v2006_v2, %v2021_v46  ;;  %v2027_v30 = vsub.f32 %v2008_v27, %v2021_v46  ;;  %v5972_v2 = vld [vmem:[#allocation14 + $0x20] sm:$0xff]  ;;  %v5978_v27 = vld [vmem:[#allocation14 + $0x18] sm:$0xff]  ;;  %v5992_v46 = vld [vmem:[#allocation16 + $0x20] sm:$0xff] }
 0xe43   :  { %v2028_v13 = vmul.f32 %v2022_v14, %v2022_v14  ;;  %v2029_v0 = vmul.f32 %v2023_v37, %v2023_v37  ;;  %v2030_v15 = vmul.f32 %v2024_v26, %v2024_v26  ;;  %v2031_v24 = vmul.f32 %v2025_v57, %v2025_v57 }
 0xe44   :  { %v2032_v62 = vmul.f32 %v2026_v51, %v2026_v51  ;;  %v2033_v32 = vmul.f32 %v2027_v30, %v2027_v30 }
 0xe45   :  { %v2034_v44 = vadd.f32 %v2029_v0, %v2028_v13 }
 0xe47   :  { %v2035_v36 = vadd.f32 %v2034_v44, %v2030_v15  ;;  %v6016_v44 = vld [vmem:[#allocation16 + $0x8] sm:$0xff] }
 0xe49   :  { %v2036_v63 = vadd.f32 %v2035_v36, %v2031_v24 }
 0xe4b   :  { %v2037_v20 = vadd.f32 %v2036_v63, %v2032_v62  ;;  %v6032_v62 = vld [vmem:[%s7016_s3] sm:$0xff]  ;;  %v6039_v63 = vld [vmem:[%s7016_s3 + $0x8] sm:$0xff] }
 0xe4d   :  { %v2038_v7 = vadd.f32 %v2037_v20, %v2033_v32  ;;  %v6046_v32 = vld [vmem:[%s7016_s3 + $0x10] sm:$0xff]  ;;  %v6053_v20 = vld [vmem:[%s7016_s3 + $0x18] sm:$0xff] }
 0xe4f   :  { %v2039_v56 = vrot.slane %v2038_v7, 4 }
 0xe51   :  { %v2040_v9 = vadd.f32 %v2039_v56, %v2038_v7  ;;  %v6060_v7 = vld [vmem:[%s7016_s3 + $0x20] sm:$0xff]  ;;  %v6067_v56 = vld [vmem:[%s7016_s3 + $0x28] sm:$0xff] }
 0xe52   :  { %7113 = vst [vmem:[#allocation25_spill] sm:$0xff] %v6067_v56 }
 0xe53   :  { %v2041_v4 = vrot.slane %v2040_v9, 2 }
 0xe55   :  { %v2042_v52 = vadd.f32 %v2041_v4, %v2040_v9  ;;  %v6074_v9 = vld [vmem:[%s7016_s3 + $0x30] sm:$0xff]  ;;  %v6081_v4 = vld [vmem:[%s7016_s3 + $0x38] sm:$0xff] }
 0xe56   :  { %7114 = vst [vmem:[#allocation28_spill] sm:$0xff] %v6074_v9 }
 0xe57   :  { %v2043_v53 = vrot.slane %v2042_v52, 1  ;;  %7115 = vst [vmem:[#allocation26_spill] sm:$0xff] %v6081_v4 }
 0xe59   :  { %v2044_v39 = vadd.f32 %v2043_v53, %v2042_v52  ;;  %v6088_v53 = vld [vmem:[%s7016_s3 + $0x40] sm:$0xff] }
 0xe5a   :  { %7116 = vst [vmem:[#allocation31_spill] sm:$0xff] %v6088_v53 }
 0xe5b   :  { %v2045_v17 = vmul.f32 %v2044_v39, %v5616_v19 }
 0xe5d   :  { %v2046_v61 = vadd.f32 1e-05, %v2045_v17 }
 0xe5f   :  { %4177 = vrsqrt.f32 %v2046_v61  ;;  %vm2053_vm11 = vweird.f32 %v2046_v61 }
 0xe65   :  { %v4178_v23 = vpop.eup %4177 }
 0xe66   :  { %v2048_v6 = vmul.f32 %v4178_v23, %v2046_v61  ;;  %vm2054_vm10 = vweird.f32 %v4178_v23  ;;  %v6095_v61 = vld [vmem:[%s7016_s3 + $0x48] sm:$0xff] }
 0xe67   :  { %vm2055_vm12 = vmor %vm2053_vm11, %vm2054_vm10  ;;  %7117 = vst [vmem:[#allocation27_spill] sm:$0xff] %v6095_v61 }
 0xe68   :  { %v2049_v35 = vmul.f32 %v4178_v23, %v2048_v6 }
 0xe6a   :  { %v2050_v1 = vmul.f32 0.5, %v2049_v35 }
 0xe6c   :  { %v2051_v47 = vsub.f32 1.5, %v2050_v1 }
 0xe6e   :  { %v2052_v31 = vmul.f32 %v4178_v23, %v2051_v47  ;;  %v6101_v47 = vld [vmem:[#allocation7 + $0x30] sm:$0xff] }
 0xe6f   :  { %7118 = vst [vmem:[#allocation24_spill] sm:$0xff] %v6101_v47 }
 0xe70   :  { %v2056_v3 = vsel %vm2055_vm12, %v4178_v23, %v2052_v31 }
 0xe71   :  { %v2061_v42 = vmul.f32 %v2056_v3, %v2026_v51  ;;  %v2062_v16 = vmul.f32 %v2056_v3, %v2027_v30  ;;  %v2059_v18 = vmul.f32 %v2056_v3, %v2024_v26  ;;  %v2060_v22 = vmul.f32 %v2056_v3, %v2025_v57  ;;  %v6002_v57 = vld [vmem:[#allocation16 + $0x18] sm:$0xff]  ;;  %v6010_v51 = vld [vmem:[#allocation16] sm:$0xff] }
 0xe72   :  { %v2057_v50 = vmul.f32 %v2056_v3, %v2022_v14  ;;  %v2058_v8 = vmul.f32 %v2056_v3, %v2023_v37  ;;  %v5997_v37 = vld [vmem:[#allocation16 + $0x10] sm:$0xff] }
 0xe73   :  { %v2068_v55 = vmul.f32 %v5969_v43, %v2062_v16  ;;  %v2067_v11 = vmul.f32 %v5972_v2, %v2061_v42  ;;  %v2065_v54 = vmul.f32 %v5975_v5, %v2059_v18  ;;  %v2066_v45 = vmul.f32 %v5978_v27, %v2060_v22  ;;  %v6104_v42 = vld [vmem:[#allocation7 + $0x28] sm:$0xff]  ;;  %v6107_v22 = vld [vmem:[#allocation7 + $0x20] sm:$0xff] }
 0xe74   :  { %v2063_v59 = vmul.f32 %v5981_v48, %v2057_v50  ;;  %v2064_v58 = vmul.f32 %v5984_v34, %v2058_v8  ;;  %7119 = vst [vmem:[#allocation32_spill] sm:$0xff] %v6104_v42 }
 0xe75   :  { %v5990_v28 = vadd.f32 %v5987_v21, %v2068_v55  ;;  %v5995_v14 = vadd.f32 %v5992_v46, %v2067_v11  ;;  %v6000_v26 = vadd.f32 %v5997_v37, %v2065_v54  ;;  %v6005_v13 = vadd.f32 %v6002_v57, %v2066_v45  ;;  %7120 = vst [vmem:[#allocation29_spill] sm:$0xff] %v6107_v22  ;;  %v6110_v55 = vld [vmem:[#allocation7 + $0x18] sm:$0xff]  ;;  %v6113_v45 = vld [vmem:[#allocation7 + $0x10] sm:$0xff] }
 0xe76   :  { %v6013_v15 = vadd.f32 %v6010_v51, %v2063_v59  ;;  %v6019_v30 = vadd.f32 %v6016_v44, %v2064_v58  ;;  %7121 = vst [vmem:[#allocation35_spill] sm:$0xff] %v6110_v55 }
 0xe77   :  { %2081 = vst [vmem:[#allocation17 + $0x88] sm:$0xff] %v5990_v28  ;;  %v2084_v0 = vpack.c.bf16 %v5990_v28, %v5995_v14  ;;  %v2083_v24 = vpack.c.bf16 %v6005_v13, %v6000_v26 }
 0xe78   :  { %2080 = vst [vmem:[#allocation17 + $0x80] sm:$0xff] %v5995_v14  ;;  %v2082_v36 = vpack.c.bf16 %v6019_v30, %v6013_v15 }
 0xe79   :  { %2090 = vmatpush.bf16.msrb.mxu1 %v2084_v0  ;;  %2078 = vst [vmem:[#allocation17 + $0x70] sm:$0xff] %v6000_v26  ;;  %v6116_v0 = vld [vmem:[#allocation7 + $0x8] sm:$0xff] }
 0xe7a   :  { %2079 = vst [vmem:[#allocation17 + $0x78] sm:$0xff] %v6005_v13 }
 0xe7b   :  { %2076 = vst [vmem:[#allocation17 + $0x60] sm:$0xff] %v6013_v15 }
 0xe7c   :  { %2077 = vst [vmem:[#allocation17 + $0x68] sm:$0xff] %v6019_v30 }
 0xe7d   :  { %2091 = vmatpush.bf16.msrb.mxu1 %v2083_v24  ;;  %7122 = vst [vmem:[#allocation30_spill] sm:$0xff] %v6113_v45 }
 0xe7e   :  { %7123 = vst [vmem:[#allocation36_spill] sm:$0xff] %v6116_v0 }
 0xe81   :  { %2092 = vmatpush.bf16.msrb.mxu1 %v2082_v36 }
 0xe84   :  { %3857 = vmatmul.msk.bf16.vlgmr.msrb.gmra.mxu1 %vm352_vm0, %v6032_v62 }
 0xe94   :  { %3858 = vmatmul.msk.bf16.gmra.mxu1 %vm352_vm0, %v6039_v63 }
 0xea4   :  { %3859 = vmatmul.msk.bf16.gmra.mxu1 %vm352_vm0, %v6046_v32 }
 0xeb4   :  { %3860 = vmatmul.msk.bf16.gmra.mxu1 %vm352_vm0, %v6053_v20 }
 0xec4   :  { %3861 = vmatmul.msk.bf16.gmra.mxu1 %vm352_vm0, %v6060_v7 }
 0xed4   :  { %3862 = vmatmul.msk.bf16.gmra.mxu1 %vm352_vm0, %v6067_v56 }
 0xee4   :  { %3863 = vmatmul.msk.bf16.gmra.mxu1 %vm352_vm0, %v6074_v9 }
 0xef4   :  { %3864 = vmatmul.msk.bf16.gmra.mxu1 %vm352_vm0, %v6081_v4 }
 0xf01   :  { %v2094_v52 = vpop.f32.mrf.mxu1 }
 0xf04   :  { %3865 = vmatmul.msk.bf16.gmra.mxu1 %vm352_vm0, %v6088_v53 }
 0xf09   :  { %v2096_v39 = vpop.f32.mrf.mxu1 }
 0xf0a   :  { %v2097_v24 = vadd.f32 %v6116_v0, %v2096_v39  ;;  %v6128_v39 = vld [vmem:[#allocation7 + $0x68] sm:$0xff]  ;;  %v6199_v0 = vld [vmem:[%s7015_s2 + $0x30] sm:$0xff] }
 0xf0b   :  { %7127 = vst [vmem:[#allocation39_spill] sm:$0xff] %v6128_v39 }
 0xf0c   :  { %7142 = vst [vmem:[#allocation54_spill] sm:$0xff] %v6199_v0 }
 0xf11   :  { %v2099_v17 = vpop.f32.mrf.mxu1 }
 0xf12   :  { %v2100_v59 = vadd.f32 %v6113_v45, %v2099_v17 }
 0xf14   :  { %3866 = vmatmul.msk.bf16.gmra.mxu1 %vm352_vm0, %v6095_v61 }
 0xf19   :  { %v2101_v23 = vpop.f32.mrf.mxu1 }
 0xf1a   :  { %v2102_v11 = vadd.f32 %v6110_v55, %v2101_v23  ;;  %v6122_v23 = vld [vmem:[#allocation5] sm:$0xff] }
 0xf1b   :  { %7125 = vst [vmem:[#allocation34_spill] sm:$0xff] %v6122_v23 }
 0xf1c   :  { %v2149_v58 = vpack.c.bf16 %v2102_v11, %v2100_v59  ;;  %v6131_v11 = vld [vmem:[#allocation7 + $0x58] sm:$0xff]  ;;  %v6134_v59 = vld [vmem:[#allocation7 + $0x60] sm:$0xff] }
 0xf1d   :  { %7128 = vst [vmem:[#allocation40_spill] sm:$0xff] %v6131_v11 }
 0xf1e   :  { %7129 = vst [vmem:[#allocation41_spill] sm:$0xff] %v6134_v59 }
 0xf21   :  { %v2104_v6 = vpop.f32.mrf.mxu1 }
 0xf22   :  { %v2105_v50 = vadd.f32 %v6107_v22, %v2104_v6 }
 0xf24   :  { %3867 = vmatmul.msk.bf16.gmra.mxu1 %vm352_vm0, %v5339_v40 }
 0xf29   :  { %v2106_v35 = vpop.f32.mrf.mxu1 }
 0xf2a   :  { %v2107_v16 = vadd.f32 %v6104_v42, %v2106_v35  ;;  %v6119_v35 = vld [vmem:[#allocation7] sm:$0xff] }
 0xf2b   :  { %7124 = vst [vmem:[#allocation33_spill] sm:$0xff] %v6119_v35  ;;  %v2095_v6 = vadd.f32 %v6119_v35, %v2094_v52 }
 0xf2c   :  { %v2150_v8 = vpack.c.bf16 %v2107_v16, %v2105_v50  ;;  %v6125_v16 = vld [vmem:[#allocation5 + $0x8] sm:$0xff] }
 0xf2d   :  { %7126 = vst [vmem:[#allocation37_spill] sm:$0xff] %v6125_v16 }
 0xf31   :  { %v2109_v1 = vpop.f32.mrf.mxu1 }
 0xf32   :  { %v2110_v31 = vadd.f32 %v6101_v47, %v2109_v1  ;;  %v2148_v1 = vpack.c.bf16 %v2097_v24, %v2095_v6 }
 0xf34   :  { %v2151_v3 = vpack.c.bf16 %v2110_v31, %v2110_v31 }
 0xf36   :  { %2164 = vmatpush.bf16.xpose.msra.mxu3 %v2151_v3 }
 0xf39   :  { %v2111_v18 = vpop.f32.mrf.mxu1 }
 0xf3e   :  { %2165 = vmatpush.bf16.xpose.msra.mxu3 %v2150_v8 }
 0xf41   :  { %v2114_v54 = vpop.f32.mrf.mxu1 }
 0xf46   :  { %2166 = vmatpush.bf16.xpose.msra.mxu3 %v2149_v58 }
 0xf49   :  { %v2116_v36 = vpop.f32.mrf.mxu1 }
 0xf4e   :  { %2167 = vmatpush.bf16.xpose.msra.mxu3 %v2148_v1  ;;  %v6138_v1 = vld [vmem:[#allocation7 + $0x48] sm:$0xff] }
 0xf4f   :  { %7130 = vst [vmem:[#allocation42_spill] sm:$0xff] %v6138_v1 }
 0xf51   :  { %v2119_v31 = vpop.f32.mrf.mxu1 }
 0xf55   :  { %2168 = vmatmul.bf16.vlgmr.msra.gmra.mxu3 %v6122_v23  ;;  %v6141_v23 = vld [vmem:[#allocation7 + $0x50] sm:$0xff] }
 0xf56   :  { %7131 = vst [vmem:[#allocation43_spill] sm:$0xff] %v6141_v23  ;;  %v2120_v35 = vadd.f32 %v6141_v23, %v2119_v31  ;;  %v6153_v31 = vld [vmem:[#allocation5 + $0x18] sm:$0xff] }
 0xf57   :  { %7135 = vst [vmem:[#allocation47_spill] sm:$0xff] %v6153_v31 }
 0xf59   :  { %v2121_v3 = vpop.f32.mrf.mxu1 }
 0xf5a   :  { %v2122_v52 = vadd.f32 %v6131_v11, %v2121_v3  ;;  %v6144_v3 = vld [vmem:[#allocation7 + $0x40] sm:$0xff] }
 0xf5b   :  { %7132 = vst [vmem:[#allocation44_spill] sm:$0xff] %v6144_v3  ;;  %v2115_v11 = vadd.f32 %v6144_v3, %v2114_v54  ;;  %v6159_v54 = vld [vmem:[#allocation5 + $0x28] sm:$0xff] }
 0xf5c   :  { %7137 = vst [vmem:[#allocation49_spill] sm:$0xff] %v6159_v54 }
 0xf61   :  { %v2124_v17 = vpop.f32.mrf.mxu1 }
 0xf62   :  { %v2125_v58 = vadd.f32 %v6134_v59, %v2124_v17  ;;  %v6147_v17 = vld [vmem:[#allocation5 + $0x10] sm:$0xff] }
 0xf63   :  { %7133 = vst [vmem:[#allocation45_spill] sm:$0xff] %v6147_v17 }
 0xf65   :  { %2173 = vmatmul.bf16.gmra.mxu3 %v6125_v16  ;;  %v2117_v16 = vadd.f32 %v6138_v1, %v2116_v36 }
 0xf69   :  { %v2126_v50 = vpop.f32.mrf.mxu1 }
 0xf6a   :  { %v2127_v8 = vadd.f32 %v6128_v39, %v2126_v50  ;;  %v2154_v50 = vpack.c.bf16 %v2125_v58, %v2122_v52  ;;  %v2153_v39 = vpack.c.bf16 %v2120_v35, %v2117_v16  ;;  %v6156_v35 = vld [vmem:[#allocation5 + $0x20] sm:$0xff]  ;;  %v6162_v16 = vld [vmem:[#allocation5 + $0x30] sm:$0xff] }
 0xf6b   :  { %7136 = vst [vmem:[#allocation48_spill] sm:$0xff] %v6156_v35 }
 0xf6c   :  { %v2155_v24 = vpack.c.bf16 %v2127_v8, %v2127_v8  ;;  %v6150_v8 = vld [vmem:[#allocation7 + $0x38] sm:$0xff]  ;;  %7138 = vst [vmem:[#allocation50_spill] sm:$0xff] %v6162_v16 }
 0xf6d   :  { %7134 = vst [vmem:[#allocation46_spill] sm:$0xff] %v6150_v8  ;;  %v2112_v36 = vadd.f32 %v6150_v8, %v2111_v18  ;;  %v6165_v18 = vld [vmem:[#allocation5 + $0x38] sm:$0xff] }
 0xf6e   :  { %v2242_v6 = vsel %vm591_vm1, %v2155_v24, 0  ;;  %7139 = vst [vmem:[#allocation51_spill] sm:$0xff] %v6165_v18 }
 0xf6f   :  { %2248 = vmatpush.bf16.msra.mxu0 %v2242_v6  ;;  %v2152_v24 = vpack.c.bf16 %v2115_v11, %v2112_v36 }
 0xf73   :  { %2249 = vmatpush.bf16.msra.mxu0 %v2154_v50 }
 0xf75   :  { %2178 = vmatmul.bf16.gmra.mxu3 %v6147_v17 }
 0xf77   :  { %2250 = vmatpush.bf16.msra.mxu0 %v2153_v39 }
 0xf7b   :  { %2251 = vmatpush.bf16.msra.mxu0 %v2152_v24 }
 0xf85   :  { %2183 = vmatmul.bf16.gmra.mxu3 %v6153_v31 }
 0xf95   :  { %2188 = vmatmul.bf16.gmra.mxu3 %v6156_v35 }
 0xfa5   :  { %2193 = vmatmul.bf16.gmra.mxu3 %v6159_v54 }
 0xfb5   :  { %2198 = vmatmul.bf16.gmra.mxu3 %v6162_v16 }
 0xfc5   :  { %2203 = vmatmul.bf16.gmra.mxu3 %v6165_v18 }
 0xfd8   :  { %v2169_v39 = vpop.f32.mrf.mxu3 }
 0xfe0   :  { %v2171_v11 = vpop.f32.mrf.mxu3 }
 0xfe1   :  { %v2209_v52 = vpack.c.bf16 %v2171_v11, %v2169_v39 }
 0xfe3   :  { %3868 = vmatmul.msk.bf16.vlgmr.msra.gmra.mxu0 %vm566_vm2, %v2209_v52 }
 0xfe8   :  { %v2174_v58 = vpop.f32.mrf.mxu3 }
 0xff0   :  { %v2176_v6 = vpop.f32.mrf.mxu3 }
 0xff1   :  { %v2210_v50 = vpack.c.bf16 %v2176_v6, %v2174_v58 }
 0xff3   :  { %3869 = vmatmul.msk.bf16.gmra.mxu0 %vm566_vm2, %v2210_v50 }
 0xff8   :  { %v2179_v36 = vpop.f32.mrf.mxu3 }
0x1000   :  { %v2181_v24 = vpop.f32.mrf.mxu3 }
0x1001   :  { %v2211_v54 = vpack.c.bf16 %v2181_v24, %v2179_v36 }
0x1003   :  { %3870 = vmatmul.msk.bf16.gmra.mxu0 %vm566_vm2, %v2211_v54 }
0x1008   :  { %v2184_v16 = vpop.f32.mrf.mxu3 }
0x1010   :  { %v2186_v35 = vpop.f32.mrf.mxu3 }
0x1011   :  { %v2212_v31 = vpack.c.bf16 %v2186_v35, %v2184_v16 }
0x1013   :  { %3871 = vmatmul.msk.bf16.gmra.mxu0 %vm566_vm2, %v2212_v31 }
0x1018   :  { %v2189_v18 = vpop.f32.mrf.mxu3 }
0x1020   :  { %v2191_v8 = vpop.f32.mrf.mxu3 }
0x1021   :  { %v2213_v39 = vpack.c.bf16 %v2191_v8, %v2189_v18 }
0x1023   :  { %3872 = vmatmul.msk.bf16.gmra.mxu0 %vm566_vm2, %v2213_v39 }
0x1028   :  { %v2194_v11 = vpop.f32.mrf.mxu3 }
0x1030   :  { %v2196_v52 = vpop.f32.mrf.mxu3 }
0x1031   :  { %v2214_v58 = vpack.c.bf16 %v2196_v52, %v2194_v11 }
0x1033   :  { %3873 = vmatmul.msk.bf16.gmra.mxu0 %vm566_vm2, %v2214_v58 }
0x1038   :  { %v2199_v6 = vpop.f32.mrf.mxu3 }
0x1040   :  { %v2201_v50 = vpop.f32.mrf.mxu3 }
0x1041   :  { %v2215_v36 = vpack.c.bf16 %v2201_v50, %v2199_v6 }
0x1043   :  { %3874 = vmatmul.msk.bf16.gmra.mxu0 %vm566_vm2, %v2215_v36  ;;  %v6181_v36 = vld [vmem:[%s7015_s2 + $0x60] sm:$0xff] }
0x1044   :  { %7140 = vst [vmem:[#allocation52_spill] sm:$0xff] %v6181_v36 }
0x1048   :  { %v2204_v54 = vpop.f32.mrf.mxu3 }
0x1050   :  { %v2206_v24 = vpop.f32.mrf.mxu3 }
0x1051   :  { %v2216_v35 = vpack.c.bf16 %v2206_v24, %v2204_v54 }
0x1053   :  { %3875 = vmatmul.msk.bf16.gmra.mxu0 %vm566_vm2, %v2216_v35  ;;  %v6190_v35 = vld [vmem:[%s7015_s2 + $0x58] sm:$0xff] }
0x1054   :  { %7141 = vst [vmem:[#allocation53_spill] sm:$0xff] %v6190_v35 }
0x1060   :  { %v2253_v31 = vpop.f32.mrf.mxu0 }
0x1068   :  { %v6176_v16 = vpop.f32.mrf.mxu0 }
0x1070   :  { %v2258_v8 = vpop.f32.mrf.mxu0 }
0x1078   :  { %v2260_v18 = vpop.f32.mrf.mxu0 }
0x1080   :  { %v2263_v39 = vpop.f32.mrf.mxu0 }
0x1088   :  { %v2265_v17 = vpop.f32.mrf.mxu0 }
0x1090   :  { %v2268_v11 = vpop.f32.mrf.mxu0 }
0x1098   :  { %v2270_v52 = vpop.f32.mrf.mxu0 }
0x10a0   :  { %v2273_v58 = vpop.f32.mrf.mxu0 }
0x10a8   :  { %v2275_v3 = vpop.f32.mrf.mxu0 }
0x10b0   :  { %v2278_v23 = vpop.f32.mrf.mxu0 }
0x10b8   :  { %v2280_v6 = vpop.f32.mrf.mxu0 }
0x10b9   :  { %v6193_v1 = vadd.f32 %v6190_v35, %v2280_v6  ;;  %v6214_v35 = vld [vmem:[%s7015_s2 + $0x28] sm:$0xff] }
0x10ba   :  { %7144 = vst [vmem:[#allocation56_spill] sm:$0xff] %v6214_v35  ;;  %v6217_v55 = vadd.f32 %v6214_v35, %v2265_v17  ;;  %v6235_v17 = vld [vmem:[%s7015_s2 + $0x50] sm:$0xff] }
0x10bb   :  { %7147 = vst [vmem:[#allocation59_spill] sm:$0xff] %v6235_v17  ;;  %v2279_v35 = vadd.f32 %v6235_v17, %v2278_v23  ;;  %v6253_v23 = vld [vmem:[%s7015_s2 + $0x38] sm:$0xff] }
0x10bc   :  { %7150 = vst [vmem:[#allocation62_spill] sm:$0xff] %v6253_v23  ;;  %v2271_v17 = vadd.f32 %v6253_v23, %v2270_v52  ;;  %v6277_v52 = vld [vmem:[%s7015_s2 + $0x18] sm:$0xff] }
0x10bd   :  { %7153 = vst [vmem:[#allocation65_spill] sm:$0xff] %v6277_v52 }
0x10c0   :  { %v2283_v50 = vpop.f32.mrf.mxu0 }
0x10c1   :  { %v6184_v54 = vadd.f32 %v6181_v36, %v2283_v50  ;;  %v6202_v50 = vadd.f32 %v6199_v0, %v2268_v11  ;;  %v6207_v36 = vld [vmem:[%s7015_s2 + $0x70] sm:$0xff]  ;;  %v6222_v11 = vld [vmem:[%s7015_s2 + $0x78] sm:$0xff] }
0x10c2   :  { %7143 = vst [vmem:[#allocation55_spill] sm:$0xff] %v6207_v36 }
0x10c3   :  { %2317 = vmax.xlane.f32.xlu2 %v6184_v54  ;;  %7145 = vst [vmem:[#allocation57_spill] sm:$0xff] %v6222_v11 }
0x10c8   :  { %v2285_v24 = vpop.f32.mrf.mxu0 }
0x10cb   :  { %2315 = vmax.xlane.f32.xlu2 %v6193_v1 }
0x10d0   :  { %v2288_v59 = vpop.f32.mrf.mxu0 }
0x10d1   :  { %v2289_v45 = vadd.f32 %v6207_v36, %v2288_v59  ;;  %v6228_v59 = vld [vmem:[%s7015_s2 + $0x68] sm:$0xff] }
0x10d2   :  { %7146 = vst [vmem:[#allocation58_spill] sm:$0xff] %v6228_v59  ;;  %v2286_v36 = vadd.f32 %v6228_v59, %v2285_v24  ;;  %v6247_v24 = vld [vmem:[%s7015_s2 + $0x48] sm:$0xff] }
0x10d3   :  { %2305 = vmax.xlane.f32.xlu2 %v6202_v50  ;;  %2321 = vmax.xlane.f32.xlu0 %v2289_v45  ;;  %7149 = vst [vmem:[#allocation61_spill] sm:$0xff] %v6247_v24  ;;  %v2276_v59 = vadd.f32 %v6247_v24, %v2275_v3  ;;  %v6267_v3 = vld [vmem:[%s7015_s2 + $0x10] sm:$0xff] }
0x10d4   :  { %7152 = vst [vmem:[#allocation64_spill] sm:$0xff] %v6267_v3  ;;  %v6270_v24 = vadd.f32 %v6267_v3, %v2258_v8 }
0x10d8   :  { %v2290_v6 = vpop.f32.mrf.mxu0 }
0x10d9   :  { %v2291_v0 = vadd.f32 %v6222_v11, %v2290_v6  ;;  %v6241_v6 = vld [vmem:[%s7015_s2 + $0x40] sm:$0xff] }
0x10da   :  { %7148 = vst [vmem:[#allocation60_spill] sm:$0xff] %v6241_v6  ;;  %v2274_v11 = vadd.f32 %v6241_v6, %v2273_v58  ;;  %v6259_v58 = vld [vmem:[%s7015_s2 + $0x20] sm:$0xff] }
0x10db   :  { %2303 = vmax.xlane.f32.xlu2 %v6217_v55  ;;  %2323 = vmax.xlane.f32.xlu1 %v2291_v0  ;;  %7151 = vst [vmem:[#allocation63_spill] sm:$0xff] %v6259_v58  ;;  %v6262_v6 = vadd.f32 %v6259_v58, %v2263_v39  ;;  %v6280_v39 = vadd.f32 %v6277_v52, %v2260_v18  ;;  %v6286_v58 = vld [vmem:[%s7015_s2] sm:$0xff] }
0x10dc   :  { %2319 = vmax.xlane.f32.xlu0 %v2286_v36  ;;  %7154 = vst [vmem:[#allocation66_spill] sm:$0xff] %v6286_v58  ;;  %v6289_v8 = vadd.f32 %v6286_v58, %v2253_v31 }
0x10e3   :  { %2313 = vmax.xlane.f32.xlu1 %v2279_v35 }
0x10e4   :  { %2309 = vmax.xlane.f32.xlu0 %v2274_v11 }
0x10eb   :  { %2311 = vmax.xlane.f32.xlu1 %v2276_v59 }
0x10ec   :  { %2307 = vmax.xlane.f32.xlu0 %v2271_v17 }
0x10f3   :  { %2301 = vmax.xlane.f32.xlu1 %v6262_v6 }
0x10f4   :  { %2297 = vmax.xlane.f32.xlu0 %v6270_v24 }
0x10fb   :  { %2299 = vmax.xlane.f32.xlu1 %v6280_v39 }
0x1103   :  { %2293 = vmax.xlane.f32.xlu1 %v6289_v8 }
0x1136   :  { %v2318_v42 = vpop.xlane.xlu2 %2317 }
0x1137   :  { %v2337_v4 = vsub.f32 %v6184_v54, %v2318_v42 }
0x1139   :  { %v2365_v58 = vmul.f32 1.442695, %v2337_v4 }
0x113e   :  { %v2316_v31 = vpop.xlane.xlu2 %2315 }
0x1146   :  { %v2322_v3 = vpop.xlane.xlu0 %2321 }
0x1147   :  { %v2339_v23 = vsub.f32 %v2289_v45, %v2322_v3 }
0x1149   :  { %v2369_v22 = vmul.f32 1.442695, %v2339_v23 }
0x114b   :  { %4179 = vpow2.f32 %v2369_v22 }
0x114e   :  { %v2324_v47 = vpop.xlane.xlu1 %2323 }
0x114f   :  { %v2340_v18 = vsub.f32 %v2291_v0, %v2324_v47  ;;  %v2320_v52 = vpop.xlane.xlu0 %2319  ;;  %v6299_v47 = vld [vmem:[%s7015_s2 + $0x8] sm:$0xff] }
0x1150   :  { %v2338_v40 = vsub.f32 %v2286_v36, %v2320_v52  ;;  %v6303_v42 = vadd.f32 %v6299_v47, %v6176_v16  ;;  %v2306_v16 = vpop.xlane.xlu2 %2305 }
0x1151   :  { %v2371_v61 = vmul.f32 1.442695, %v2340_v18  ;;  %v6292_v53 = vpop.eup %4179 }
0x1152   :  { %v2367_v9 = vmul.f32 1.442695, %v2338_v40  ;;  %2401 = vadd.xlane.f32.xlu2 %v6292_v53 }
0x1153   :  { %4181 = vpow2.f32 %v2371_v61 }
0x1154   :  { %4183 = vpow2.f32 %v2367_v9  ;;  %v2336_v9 = vsub.f32 %v6193_v1, %v2316_v31 }
0x1155   :  { %4185 = vpow2.f32 %v2365_v58 }
0x1156   :  { %v2314_v45 = vpop.xlane.xlu1 %2313  ;;  %v2363_v0 = vmul.f32 1.442695, %v2336_v9 }
0x1157   :  { %v2335_v23 = vsub.f32 %v2279_v35, %v2314_v45  ;;  %v2310_v3 = vpop.xlane.xlu0 %2309 }
0x1158   :  { %v2333_v22 = vsub.f32 %v2274_v11, %v2310_v3 }
0x1159   :  { %v2361_v56 = vmul.f32 1.442695, %v2335_v23  ;;  %v6305_v40 = vpop.eup %4181 }
0x115a   :  { %v2357_v4 = vmul.f32 1.442695, %v2333_v22  ;;  %v6308_v61 = vpop.eup %4183  ;;  %2403 = vadd.xlane.f32.xlu0 %v6305_v40  ;;  %2295 = vmax.xlane.f32.xlu2 %v6303_v42 }
0x115b   :  { %4187 = vpow2.f32 %v2361_v56  ;;  %2399 = vadd.xlane.f32.xlu1 %v6308_v61  ;;  %v6313_v11 = vpop.eup %4185  ;;  %v2331_v56 = vsub.f32 %v6202_v50, %v2306_v16  ;;  %v2304_v50 = vpop.xlane.xlu2 %2303 }
0x115c   :  { %4189 = vpow2.f32 %v2357_v4 }
0x115d   :  { %4191 = vpow2.f32 %v2363_v0 }
0x115e   :  { %v2312_v36 = vpop.xlane.xlu1 %2311 }
0x115f   :  { %v2334_v54 = vsub.f32 %v2276_v59, %v2312_v36  ;;  %v2308_v35 = vpop.xlane.xlu0 %2307  ;;  %v2353_v59 = vmul.f32 1.442695, %v2331_v56 }
0x1160   :  { %v2332_v58 = vsub.f32 %v2271_v17, %v2308_v35 }
0x1161   :  { %v6315_v1 = vpop.eup %4187  ;;  %v2359_v52 = vmul.f32 1.442695, %v2334_v54 }
0x1162   :  { %v6317_v18 = vpop.eup %4189  ;;  %v2355_v31 = vmul.f32 1.442695, %v2332_v58  ;;  %2397 = vadd.xlane.f32.xlu0 %v6313_v11  ;;  %2393 = vadd.xlane.f32.xlu2 %v6315_v1 }
0x1163   :  { %4193 = vpow2.f32 %v2359_v52  ;;  %2389 = vadd.xlane.f32.xlu1 %v6317_v18  ;;  %v6324_v3 = vpop.eup %4191 }
0x1164   :  { %4195 = vpow2.f32 %v2355_v31 }
0x1165   :  { %4197 = vpow2.f32 %v2353_v59 }
0x1166   :  { %v2302_v45 = vpop.xlane.xlu1 %2301 }
0x1167   :  { %v2329_v17 = vsub.f32 %v6262_v6, %v2302_v45  ;;  %v2298_v23 = vpop.xlane.xlu0 %2297  ;;  %v2330_v6 = vsub.f32 %v6217_v55, %v2304_v50 }
0x1168   :  { %v2327_v22 = vsub.f32 %v6270_v24, %v2298_v23 }
0x1169   :  { %v6327_v9 = vpop.eup %4193  ;;  %v2349_v4 = vmul.f32 1.442695, %v2329_v17  ;;  %v2351_v35 = vmul.f32 1.442695, %v2330_v6 }
0x116a   :  { %v6329_v0 = vpop.eup %4195  ;;  %v2345_v36 = vmul.f32 1.442695, %v2327_v22  ;;  %2395 = vadd.xlane.f32.xlu0 %v6324_v3  ;;  %2391 = vadd.xlane.f32.xlu2 %v6327_v9 }
0x116b   :  { %4199 = vpow2.f32 %v2349_v4  ;;  %2387 = vadd.xlane.f32.xlu1 %v6329_v0  ;;  %v6336_v54 = vpop.eup %4197 }
0x116c   :  { %4201 = vpow2.f32 %v2345_v36 }
0x116e   :  { %v2300_v16 = vpop.xlane.xlu1 %2299 }
0x116f   :  { %v2328_v24 = vsub.f32 %v6280_v39, %v2300_v16 }
0x1171   :  { %v6338_v58 = vpop.eup %4199  ;;  %v2347_v52 = vmul.f32 1.442695, %v2328_v24 }
0x1172   :  { %v6340_v56 = vpop.eup %4201  ;;  %2385 = vadd.xlane.f32.xlu0 %v6336_v54  ;;  %2381 = vadd.xlane.f32.xlu2 %v6338_v58 }
0x1173   :  { %4203 = vpow2.f32 %v2347_v52  ;;  %2377 = vadd.xlane.f32.xlu1 %v6340_v56 }
0x1174   :  { %4205 = vpow2.f32 %v2351_v35 }
0x1176   :  { %v2294_v55 = vpop.xlane.xlu1 %2293 }
0x1177   :  { %v2325_v31 = vsub.f32 %v6289_v8, %v2294_v55 }
0x1179   :  { %v6346_v39 = vpop.eup %4203  ;;  %v2341_v59 = vmul.f32 1.442695, %v2325_v31 }
0x117a   :  { %v6348_v45 = vpop.eup %4205  ;;  %2379 = vadd.xlane.f32.xlu2 %v6346_v39 }
0x117b   :  { %4207 = vpow2.f32 %v2341_v59  ;;  %2383 = vadd.xlane.f32.xlu0 %v6348_v45 }
0x1181   :  { %v6352_v17 = vpop.eup %4207 }
0x1183   :  { %2373 = vadd.xlane.f32.xlu0 %v6352_v17 }
0x11c5   :  { %v2402_v23 = vpop.xlane.xlu2 %2401 }
0x11c6   :  { %4209 = vrcp.f32 %v2402_v23 }
0x11cc   :  { %v4210_v36 = vpop.eup %4209 }
0x11cd   :  { %v2296_v22 = vpop.xlane.xlu2 %2295  ;;  %v2404_v50 = vpop.xlane.xlu0 %2403  ;;  %v2435_v24 = vmul.f32 %v4210_v36, %v6292_v53 }
0x11ce   :  { %v2326_v8 = vsub.f32 %v6303_v42, %v2296_v22  ;;  %4211 = vrcp.f32 %v2404_v50  ;;  %v2400_v6 = vpop.xlane.xlu1 %2399 }
0x11d0   :  { %v2343_v4 = vmul.f32 1.442695, %v2326_v8 }
0x11d2   :  { %4213 = vpow2.f32 %v2343_v4 }
0x11d3   :  { %4215 = vrcp.f32 %v2400_v6 }
0x11d4   :  { %v4212_v16 = vpop.eup %4211 }
0x11d5   :  { %v2436_v35 = vmul.f32 %v4212_v16, %v6305_v40  ;;  %v2398_v52 = vpop.xlane.xlu0 %2397  ;;  %v2394_v55 = vpop.xlane.xlu2 %2393 }
0x11d6   :  { %4217 = vrcp.f32 %v2398_v52  ;;  %v2390_v40 = vpop.xlane.xlu1 %2389 }
0x11d7   :  { %v2444_v31 = vpack.c.bf16 %v2436_v35, %v2435_v24  ;;  %4219 = vrcp.f32 %v2394_v55 }
0x11d8   :  { %v6358_v59 = vpop.eup %4213 }
0x11d9   :  { %2375 = vadd.xlane.f32.xlu1 %v6358_v59  ;;  %2445 = vmatpush.bf16.xpose.msra.mxu2 %v2444_v31  ;;  %v4216_v42 = vpop.eup %4215 }
0x11da   :  { %v2434_v53 = vmul.f32 %v4216_v42, %v6308_v61 }
0x11dc   :  { %v4218_v22 = vpop.eup %4217 }
0x11dd   :  { %v2396_v23 = vpop.xlane.xlu0 %2395  ;;  %v2433_v50 = vmul.f32 %v4218_v22, %v6313_v11  ;;  %v2392_v8 = vpop.xlane.xlu2 %2391 }
0x11de   :  { %4221 = vrcp.f32 %v2396_v23  ;;  %v4220_v36 = vpop.eup %4219  ;;  %v2388_v31 = vpop.xlane.xlu1 %2387 }
0x11df   :  { %v2443_v4 = vpack.c.bf16 %v2434_v53, %v2433_v50  ;;  %4223 = vrcp.f32 %v2392_v8  ;;  %v2431_v24 = vmul.f32 %v4220_v36, %v6315_v1 }
0x11e0   :  { %4225 = vrcp.f32 %v2390_v40 }
0x11e1   :  { %2446 = vmatpush.bf16.xpose.msra.mxu2 %v2443_v4 }
0x11e4   :  { %v4222_v6 = vpop.eup %4221 }
0x11e5   :  { %v2386_v16 = vpop.xlane.xlu0 %2385  ;;  %v2432_v35 = vmul.f32 %v4222_v6, %v6324_v3  ;;  %v4224_v55 = vpop.eup %4223 }
0x11e6   :  { %v4226_v11 = vpop.eup %4225  ;;  %4227 = vrcp.f32 %v2386_v16  ;;  %v2430_v61 = vmul.f32 %v4224_v55, %v6327_v9  ;;  %v2382_v42 = vpop.xlane.xlu2 %2381 }
0x11e7   :  { %v2442_v52 = vpack.c.bf16 %v2432_v35, %v2431_v24  ;;  %4229 = vrcp.f32 %v2388_v31  ;;  %v2429_v23 = vmul.f32 %v4226_v11, %v6317_v18  ;;  %v2378_v6 = vpop.xlane.xlu1 %2377  ;;  %v2129_v31 = vpop.f32.mrf.mxu1 }
0x11e9   :  { %2447 = vmatpush.bf16.xpose.msra.mxu2 %v2442_v52  ;;  %v2441_v50 = vpack.c.bf16 %v2430_v61, %v2429_v23 }
0x11ec   :  { %v4228_v53 = vpop.eup %4227 }
0x11ed   :  { %v4230_v40 = vpop.eup %4229  ;;  %v2427_v1 = vmul.f32 %v4228_v53, %v6336_v54 }
0x11ee   :  { %v2384_v22 = vpop.xlane.xlu0 %2383  ;;  %v2428_v3 = vmul.f32 %v4230_v40, %v6329_v0  ;;  %v2380_v8 = vpop.xlane.xlu2 %2379 }
0x11ef   :  { %4231 = vrcp.f32 %v2384_v22  ;;  %v2131_v11 = vpop.f32.mrf.mxu1 }
0x11f0   :  { %4233 = vrcp.f32 %v2382_v42  ;;  %v2440_v4 = vpack.c.bf16 %v2428_v3, %v2427_v1 }
0x11f1   :  { %2448 = vmatpush.bf16.xpose.msra.mxu2 %v2441_v50  ;;  %4235 = vrcp.f32 %v2380_v8  ;;  %v6378_v8 = vld [vmem:[#allocation7 + $0x78] sm:$0xff] }
0x11f2   :  { %4237 = vrcp.f32 %v2378_v6 }
0x11f5   :  { %v4232_v36 = vpop.eup %4231 }
0x11f6   :  { %v4234_v9 = vpop.eup %4233  ;;  %v2426_v18 = vmul.f32 %v4232_v36, %v6348_v45  ;;  %v2374_v23 = vpop.xlane.xlu0 %2373 }
0x11f7   :  { %v2425_v16 = vmul.f32 %v4234_v9, %v6338_v58  ;;  %v4236_v35 = vpop.eup %4235  ;;  %v2134_v61 = vpop.f32.mrf.mxu1  ;;  %4239 = vrcp.f32 %v2374_v23 }
0x11f8   :  { %v4238_v52 = vpop.eup %4237  ;;  %v2424_v54 = vmul.f32 %v4236_v35, %v6346_v39  ;;  %v6387_v35 = vld [vmem:[#allocation7 + $0x90] sm:$0xff] }
0x11f9   :  { %2449 = vmatpush.bf16.xpose.msra.mxu2 %v2440_v4  ;;  %v2439_v24 = vpack.c.bf16 %v2426_v18, %v2425_v16  ;;  %v2423_v0 = vmul.f32 %v4238_v52, %v6340_v56  ;;  %v6375_v56 = vld [vmem:[#allocation7 + $0x70] sm:$0xff]  ;;  %v2132_v4 = vadd.f32 %v6378_v8, %v2131_v11  ;;  %v6381_v18 = vld [vmem:[#allocation7 + $0x80] sm:$0xff] }
0x11fa   :  { %v2130_v3 = vadd.f32 %v6375_v56, %v2129_v31  ;;  %v6393_v31 = vld [vmem:[#allocation7 + $0xa0] sm:$0xff] }
0x11fb   :  { %v2438_v55 = vpack.c.bf16 %v2424_v54, %v2423_v0  ;;  %v6390_v54 = vld [vmem:[#allocation7 + $0x98] sm:$0xff] }
0x11fc   :  { %v2156_v36 = vpack.c.bf16 %v2132_v4, %v2130_v3 }
0x11fd   :  { %v4240_v58 = vpop.eup %4239 }
0x11fe   :  { %v2421_v53 = vmul.f32 %v4240_v58, %v6352_v17  ;;  %v2135_v17 = vadd.f32 %v6381_v18, %v2134_v61 }
0x11ff   :  { %v2136_v42 = vpop.f32.mrf.mxu1 }
0x1201   :  { %2450 = vmatpush.bf16.xpose.msra.mxu2 %v2439_v24 }
0x1207   :  { %v2139_v22 = vpop.f32.mrf.mxu1 }
0x1208   :  { %v2140_v52 = vadd.f32 %v6387_v35, %v2139_v22 }
0x1209   :  { %2451 = vmatpush.bf16.xpose.msra.mxu2 %v2438_v55 }
0x120f   :  { %v2141_v1 = vpop.f32.mrf.mxu1 }
0x1210   :  { %v2142_v0 = vadd.f32 %v6390_v54, %v2141_v1 }
0x1212   :  { %v2158_v55 = vpack.c.bf16 %v2142_v0, %v2140_v52 }
0x1217   :  { %v2144_v6 = vpop.f32.mrf.mxu1 }
0x1218   :  { %v2145_v11 = vadd.f32 %v6393_v31, %v2144_v6  ;;  %v6397_v6 = vld [vmem:[#allocation8] sm:$0xff] }
0x121a   :  { %v2159_v61 = vpack.c.bf16 %v2145_v11, %v2145_v11  ;;  %v6409_v11 = vld [vmem:[#allocation10 + $0x20] sm:$0xff] }
0x121f   :  { %v2146_v9 = vpop.f32.mrf.mxu1 }
0x1220   :  { %v6401_v9 = vld [vmem:[#allocation8 + $0x8] sm:$0xff] }
0x124c   :  { %v2376_v45 = vpop.xlane.xlu1 %2375 }
0x124d   :  { %4241 = vrcp.f32 %v2376_v45 }
0x1253   :  { %v4242_v50 = vpop.eup %4241 }
0x1254   :  { %v2422_v40 = vmul.f32 %v4242_v50, %v6358_v59  ;;  %v6384_v59 = vld [vmem:[#allocation7 + $0x88] sm:$0xff] }
0x1255   :  { %v2137_v16 = vadd.f32 %v6384_v59, %v2136_v42 }
0x1256   :  { %v2437_v39 = vpack.c.bf16 %v2422_v40, %v2421_v53 }
0x1257   :  { %v2157_v24 = vpack.c.bf16 %v2137_v16, %v2135_v17  ;;  %v6405_v17 = vld [vmem:[#allocation8 + $0x10] sm:$0xff] }
0x1258   :  { %2452 = vmatpush.bf16.xpose.msra.mxu2 %v2437_v39 }
0x125f   :  { %2453 = vmatmul.bf16.vlgmr.msra.gmra.mxu2 %v2156_v36 }
0x126f   :  { %2458 = vmatmul.bf16.gmra.mxu2 %v2157_v24 }
0x127f   :  { %2463 = vmatmul.bf16.gmra.mxu2 %v2158_v55 }
0x128f   :  { %2468 = vmatmul.bf16.gmra.mxu2 %v2159_v61 }
0x12e2   :  { %v2454_v23 = vpop.f32.mrf.mxu2 }
0x12ea   :  { %v2456_v42 = vpop.f32.mrf.mxu2 }
0x12eb   :  { %v2473_v36 = vpack.c.bf16 %v2456_v42, %v2454_v23  ;;  %v6412_v42 = vld [vmem:[#allocation10 + $0x18] sm:$0xff] }
0x12f2   :  { %v2459_v45 = vpop.f32.mrf.mxu2 }
0x12fa   :  { %v2461_v58 = vpop.f32.mrf.mxu2 }
0x12fb   :  { %v2474_v4 = vpack.c.bf16 %v2461_v58, %v2459_v45  ;;  %v6415_v58 = vld [vmem:[#allocation10 + $0x28] sm:$0xff] }
0x1302   :  { %v2464_v50 = vpop.f32.mrf.mxu2 }
0x130a   :  { %v2466_v53 = vpop.f32.mrf.mxu2 }
0x130b   :  { %v2475_v1 = vpack.c.bf16 %v2466_v53, %v2464_v50  ;;  %v6418_v53 = vld [vmem:[#allocation10 + $0x10] sm:$0xff] }
0x130c   :  { %7155 = vst [vmem:[#allocation67_spill] sm:$0xff] %v6418_v53 }
0x1312   :  { %v2469_v40 = vpop.f32.mrf.mxu2 }
0x1313   :  { %v2476_v22 = vpack.c.bf16 %v2469_v40, %v2469_v40 }
0x1315   :  { %v2478_v39 = vsel %vm591_vm1, %v2476_v22, 0 }
0x1316   :  { %2484 = vmatpush.bf16.msrb.mxu2 %v2478_v39 }
0x131a   :  { %v2471_v3 = vpop.f32.mrf.mxu2  ;;  %2485 = vmatpush.bf16.msrb.mxu2 %v2475_v1  ;;  %v6423_v1 = vld [vmem:[#allocation10 + $0x8] sm:$0xff] }
0x131e   :  { %2486 = vmatpush.bf16.msrb.mxu2 %v2474_v4 }
0x1322   :  { %2487 = vmatpush.bf16.msrb.mxu2 %v2473_v36 }
0x1325   :  { %3876 = vmatmul.msk.bf16.vlgmr.msrb.gmra.mxu2 %vm566_vm2, %v6397_v6 }
0x1335   :  { %3877 = vmatmul.msk.bf16.gmra.mxu2 %vm566_vm2, %v6401_v9 }
0x1345   :  { %3878 = vmatmul.msk.bf16.gmra.mxu2 %vm566_vm2, %v6405_v17 }
0x13a8   :  { %v2489_v16 = vpop.f32.mrf.mxu2 }
0x13b0   :  { %v2491_v24 = vpop.f32.mrf.mxu2 }
0x13b1   :  { %v2492_v3 = vadd.f32 %v6423_v1, %v2491_v24 }
0x13b8   :  { %v2494_v52 = vpop.f32.mrf.mxu2 }
0x13b9   :  { %v2495_v40 = vadd.f32 %v6418_v53, %v2494_v52  ;;  %v2505_v52 = vadd.f32 %v2492_v3, %v6019_v30 }
0x13c0   :  { %v2496_v0 = vpop.f32.mrf.mxu2 }
0x13c1   :  { %v2497_v45 = vadd.f32 %v6412_v42, %v2496_v0  ;;  %v6427_v0 = vld [vmem:[#allocation10] sm:$0xff] }
0x13c3   :  { %v2507_v4 = vadd.f32 %v2497_v45, %v6005_v13 }
0x13c8   :  { %v2499_v55 = vpop.f32.mrf.mxu2 }
0x13c9   :  { %v2500_v61 = vadd.f32 %v6409_v11, %v2499_v55  ;;  %v2490_v55 = vadd.f32 %v6427_v0, %v2489_v16 }
0x13cb   :  { %v2508_v22 = vadd.f32 %v2500_v61, %v5995_v14  ;;  %v2504_v14 = vadd.f32 %v2490_v55, %v6013_v15 }
0x13d0   :  { %v2501_v23 = vpop.f32.mrf.mxu2 }
0x13d1   :  { %v2502_v50 = vadd.f32 %v6415_v58, %v2501_v23  ;;  %v2506_v23 = vadd.f32 %v2495_v40, %v6000_v26 }
0x13d3   :  { %v2509_v39 = vadd.f32 %v2502_v50, %v5990_v28  ;;  %v2511_v53 = vpack.c.bf16 %v2507_v4, %v2506_v23  ;;  %v2510_v28 = vpack.c.bf16 %v2505_v52, %v2504_v14 }
0x13d5   :  { %v2512_v36 = vpack.c.bf16 %v2509_v39, %v2508_v22 }
0x13d7   :  { %2518 = vmatpush.bf16.msrb.mxu3 %v2512_v36 }
0x13db   :  { %2519 = vmatpush.bf16.msrb.mxu3 %v2511_v53 }
0x13df   :  { %2520 = vmatpush.bf16.msrb.mxu3 %v2510_v28 }
0x13e2   :  { %3879 = vmatmul.msk.bf16.vlgmr.msrb.gmra.mxu3 %vm352_vm0, %v5937_v25 }
0x13f2   :  { %3880 = vmatmul.msk.bf16.gmra.mxu3 %vm352_vm0, %v5941_v41 }
0x1402   :  { %3881 = vmatmul.msk.bf16.gmra.mxu3 %vm352_vm0, %v5945_v10 }
0x1465   :  { %v2522_v13 = vpop.f32.mrf.mxu3 }
0x1466   :  { %v2523_v15 = vadd.f32 %v5952_v12, %v2522_v13 }
0x146d   :  { %v2524_v26 = vpop.f32.mrf.mxu3 }
0x146e   :  { %v2525_v30 = vadd.f32 %v5949_v33, %v2524_v26 }
0x1470   :  { %v2537_v50 = vadd.f32 %v2525_v30, %v2523_v15 }
0x1475   :  { %v2527_v16 = vpop.f32.mrf.mxu3 }
0x1476   :  { %v2528_v45 = vadd.f32 %v5955_v49, %v2527_v16 }
0x1478   :  { %v2538_v53 = vadd.f32 %v2537_v50, %v2528_v45 }
0x147d   :  { %v2529_v24 = vpop.f32.mrf.mxu3 }
0x147e   :  { %v2530_v25 = vadd.f32 %v5958_v38, %v2529_v24 }
0x1480   :  { %v2539_v40 = vadd.f32 %v2538_v53, %v2530_v25 }
0x1485   :  { %v2532_v61 = vpop.f32.mrf.mxu3 }
0x1486   :  { %v2533_v41 = vadd.f32 %v5961_v29, %v2532_v61 }
0x1488   :  { %v2540_v10 = vadd.f32 %v2539_v40, %v2533_v41 }
0x148d   :  { %v2534_v22 = vpop.f32.mrf.mxu3 }
0x148e   :  { %v2535_v39 = vadd.f32 %v5964_v60, %v2534_v22 }
0x1490   :  { %v2541_v3 = vadd.f32 %v2540_v10, %v2535_v39 }
0x1492   :  { %v2542_v4 = vrot.slane %v2541_v3, 4 }
0x1494   :  { %v2543_v36 = vadd.f32 %v2542_v4, %v2541_v3 }
0x1496   :  { %v2544_v33 = vrot.slane %v2543_v36, 2 }
0x1498   :  { %v2545_v55 = vadd.f32 %v2544_v33, %v2543_v36 }
0x149a   :  { %v2546_v23 = vrot.slane %v2545_v55, 1 }
0x149c   :  { %v2547_v12 = vadd.f32 %v2546_v23, %v2545_v55 }
0x149e   :  { %v2548_v49 = vmul.f32 %v2547_v12, %v5616_v19 }
0x14a0   :  { %v2549_v52 = vsub.f32 %v2523_v15, %v2548_v49  ;;  %v2550_v14 = vsub.f32 %v2525_v30, %v2548_v49  ;;  %v2551_v38 = vsub.f32 %v2528_v45, %v2548_v49  ;;  %v2552_v28 = vsub.f32 %v2530_v25, %v2548_v49 }
0x14a1   :  { %v2553_v26 = vsub.f32 %v2533_v41, %v2548_v49  ;;  %v2554_v61 = vsub.f32 %v2535_v39, %v2548_v49 }
0x14a2   :  { %v2555_v13 = vmul.f32 %v2549_v52, %v2549_v52  ;;  %v2556_v29 = vmul.f32 %v2550_v14, %v2550_v14  ;;  %v2557_v16 = vmul.f32 %v2551_v38, %v2551_v38  ;;  %v2558_v60 = vmul.f32 %v2552_v28, %v2552_v28 }
0x14a3   :  { %v2559_v53 = vmul.f32 %v2553_v26, %v2553_v26  ;;  %v2560_v22 = vmul.f32 %v2554_v61, %v2554_v61 }
0x14a4   :  { %v2561_v24 = vadd.f32 %v2556_v29, %v2555_v13 }
0x14a6   :  { %v2562_v50 = vadd.f32 %v2561_v24, %v2557_v16 }
0x14a8   :  { %v2563_v40 = vadd.f32 %v2562_v50, %v2558_v60 }
0x14aa   :  { %v2564_v10 = vadd.f32 %v2563_v40, %v2559_v53 }
0x14ac   :  { %v2565_v3 = vadd.f32 %v2564_v10, %v2560_v22 }
0x14ae   :  { %v2566_v4 = vrot.slane %v2565_v3, 4 }
0x14b0   :  { %v2567_v36 = vadd.f32 %v2566_v4, %v2565_v3 }
0x14b2   :  { %v2568_v33 = vrot.slane %v2567_v36, 2 }
0x14b4   :  { %v2569_v15 = vadd.f32 %v2568_v33, %v2567_v36 }
0x14b6   :  { %v2570_v30 = vrot.slane %v2569_v15, 1 }
0x14b8   :  { %v2571_v45 = vadd.f32 %v2570_v30, %v2569_v15 }
0x14ba   :  { %v2572_v25 = vmul.f32 %v2571_v45, %v5616_v19  ;;  %v7163_v45 = vld [vmem:[#allocation32_spill] sm:$0xff] }
0x14bc   :  { %v2573_v55 = vadd.f32 1e-05, %v2572_v25 }
0x14be   :  { %4243 = vrsqrt.f32 %v2573_v55  ;;  %vm2580_vm14 = vweird.f32 %v2573_v55 }
0x14c4   :  { %v4244_v41 = vpop.eup %4243 }
0x14c5   :  { %v2575_v23 = vmul.f32 %v4244_v41, %v2573_v55  ;;  %vm2581_vm13 = vweird.f32 %v4244_v41 }
0x14c6   :  { %vm2582_vm15 = vmor %vm2580_vm14, %vm2581_vm13 }
0x14c7   :  { %v2576_v39 = vmul.f32 %v4244_v41, %v2575_v23 }
0x14c9   :  { %v2577_v12 = vmul.f32 0.5, %v2576_v39 }
0x14cb   :  { %v2578_v49 = vsub.f32 1.5, %v2577_v12  ;;  %v7165_v12 = vld [vmem:[#allocation35_spill] sm:$0xff] }
0x14cd   :  { %v2579_v13 = vmul.f32 %v4244_v41, %v2578_v49 }
0x14cf   :  { %v2583_v29 = vsel %vm2582_vm15, %v4244_v41, %v2579_v13  ;;  %v7164_v41 = vld [vmem:[#allocation29_spill] sm:$0xff] }
0x14d0   :  { %v2588_v16 = vmul.f32 %v2583_v29, %v2553_v26  ;;  %v2589_v24 = vmul.f32 %v2583_v29, %v2554_v61  ;;  %v2586_v60 = vmul.f32 %v2583_v29, %v2551_v38  ;;  %v2587_v50 = vmul.f32 %v2583_v29, %v2552_v28  ;;  %v7162_v26 = vld [vmem:[#allocation24_spill] sm:$0xff] }
0x14d1   :  { %v2584_v53 = vmul.f32 %v2583_v29, %v2549_v52  ;;  %v2585_v40 = vmul.f32 %v2583_v29, %v2550_v14  ;;  %v7166_v29 = vld [vmem:[#allocation30_spill] sm:$0xff] }
0x14d2   :  { %v2595_v22 = vmul.f32 %v5969_v43, %v2589_v24  ;;  %v2594_v10 = vmul.f32 %v5972_v2, %v2588_v16  ;;  %v2592_v3 = vmul.f32 %v5975_v5, %v2586_v60  ;;  %v2593_v4 = vmul.f32 %v5978_v27, %v2587_v50  ;;  %v7167_v60 = vld [vmem:[#allocation36_spill] sm:$0xff] }
0x14d3   :  { %v2590_v36 = vmul.f32 %v5981_v48, %v2584_v53  ;;  %v2591_v33 = vmul.f32 %v5984_v34, %v2585_v40  ;;  %v7168_v40 = vld [vmem:[#allocation33_spill] sm:$0xff] }
0x14d4   :  { %v6454_v15 = vadd.f32 %v5987_v21, %v2595_v22  ;;  %v6457_v38 = vadd.f32 %v5992_v46, %v2594_v10  ;;  %v6460_v52 = vadd.f32 %v5997_v37, %v2592_v3  ;;  %v6463_v43 = vadd.f32 %v6002_v57, %v2593_v4  ;;  %v7156_v21 = vld [vmem:[#allocation25_spill] sm:$0xff]  ;;  %v7157_v46 = vld [vmem:[#allocation28_spill] sm:$0xff]  ;;  %v7158_v37 = vld [vmem:[#allocation26_spill] sm:$0xff] }
0x14d5   :  { %v6469_v5 = vadd.f32 %v6010_v51, %v2590_v36  ;;  %v6473_v27 = vadd.f32 %v6016_v44, %v2591_v33  ;;  %v7159_v51 = vld [vmem:[#allocation31_spill] sm:$0xff]  ;;  %v7169_v4 = vld [vmem:[#allocation34_spill] sm:$0xff] }
0x14d6   :  { %2608 = vst [vmem:[#allocation17 + $0xb8] sm:$0xff] %v6454_v15  ;;  %v2611_v2 = vpack.c.bf16 %v6454_v15, %v6457_v38  ;;  %v2610_v48 = vpack.c.bf16 %v6463_v43, %v6460_v52 }
0x14d7   :  { %2607 = vst [vmem:[#allocation17 + $0xb0] sm:$0xff] %v6457_v38  ;;  %v2609_v34 = vpack.c.bf16 %v6473_v27, %v6469_v5 }
0x14d8   :  { %2617 = vmatpush.bf16.msrb.mxu0 %v2611_v2  ;;  %2605 = vst [vmem:[#allocation17 + $0xa0] sm:$0xff] %v6460_v52  ;;  %v7170_v2 = vld [vmem:[#allocation37_spill] sm:$0xff] }
0x14d9   :  { %2606 = vst [vmem:[#allocation17 + $0xa8] sm:$0xff] %v6463_v43 }
0x14da   :  { %2603 = vst [vmem:[#allocation17 + $0x90] sm:$0xff] %v6469_v5 }
0x14db   :  { %2604 = vst [vmem:[#allocation17 + $0x98] sm:$0xff] %v6473_v27 }
0x14dc   :  { %2618 = vmatpush.bf16.msrb.mxu0 %v2610_v48 }
0x14e0   :  { %2619 = vmatpush.bf16.msrb.mxu0 %v2609_v34  ;;  %v7171_v34 = vld [vmem:[#allocation39_spill] sm:$0xff] }
0x14e3   :  { %3882 = vmatmul.msk.bf16.vlgmr.msrb.gmra.mxu0 %vm352_vm0, %v6032_v62 }
0x14f3   :  { %3883 = vmatmul.msk.bf16.gmra.mxu0 %vm352_vm0, %v6039_v63  ;;  %v7160_v63 = vld [vmem:[#allocation27_spill] sm:$0xff] }
0x1503   :  { %3884 = vmatmul.msk.bf16.gmra.mxu0 %vm352_vm0, %v6046_v32 }
0x1513   :  { %3885 = vmatmul.msk.bf16.gmra.mxu0 %vm352_vm0, %v6053_v20 }
0x1523   :  { %3886 = vmatmul.msk.bf16.gmra.mxu0 %vm352_vm0, %v6060_v7  ;;  %v7161_v7 = vld [vmem:[#allocation38_spill] sm:$0xff] }
0x1533   :  { %3887 = vmatmul.msk.bf16.gmra.mxu0 %vm352_vm0, %v7156_v21 }
0x1543   :  { %3888 = vmatmul.msk.bf16.gmra.mxu0 %vm352_vm0, %v7157_v46  ;;  %v7172_v46 = vld [vmem:[#allocation40_spill] sm:$0xff] }
0x1553   :  { %3889 = vmatmul.msk.bf16.gmra.mxu0 %vm352_vm0, %v7158_v37 }
0x1560   :  { %v2621_v57 = vpop.f32.mrf.mxu0 }
0x1561   :  { %v2622_v22 = vadd.f32 %v7168_v40, %v2621_v57  ;;  %v7174_v57 = vld [vmem:[#allocation42_spill] sm:$0xff] }
0x1563   :  { %3890 = vmatmul.msk.bf16.gmra.mxu0 %vm352_vm0, %v7159_v51  ;;  %v7173_v51 = vld [vmem:[#allocation41_spill] sm:$0xff] }
0x1568   :  { %v2623_v44 = vpop.f32.mrf.mxu0 }
0x1569   :  { %v2624_v50 = vadd.f32 %v7167_v60, %v2623_v44 }
0x156b   :  { %v2675_v10 = vpack.c.bf16 %v2624_v50, %v2622_v22 }
0x1570   :  { %v2626_v62 = vpop.f32.mrf.mxu0 }
0x1571   :  { %v2627_v16 = vadd.f32 %v7166_v29, %v2626_v62  ;;  %v7182_v29 = vld [vmem:[#allocation50_spill] sm:$0xff] }
0x1573   :  { %3891 = vmatmul.msk.bf16.gmra.mxu0 %vm352_vm0, %v7160_v63 }
0x1578   :  { %v2628_v32 = vpop.f32.mrf.mxu0 }
0x1579   :  { %v2629_v49 = vadd.f32 %v7165_v12, %v2628_v32  ;;  %v7180_v12 = vld [vmem:[#allocation48_spill] sm:$0xff] }
0x157b   :  { %v2676_v24 = vpack.c.bf16 %v2629_v49, %v2627_v16  ;;  %v7181_v49 = vld [vmem:[#allocation49_spill] sm:$0xff]  ;;  %v7183_v16 = vld [vmem:[#allocation51_spill] sm:$0xff] }
0x1580   :  { %v2631_v20 = vpop.f32.mrf.mxu0 }
0x1581   :  { %v2632_v23 = vadd.f32 %v7164_v41, %v2631_v20  ;;  %v7175_v20 = vld [vmem:[#allocation43_spill] sm:$0xff] }
0x1583   :  { %3892 = vmatmul.msk.bf16.gmra.mxu0 %vm352_vm0, %v7161_v7 }
0x1588   :  { %v2633_v14 = vpop.f32.mrf.mxu0 }
0x1589   :  { %v2634_v25 = vadd.f32 %v7163_v45, %v2633_v14  ;;  %v7177_v45 = vld [vmem:[#allocation45_spill] sm:$0xff] }
0x158b   :  { %v2677_v39 = vpack.c.bf16 %v2634_v25, %v2632_v23  ;;  %v7178_v25 = vld [vmem:[#allocation46_spill] sm:$0xff] }
0x1590   :  { %v2636_v28 = vpop.f32.mrf.mxu0 }
0x1591   :  { %v2637_v61 = vadd.f32 %v7162_v26, %v2636_v28 }
0x1593   :  { %v2678_v30 = vpack.c.bf16 %v2637_v61, %v2637_v61  ;;  %v7176_v61 = vld [vmem:[#allocation44_spill] sm:$0xff] }
0x1595   :  { %2691 = vmatpush.bf16.xpose.msra.mxu2 %v2678_v30 }
0x1598   :  { %v2638_v55 = vpop.f32.mrf.mxu0 }
0x1599   :  { %v2639_v41 = vadd.f32 %v7178_v25, %v2638_v55 }
0x159d   :  { %2692 = vmatpush.bf16.xpose.msra.mxu2 %v2677_v39  ;;  %v7179_v39 = vld [vmem:[#allocation47_spill] sm:$0xff] }
0x15a0   :  { %v2641_v13 = vpop.f32.mrf.mxu0 }
0x15a1   :  { %v2642_v30 = vadd.f32 %v7176_v61, %v2641_v13 }
0x15a3   :  { %v2679_v23 = vpack.c.bf16 %v2642_v30, %v2639_v41 }
0x15a5   :  { %2693 = vmatpush.bf16.xpose.msra.mxu2 %v2676_v24 }
0x15a8   :  { %v2643_v53 = vpop.f32.mrf.mxu0 }
0x15a9   :  { %v2644_v32 = vadd.f32 %v7174_v57, %v2643_v53 }
0x15ad   :  { %2694 = vmatpush.bf16.xpose.msra.mxu2 %v2675_v10 }
0x15b0   :  { %v2646_v3 = vpop.f32.mrf.mxu0 }
0x15b1   :  { %v2647_v14 = vadd.f32 %v7175_v20, %v2646_v3 }
0x15b3   :  { %v2680_v26 = vpack.c.bf16 %v2647_v14, %v2644_v32 }
0x15b4   :  { %2695 = vmatmul.bf16.vlgmr.msra.gmra.mxu2 %v7169_v4 }
0x15b8   :  { %v2648_v36 = vpop.f32.mrf.mxu0 }
0x15b9   :  { %v2649_v37 = vadd.f32 %v7172_v46, %v2648_v36 }
0x15c0   :  { %v2651_v33 = vpop.f32.mrf.mxu0 }
0x15c1   :  { %v2652_v62 = vadd.f32 %v7173_v51, %v2651_v33 }
0x15c3   :  { %v2681_v28 = vpack.c.bf16 %v2652_v62, %v2649_v37 }
0x15c4   :  { %2700 = vmatmul.bf16.gmra.mxu2 %v7170_v2 }
0x15c8   :  { %v2653_v48 = vpop.f32.mrf.mxu0 }
0x15c9   :  { %v2654_v21 = vadd.f32 %v7171_v34, %v2653_v48 }
0x15cb   :  { %v2682_v44 = vpack.c.bf16 %v2654_v21, %v2654_v21 }
0x15cd   :  { %v2769_v63 = vsel %vm591_vm1, %v2682_v44, 0 }
0x15ce   :  { %2775 = vmatpush.bf16.msra.mxu1 %v2769_v63 }
0x15d2   :  { %2776 = vmatpush.bf16.msra.mxu1 %v2681_v28 }
0x15d4   :  { %2705 = vmatmul.bf16.gmra.mxu2 %v7177_v45 }
0x15d6   :  { %2777 = vmatpush.bf16.msra.mxu1 %v2680_v26 }
0x15da   :  { %2778 = vmatpush.bf16.msra.mxu1 %v2679_v23 }
0x15e4   :  { %2710 = vmatmul.bf16.gmra.mxu2 %v7179_v39 }
0x15f4   :  { %2715 = vmatmul.bf16.gmra.mxu2 %v7180_v12 }
0x1604   :  { %2720 = vmatmul.bf16.gmra.mxu2 %v7181_v49  ;;  %v7184_v49 = vld [vmem:[#allocation52_spill] sm:$0xff] }
0x1614   :  { %2725 = vmatmul.bf16.gmra.mxu2 %v7182_v29 }
0x1624   :  { %2730 = vmatmul.bf16.gmra.mxu2 %v7183_v16 }
0x1637   :  { %v2696_v24 = vpop.f32.mrf.mxu2 }
0x163f   :  { %v2698_v60 = vpop.f32.mrf.mxu2 }
0x1640   :  { %v2736_v13 = vpack.c.bf16 %v2698_v60, %v2696_v24  ;;  %v7185_v24 = vld [vmem:[#allocation53_spill] sm:$0xff] }
0x1642   :  { %3893 = vmatmul.msk.bf16.vlgmr.msra.gmra.mxu1 %vm566_vm2, %v2736_v13 }
0x1647   :  { %v2701_v50 = vpop.f32.mrf.mxu2 }
0x164f   :  { %v2703_v55 = vpop.f32.mrf.mxu2 }
0x1650   :  { %v2737_v53 = vpack.c.bf16 %v2703_v55, %v2701_v50  ;;  %v7186_v50 = vld [vmem:[#allocation54_spill] sm:$0xff] }
0x1652   :  { %3894 = vmatmul.msk.bf16.gmra.mxu1 %vm566_vm2, %v2737_v53  ;;  %v7187_v53 = vld [vmem:[#allocation55_spill] sm:$0xff] }
0x1657   :  { %v2706_v40 = vpop.f32.mrf.mxu2 }
0x165f   :  { %v2708_v22 = vpop.f32.mrf.mxu2 }
0x1660   :  { %v2738_v10 = vpack.c.bf16 %v2708_v22, %v2706_v40 }
0x1662   :  { %3895 = vmatmul.msk.bf16.gmra.mxu1 %vm566_vm2, %v2738_v10  ;;  %v7188_v10 = vld [vmem:[#allocation57_spill] sm:$0xff] }
0x1667   :  { %v2711_v3 = vpop.f32.mrf.mxu2 }
0x166f   :  { %v2713_v4 = vpop.f32.mrf.mxu2 }
0x1670   :  { %v2739_v36 = vpack.c.bf16 %v2713_v4, %v2711_v3  ;;  %v7189_v4 = vld [vmem:[#allocation56_spill] sm:$0xff] }
0x1672   :  { %3896 = vmatmul.msk.bf16.gmra.mxu1 %vm566_vm2, %v2739_v36 }
0x1677   :  { %v2716_v33 = vpop.f32.mrf.mxu2 }
0x167f   :  { %v2718_v2 = vpop.f32.mrf.mxu2 }
0x1680   :  { %v2740_v48 = vpack.c.bf16 %v2718_v2, %v2716_v33  ;;  %v7190_v33 = vld [vmem:[#allocation58_spill] sm:$0xff] }
0x1682   :  { %3897 = vmatmul.msk.bf16.gmra.mxu1 %vm566_vm2, %v2740_v48  ;;  %v7191_v48 = vld [vmem:[#allocation59_spill] sm:$0xff] }
0x1687   :  { %v2721_v34 = vpop.f32.mrf.mxu2 }
0x168f   :  { %v2723_v21 = vpop.f32.mrf.mxu2 }
0x1690   :  { %v2741_v46 = vpack.c.bf16 %v2723_v21, %v2721_v34  ;;  %v7192_v21 = vld [vmem:[#allocation60_spill] sm:$0xff] }
0x1692   :  { %3898 = vmatmul.msk.bf16.gmra.mxu1 %vm566_vm2, %v2741_v46 }
0x1697   :  { %v2726_v37 = vpop.f32.mrf.mxu2 }
0x169f   :  { %v2728_v51 = vpop.f32.mrf.mxu2 }
0x16a0   :  { %v2742_v62 = vpack.c.bf16 %v2728_v51, %v2726_v37  ;;  %v7193_v37 = vld [vmem:[#allocation61_spill] sm:$0xff] }
0x16a2   :  { %3899 = vmatmul.msk.bf16.gmra.mxu1 %vm566_vm2, %v2742_v62  ;;  %v7194_v62 = vld [vmem:[#allocation62_spill] sm:$0xff] }
0x16a7   :  { %v2731_v44 = vpop.f32.mrf.mxu2 }
0x16af   :  { %v2733_v63 = vpop.f32.mrf.mxu2 }
0x16b0   :  { %v2743_v57 = vpack.c.bf16 %v2733_v63, %v2731_v44  ;;  %v7195_v63 = vld [vmem:[#allocation63_spill] sm:$0xff] }
0x16b2   :  { %3900 = vmatmul.msk.bf16.gmra.mxu1 %vm566_vm2, %v2743_v57 }
0x16bf   :  { %v2780_v32 = vpop.f32.mrf.mxu1 }
0x16c7   :  { %v6536_v20 = vpop.f32.mrf.mxu1 }
0x16cf   :  { %v2785_v14 = vpop.f32.mrf.mxu1 }
0x16d7   :  { %v2787_v28 = vpop.f32.mrf.mxu1 }
0x16df   :  { %v2790_v26 = vpop.f32.mrf.mxu1 }
0x16e0   :  { %v6559_v57 = vadd.f32 %v7195_v63, %v2790_v26 }
0x16e7   :  { %v2792_v61 = vpop.f32.mrf.mxu1 }
0x16e8   :  { %v6550_v36 = vadd.f32 %v7189_v4, %v2792_v61  ;;  %v7196_v61 = vld [vmem:[#allocation64_spill] sm:$0xff] }
0x16ef   :  { %v2795_v30 = vpop.f32.mrf.mxu1 }
0x16f0   :  { %v6544_v55 = vadd.f32 %v7186_v50, %v2795_v30  ;;  %v6562_v30 = vadd.f32 %v7196_v61, %v2785_v14 }
0x16f7   :  { %v2797_v45 = vpop.f32.mrf.mxu1 }
0x16f8   :  { %v2798_v44 = vadd.f32 %v7194_v62, %v2797_v45 }
0x16ff   :  { %v2800_v25 = vpop.f32.mrf.mxu1 }
0x1700   :  { %v2801_v46 = vadd.f32 %v7192_v21, %v2800_v25 }
0x1707   :  { %v2802_v41 = vpop.f32.mrf.mxu1 }
0x1708   :  { %v2803_v51 = vadd.f32 %v7193_v37, %v2802_v41  ;;  %v7198_v41 = vld [vmem:[#allocation66_spill] sm:$0xff] }
0x170f   :  { %v2805_v23 = vpop.f32.mrf.mxu1 }
0x1710   :  { %v2806_v34 = vadd.f32 %v7191_v48, %v2805_v23  ;;  %v7197_v23 = vld [vmem:[#allocation65_spill] sm:$0xff] }
0x1711   :  { %v6567_v25 = vadd.f32 %v7197_v23, %v2787_v28 }
0x1717   :  { %v2807_v39 = vpop.f32.mrf.mxu1 }
0x1718   :  { %v6540_v60 = vadd.f32 %v7185_v24, %v2807_v39  ;;  %v6571_v39 = vadd.f32 %v7198_v41, %v2780_v32 }
0x171f   :  { %v2810_v12 = vpop.f32.mrf.mxu1 }
0x1720   :  { %v2811_v29 = vadd.f32 %v7184_v49, %v2810_v12 }
0x1722   :  { %2844 = vmax.xlane.f32.xlu1 %v2811_v29 }
0x1727   :  { %v2812_v16 = vpop.f32.mrf.mxu1 }
0x1728   :  { %v2813_v2 = vadd.f32 %v7190_v33, %v2812_v16 }
0x172a   :  { %2842 = vmax.xlane.f32.xlu1 %v6540_v60 }
0x172f   :  { %v2815_v13 = vpop.f32.mrf.mxu1 }
0x1730   :  { %v2816_v40 = vadd.f32 %v7187_v53, %v2815_v13 }
0x1732   :  { %2832 = vmax.xlane.f32.xlu1 %v6544_v55  ;;  %2848 = vmax.xlane.f32.xlu2 %v2816_v40 }
0x1737   :  { %v2817_v22 = vpop.f32.mrf.mxu1 }
0x1738   :  { %v2818_v3 = vadd.f32 %v7188_v10, %v2817_v22 }
0x173a   :  { %2830 = vmax.xlane.f32.xlu1 %v6550_v36  ;;  %2850 = vmax.xlane.f32.xlu0 %v2818_v3 }
0x173b   :  { %2846 = vmax.xlane.f32.xlu2 %v2813_v2 }
0x1742   :  { %2840 = vmax.xlane.f32.xlu0 %v2806_v34 }
0x1743   :  { %2836 = vmax.xlane.f32.xlu2 %v2801_v46 }
0x174a   :  { %2838 = vmax.xlane.f32.xlu0 %v2803_v51 }
0x174b   :  { %2834 = vmax.xlane.f32.xlu2 %v2798_v44 }
0x1752   :  { %2828 = vmax.xlane.f32.xlu0 %v6559_v57 }
0x1753   :  { %2824 = vmax.xlane.f32.xlu2 %v6562_v30 }
0x175a   :  { %2826 = vmax.xlane.f32.xlu0 %v6567_v25 }
0x1762   :  { %2820 = vmax.xlane.f32.xlu0 %v6571_v39 }
0x1795   :  { %v2845_v49 = vpop.xlane.xlu1 %2844 }
0x1796   :  { %v2864_v28 = vsub.f32 %v2811_v29, %v2845_v49 }
0x1798   :  { %v2892_v10 = vmul.f32 1.442695, %v2864_v28 }
0x179d   :  { %v2843_v32 = vpop.xlane.xlu1 %2842 }
0x179e   :  { %v2863_v29 = vsub.f32 %v6540_v60, %v2843_v32 }
0x17a5   :  { %v2849_v45 = vpop.xlane.xlu2 %2848 }
0x17a6   :  { %v2866_v26 = vsub.f32 %v2816_v40, %v2849_v45 }
0x17a8   :  { %v2896_v12 = vmul.f32 1.442695, %v2866_v26 }
0x17aa   :  { %4245 = vpow2.f32 %v2896_v12 }
0x17ad   :  { %v2851_v14 = vpop.xlane.xlu0 %2850 }
0x17ae   :  { %v2867_v16 = vsub.f32 %v2818_v3, %v2851_v14  ;;  %v2847_v24 = vpop.xlane.xlu2 %2846  ;;  %v6579_v3 = vadd.f32 %v6299_v47, %v6536_v20  ;;  %v2833_v47 = vpop.xlane.xlu1 %2832 }
0x17af   :  { %v2865_v13 = vsub.f32 %v2813_v2, %v2847_v24  ;;  %v2858_v26 = vsub.f32 %v6544_v55, %v2833_v47 }
0x17b0   :  { %v2898_v50 = vmul.f32 1.442695, %v2867_v16  ;;  %v6574_v53 = vpop.eup %4245 }
0x17b1   :  { %v2894_v22 = vmul.f32 1.442695, %v2865_v13  ;;  %2928 = vadd.xlane.f32.xlu1 %v6574_v53 }
0x17b2   :  { %4247 = vpow2.f32 %v2898_v50 }
0x17b3   :  { %4249 = vpow2.f32 %v2894_v22 }
0x17b4   :  { %4251 = vpow2.f32 %v2892_v10 }
0x17b5   :  { %v2841_v4 = vpop.xlane.xlu0 %2840 }
0x17b6   :  { %v2862_v40 = vsub.f32 %v2806_v34, %v2841_v4  ;;  %v2837_v33 = vpop.xlane.xlu2 %2836  ;;  %v2890_v34 = vmul.f32 1.442695, %v2863_v29  ;;  %v2831_v55 = vpop.xlane.xlu1 %2830 }
0x17b7   :  { %v2860_v48 = vsub.f32 %v2801_v46, %v2837_v33 }
0x17b8   :  { %v2888_v21 = vmul.f32 1.442695, %v2862_v40  ;;  %v6581_v2 = vpop.eup %4247 }
0x17b9   :  { %v2884_v37 = vmul.f32 1.442695, %v2860_v48  ;;  %v6584_v62 = vpop.eup %4249  ;;  %2930 = vadd.xlane.f32.xlu2 %v6581_v2  ;;  %2822 = vmax.xlane.f32.xlu1 %v6579_v3 }
0x17ba   :  { %4253 = vpow2.f32 %v2888_v21  ;;  %2926 = vadd.xlane.f32.xlu0 %v6584_v62  ;;  %v6589_v61 = vpop.eup %4251 }
0x17bb   :  { %4255 = vpow2.f32 %v2884_v37 }
0x17bc   :  { %4257 = vpow2.f32 %v2890_v34 }
0x17bd   :  { %v2839_v46 = vpop.xlane.xlu0 %2838 }
0x17be   :  { %v2861_v20 = vsub.f32 %v2803_v51, %v2839_v46  ;;  %v2835_v63 = vpop.xlane.xlu2 %2834  ;;  %v2880_v51 = vmul.f32 1.442695, %v2858_v26 }
0x17bf   :  { %v2859_v23 = vsub.f32 %v2798_v44, %v2835_v63 }
0x17c0   :  { %v6591_v60 = vpop.eup %4253  ;;  %v2886_v41 = vmul.f32 1.442695, %v2861_v20 }
0x17c1   :  { %v6593_v45 = vpop.eup %4255  ;;  %v2882_v12 = vmul.f32 1.442695, %v2859_v23  ;;  %2924 = vadd.xlane.f32.xlu2 %v6589_v61  ;;  %2920 = vadd.xlane.f32.xlu1 %v6591_v60 }
0x17c2   :  { %4259 = vpow2.f32 %v2886_v41  ;;  %2916 = vadd.xlane.f32.xlu0 %v6593_v45  ;;  %v6600_v16 = vpop.eup %4257 }
0x17c3   :  { %4261 = vpow2.f32 %v2882_v12 }
0x17c4   :  { %4263 = vpow2.f32 %v2880_v51 }
0x17c5   :  { %v2829_v49 = vpop.xlane.xlu0 %2828 }
0x17c6   :  { %v2856_v44 = vsub.f32 %v6559_v57, %v2829_v49  ;;  %v2825_v14 = vpop.xlane.xlu2 %2824  ;;  %v2857_v57 = vsub.f32 %v6550_v36, %v2831_v55 }
0x17c7   :  { %v2854_v24 = vsub.f32 %v6562_v30, %v2825_v14 }
0x17c8   :  { %v6603_v13 = vpop.eup %4259  ;;  %v2876_v50 = vmul.f32 1.442695, %v2856_v44  ;;  %v2878_v4 = vmul.f32 1.442695, %v2857_v57 }
0x17c9   :  { %v6605_v28 = vpop.eup %4261  ;;  %v2872_v22 = vmul.f32 1.442695, %v2854_v24  ;;  %2922 = vadd.xlane.f32.xlu2 %v6600_v16  ;;  %2918 = vadd.xlane.f32.xlu1 %v6603_v13 }
0x17ca   :  { %4265 = vpow2.f32 %v2876_v50  ;;  %2914 = vadd.xlane.f32.xlu0 %v6605_v28  ;;  %v6612_v10 = vpop.eup %4263 }
0x17cb   :  { %4267 = vpow2.f32 %v2872_v22 }
0x17cd   :  { %v2827_v32 = vpop.xlane.xlu0 %2826 }
0x17ce   :  { %v2855_v30 = vsub.f32 %v6567_v25, %v2827_v32 }
0x17d0   :  { %v6614_v40 = vpop.eup %4265  ;;  %v2874_v33 = vmul.f32 1.442695, %v2855_v30 }
0x17d1   :  { %v6616_v48 = vpop.eup %4267  ;;  %2912 = vadd.xlane.f32.xlu2 %v6612_v10  ;;  %2908 = vadd.xlane.f32.xlu1 %v6614_v40 }
0x17d2   :  { %4269 = vpow2.f32 %v2874_v33  ;;  %2904 = vadd.xlane.f32.xlu0 %v6616_v48 }
0x17d3   :  { %4271 = vpow2.f32 %v2878_v4 }
0x17d5   :  { %v2821_v36 = vpop.xlane.xlu0 %2820 }
0x17d6   :  { %v2852_v21 = vsub.f32 %v6571_v39, %v2821_v36 }
0x17d8   :  { %v6622_v25 = vpop.eup %4269  ;;  %v2868_v29 = vmul.f32 1.442695, %v2852_v21 }
0x17d9   :  { %v6624_v37 = vpop.eup %4271  ;;  %2906 = vadd.xlane.f32.xlu1 %v6622_v25 }
0x17da   :  { %4273 = vpow2.f32 %v2868_v29  ;;  %2910 = vadd.xlane.f32.xlu2 %v6624_v37 }
0x17e0   :  { %v6628_v34 = vpop.eup %4273 }
0x17e2   :  { %2900 = vadd.xlane.f32.xlu2 %v6628_v34 }
0x1824   :  { %v2929_v46 = vpop.xlane.xlu1 %2928 }
0x1825   :  { %4275 = vrcp.f32 %v2929_v46 }
0x182b   :  { %v4276_v23 = vpop.eup %4275 }
0x182c   :  { %v2823_v47 = vpop.xlane.xlu1 %2822  ;;  %v2931_v20 = vpop.xlane.xlu2 %2930  ;;  %v2962_v12 = vmul.f32 %v4276_v23, %v6574_v53 }
0x182d   :  { %v2853_v39 = vsub.f32 %v6579_v3, %v2823_v47  ;;  %4277 = vrcp.f32 %v2931_v20  ;;  %v2927_v41 = vpop.xlane.xlu0 %2926 }
0x182f   :  { %v2870_v63 = vmul.f32 1.442695, %v2853_v39 }
0x1831   :  { %4279 = vpow2.f32 %v2870_v63 }
0x1832   :  { %4281 = vrcp.f32 %v2927_v41 }
0x1833   :  { %v4278_v26 = vpop.eup %4277 }
0x1834   :  { %v2963_v51 = vmul.f32 %v4278_v26, %v6581_v2  ;;  %v2925_v49 = vpop.xlane.xlu2 %2924  ;;  %v2921_v44 = vpop.xlane.xlu1 %2920 }
0x1835   :  { %4283 = vrcp.f32 %v2925_v49  ;;  %v2917_v2 = vpop.xlane.xlu0 %2916 }
0x1836   :  { %v2971_v14 = vpack.c.bf16 %v2963_v51, %v2962_v12  ;;  %4285 = vrcp.f32 %v2921_v44 }
0x1837   :  { %v6634_v24 = vpop.eup %4279 }
0x1838   :  { %2902 = vadd.xlane.f32.xlu0 %v6634_v24  ;;  %2972 = vmatpush.bf16.xpose.msra.mxu3 %v2971_v14  ;;  %v4282_v3 = vpop.eup %4281 }
0x1839   :  { %v2961_v53 = vmul.f32 %v4282_v3, %v6584_v62 }
0x183b   :  { %v4284_v50 = vpop.eup %4283 }
0x183c   :  { %v2923_v55 = vpop.xlane.xlu2 %2922  ;;  %v2960_v22 = vmul.f32 %v4284_v50, %v6589_v61  ;;  %v2919_v57 = vpop.xlane.xlu1 %2918 }
0x183d   :  { %4287 = vrcp.f32 %v2923_v55  ;;  %v4286_v30 = vpop.eup %4285  ;;  %v2915_v47 = vpop.xlane.xlu0 %2914 }
0x183e   :  { %v2970_v32 = vpack.c.bf16 %v2961_v53, %v2960_v22  ;;  %4289 = vrcp.f32 %v2919_v57  ;;  %v2958_v36 = vmul.f32 %v4286_v30, %v6591_v60  ;;  %v2656_v53 = vpop.f32.mrf.mxu0 }
0x183f   :  { %4291 = vrcp.f32 %v2917_v2 }
0x1840   :  { %2973 = vmatpush.bf16.xpose.msra.mxu3 %v2970_v32 }
0x1843   :  { %v4288_v4 = vpop.eup %4287 }
0x1844   :  { %v2913_v33 = vpop.xlane.xlu2 %2912  ;;  %v2959_v21 = vmul.f32 %v4288_v4, %v6600_v16  ;;  %v4290_v46 = vpop.eup %4289 }
0x1845   :  { %v4292_v61 = vpop.eup %4291  ;;  %4293 = vrcp.f32 %v2913_v33  ;;  %v2957_v62 = vmul.f32 %v4290_v46, %v6603_v13  ;;  %v2909_v20 = vpop.xlane.xlu1 %2908 }
0x1846   :  { %v2969_v29 = vpack.c.bf16 %v2959_v21, %v2958_v36  ;;  %4295 = vrcp.f32 %v2915_v47  ;;  %v2956_v39 = vmul.f32 %v4292_v61, %v6593_v45  ;;  %v2905_v44 = vpop.xlane.xlu0 %2904  ;;  %v2658_v2 = vpop.f32.mrf.mxu0 }
0x1847   :  { %v2659_v46 = vadd.f32 %v6378_v8, %v2658_v2 }
0x1848   :  { %2974 = vmatpush.bf16.xpose.msra.mxu3 %v2969_v29  ;;  %v2968_v23 = vpack.c.bf16 %v2957_v62, %v2956_v39 }
0x184b   :  { %v4294_v41 = vpop.eup %4293 }
0x184c   :  { %v4296_v26 = vpop.eup %4295  ;;  %v2954_v60 = vmul.f32 %v4294_v41, %v6612_v10 }
0x184d   :  { %v2911_v63 = vpop.xlane.xlu2 %2910  ;;  %v2955_v16 = vmul.f32 %v4296_v26, %v6605_v28  ;;  %v2907_v12 = vpop.xlane.xlu1 %2906 }
0x184e   :  { %4297 = vrcp.f32 %v2911_v63  ;;  %v2661_v57 = vpop.f32.mrf.mxu0 }
0x184f   :  { %4299 = vrcp.f32 %v2909_v20  ;;  %v2967_v51 = vpack.c.bf16 %v2955_v16, %v2954_v60  ;;  %v2662_v20 = vadd.f32 %v6381_v18, %v2661_v57 }
0x1850   :  { %2975 = vmatpush.bf16.xpose.msra.mxu3 %v2968_v23  ;;  %4301 = vrcp.f32 %v2907_v12 }
0x1851   :  { %4303 = vrcp.f32 %v2905_v44 }
0x1854   :  { %v4298_v49 = vpop.eup %4297 }
0x1855   :  { %v4300_v13 = vpop.eup %4299  ;;  %v2953_v45 = vmul.f32 %v4298_v49, %v6624_v37  ;;  %v2901_v30 = vpop.xlane.xlu2 %2900 }
0x1856   :  { %v2952_v14 = vmul.f32 %v4300_v13, %v6614_v40  ;;  %v4302_v55 = vpop.eup %4301  ;;  %v2663_v32 = vpop.f32.mrf.mxu0  ;;  %4305 = vrcp.f32 %v2901_v30 }
0x1857   :  { %v4304_v50 = vpop.eup %4303  ;;  %v2951_v10 = vmul.f32 %v4302_v55, %v6622_v25  ;;  %v2664_v39 = vadd.f32 %v6384_v59, %v2663_v32 }
0x1858   :  { %2976 = vmatpush.bf16.xpose.msra.mxu3 %v2967_v51  ;;  %v2966_v3 = vpack.c.bf16 %v2953_v45, %v2952_v14  ;;  %v2950_v28 = vmul.f32 %v4304_v50, %v6616_v48  ;;  %v2657_v48 = vadd.f32 %v6375_v56, %v2656_v53  ;;  %v7199_v53 = vld [vmem:[#allocation67_spill] sm:$0xff] }
0x1859   :  { %v2684_v63 = vpack.c.bf16 %v2664_v39, %v2662_v20 }
0x185a   :  { %v2965_v22 = vpack.c.bf16 %v2951_v10, %v2950_v28  ;;  %v2683_v47 = vpack.c.bf16 %v2659_v46, %v2657_v48  ;;  %v6698_v46 = vld [vmem:[#allocation13 + $0x18] sm:$0xff] }
0x185c   :  { %v4306_v40 = vpop.eup %4305 }
0x185d   :  { %v2948_v36 = vmul.f32 %v4306_v40, %v6628_v34 }
0x185e   :  { %v2666_v4 = vpop.f32.mrf.mxu0 }
0x185f   :  { %v2667_v34 = vadd.f32 %v6387_v35, %v2666_v4 }
0x1860   :  { %2977 = vmatpush.bf16.xpose.msra.mxu3 %v2966_v3 }
0x1866   :  { %v2668_v29 = vpop.f32.mrf.mxu0 }
0x1868   :  { %2978 = vmatpush.bf16.xpose.msra.mxu3 %v2965_v22 }
0x186e   :  { %v2671_v61 = vpop.f32.mrf.mxu0 }
0x186f   :  { %v2672_v56 = vadd.f32 %v6393_v31, %v2671_v61 }
0x1871   :  { %v2686_v41 = vpack.c.bf16 %v2672_v56, %v2672_v56 }
0x1876   :  { %v2673_v62 = vpop.f32.mrf.mxu0 }
0x1877   :  { %v6701_v62 = vld [vmem:[#allocation13 + $0x20] sm:$0xff] }
0x18ab   :  { %v2903_v37 = vpop.xlane.xlu0 %2902 }
0x18ac   :  { %4307 = vrcp.f32 %v2903_v37 }
0x18b2   :  { %v4308_v33 = vpop.eup %4307 }
0x18b3   :  { %v2949_v21 = vmul.f32 %v4308_v33, %v6634_v24  ;;  %v2669_v24 = vadd.f32 %v6390_v54, %v2668_v29 }
0x18b5   :  { %v2964_v25 = vpack.c.bf16 %v2949_v21, %v2948_v36  ;;  %v2685_v23 = vpack.c.bf16 %v2669_v24, %v2667_v34  ;;  %v6692_v36 = vld [vmem:[#allocation13] sm:$0xff]  ;;  %v6704_v24 = vld [vmem:[#allocation13 + $0x28] sm:$0xff] }
0x18b7   :  { %2979 = vmatpush.bf16.xpose.msra.mxu3 %v2964_v25  ;;  %v6695_v25 = vld [vmem:[#allocation13 + $0x10] sm:$0xff] }
0x18be   :  { %2980 = vmatmul.bf16.vlgmr.msra.gmra.mxu3 %v2683_v47 }
0x18ce   :  { %2985 = vmatmul.bf16.gmra.mxu3 %v2684_v63 }
0x18de   :  { %2990 = vmatmul.bf16.gmra.mxu3 %v2685_v23 }
0x18ee   :  { %2995 = vmatmul.bf16.gmra.mxu3 %v2686_v41 }
0x1941   :  { %v2981_v8 = vpop.f32.mrf.mxu3 }
0x1949   :  { %v2983_v26 = vpop.f32.mrf.mxu3 }
0x194a   :  { %v3000_v13 = vpack.c.bf16 %v2983_v26, %v2981_v8 }
0x1951   :  { %v2986_v60 = vpop.f32.mrf.mxu3 }
0x1959   :  { %v2988_v16 = vpop.f32.mrf.mxu3 }
0x195a   :  { %v3001_v54 = vpack.c.bf16 %v2988_v16, %v2986_v60 }
0x1961   :  { %v2991_v12 = vpop.f32.mrf.mxu3 }
0x1969   :  { %v2993_v18 = vpop.f32.mrf.mxu3 }
0x196a   :  { %v3002_v35 = vpack.c.bf16 %v2993_v18, %v2991_v12 }
0x1971   :  { %v2996_v51 = vpop.f32.mrf.mxu3 }
0x1972   :  { %v3003_v59 = vpack.c.bf16 %v2996_v51, %v2996_v51 }
0x1974   :  { %v3005_v49 = vsel %vm591_vm1, %v3003_v59, 0 }
0x1975   :  { %3011 = vmatpush.bf16.msrb.mxu3 %v3005_v49 }
0x1979   :  { %v2998_v44 = vpop.f32.mrf.mxu3  ;;  %3012 = vmatpush.bf16.msrb.mxu3 %v3002_v35 }
0x197d   :  { %3013 = vmatpush.bf16.msrb.mxu3 %v3001_v54 }
0x1981   :  { %3014 = vmatpush.bf16.msrb.mxu3 %v3000_v13 }
0x1984   :  { %3901 = vmatmul.msk.bf16.vlgmr.msrb.gmra.mxu3 %vm566_vm2, %v6397_v6 }
0x1994   :  { %3902 = vmatmul.msk.bf16.gmra.mxu3 %vm566_vm2, %v6401_v9 }
0x19a4   :  { %3903 = vmatmul.msk.bf16.gmra.mxu3 %vm566_vm2, %v6405_v17 }
0x1a07   :  { %v3016_v31 = vpop.f32.mrf.mxu3 }
0x1a08   :  { %v3017_v30 = vadd.f32 %v6427_v0, %v3016_v31  ;;  %v6685_v0 = vld [vmem:[#allocation11 + $0x10] sm:$0xff] }
0x1a0f   :  { %v3018_v45 = vpop.f32.mrf.mxu3 }
0x1a10   :  { %v3019_v17 = vadd.f32 %v6423_v1, %v3018_v45  ;;  %v6681_v1 = vld [vmem:[#allocation11 + $0x8] sm:$0xff] }
0x1a17   :  { %v3021_v14 = vpop.f32.mrf.mxu3 }
0x1a18   :  { %v3022_v6 = vadd.f32 %v7199_v53, %v3021_v14 }
0x1a1f   :  { %v3023_v3 = vpop.f32.mrf.mxu3 }
0x1a20   :  { %v3024_v28 = vadd.f32 %v6412_v42, %v3023_v3  ;;  %v3032_v42 = vadd.f32 %v3019_v17, %v6473_v27  ;;  %v6689_v27 = vld [vmem:[#allocation13 + $0x8] sm:$0xff] }
0x1a22   :  { %v3034_v57 = vadd.f32 %v3024_v28, %v6463_v43 }
0x1a27   :  { %v3026_v55 = vpop.f32.mrf.mxu3 }
0x1a28   :  { %v3027_v50 = vadd.f32 %v6409_v11, %v3026_v55  ;;  %v3033_v11 = vadd.f32 %v3022_v6, %v6460_v52 }
0x1a2a   :  { %v3035_v2 = vadd.f32 %v3027_v50, %v6457_v38  ;;  %v3038_v37 = vpack.c.bf16 %v3034_v57, %v3033_v11  ;;  %v6677_v38 = vld [vmem:[#allocation11] sm:$0xff] }
0x1a2f   :  { %v3028_v10 = vpop.f32.mrf.mxu3 }
0x1a30   :  { %v3029_v22 = vadd.f32 %v6415_v58, %v3028_v10  ;;  %v3031_v58 = vadd.f32 %v3017_v30, %v6469_v5 }
0x1a32   :  { %v3036_v9 = vadd.f32 %v3029_v22, %v6454_v15  ;;  %v3037_v4 = vpack.c.bf16 %v3032_v42, %v3031_v58 }
0x1a34   :  { %v3039_v32 = vpack.c.bf16 %v3036_v9, %v3035_v2 }
0x1a36   :  { %3045 = vmatpush.bf16.msrb.mxu2 %v3039_v32 }
0x1a3a   :  { %3046 = vmatpush.bf16.msrb.mxu2 %v3038_v37 }
0x1a3e   :  { %3047 = vmatpush.bf16.msrb.mxu2 %v3037_v4 }
0x1a41   :  { %3904 = vmatmul.msk.bf16.vlgmr.msrb.gmra.mxu2 %vm352_vm0, %v6677_v38 }
0x1a51   :  { %3905 = vmatmul.msk.bf16.gmra.mxu2 %vm352_vm0, %v6681_v1 }
0x1a61   :  { %3906 = vmatmul.msk.bf16.gmra.mxu2 %vm352_vm0, %v6685_v0 }
0x1ac4   :  { %v3049_v15 = vpop.f32.mrf.mxu2 }
0x1ac5   :  { %v3050_v21 = vadd.f32 %v6692_v36, %v3049_v15 }
0x1acc   :  { %v3051_v52 = vpop.f32.mrf.mxu2 }
0x1acd   :  { %v3052_v40 = vadd.f32 %v6689_v27, %v3051_v52 }
0x1acf   :  { %v3064_v48 = vadd.f32 %v3052_v40, %v3050_v21 }
0x1ad4   :  { %v3054_v43 = vpop.f32.mrf.mxu2 }
0x1ad5   :  { %v3055_v29 = vadd.f32 %v6695_v25, %v3054_v43 }
0x1ad7   :  { %v3065_v61 = vadd.f32 %v3064_v48, %v3055_v29 }
0x1adc   :  { %v3056_v5 = vpop.f32.mrf.mxu2 }
0x1add   :  { %v3057_v47 = vadd.f32 %v6698_v46, %v3056_v5 }
0x1adf   :  { %v3066_v39 = vadd.f32 %v3065_v61, %v3057_v47 }
0x1ae4   :  { %v3059_v33 = vpop.f32.mrf.mxu2 }
0x1ae5   :  { %v3060_v20 = vadd.f32 %v6701_v62, %v3059_v33 }
0x1ae7   :  { %v3067_v34 = vadd.f32 %v3066_v39, %v3060_v20 }
0x1aec   :  { %v3061_v63 = vpop.f32.mrf.mxu2 }
0x1aed   :  { %v3062_v23 = vadd.f32 %v6704_v24, %v3061_v63  ;;  %v6715_v63 = vld [vmem:[#allocation14 + $0x10] sm:$0xff] }
0x1aef   :  { %v3068_v56 = vadd.f32 %v3067_v34, %v3062_v23 }
0x1af1   :  { %v3069_v41 = vrot.slane %v3068_v56, 4 }
0x1af3   :  { %v3070_v8 = vadd.f32 %v3069_v41, %v3068_v56  ;;  %v6721_v41 = vld [vmem:[#allocation14] sm:$0xff] }
0x1af5   :  { %v3071_v26 = vrot.slane %v3070_v8, 2 }
0x1af7   :  { %v3072_v60 = vadd.f32 %v3071_v26, %v3070_v8  ;;  %v6724_v26 = vld [vmem:[#allocation14 + $0x8] sm:$0xff] }
0x1af9   :  { %v3073_v16 = vrot.slane %v3072_v60, 1 }
0x1afb   :  { %v3074_v12 = vadd.f32 %v3073_v16, %v3072_v60  ;;  %v6727_v16 = vld [vmem:[#allocation16 + $0x28] sm:$0xff] }
0x1afd   :  { %v3075_v18 = vmul.f32 %v3074_v12, %v5616_v19 }
0x1aff   :  { %v3076_v51 = vsub.f32 %v3050_v21, %v3075_v18  ;;  %v3077_v59 = vsub.f32 %v3052_v40, %v3075_v18  ;;  %v3078_v49 = vsub.f32 %v3055_v29, %v3075_v18  ;;  %v3079_v35 = vsub.f32 %v3057_v47, %v3075_v18  ;;  %v6709_v47 = vld [vmem:[#allocation14 + $0x28] sm:$0xff] }
0x1b00   :  { %v3080_v13 = vsub.f32 %v3060_v20, %v3075_v18  ;;  %v3081_v14 = vsub.f32 %v3062_v23, %v3075_v18  ;;  %v6712_v20 = vld [vmem:[#allocation14 + $0x20] sm:$0xff]  ;;  %v6718_v23 = vld [vmem:[#allocation14 + $0x18] sm:$0xff]  ;;  %v6732_v18 = vld [vmem:[#allocation16 + $0x20] sm:$0xff] }
0x1b01   :  { %v3082_v44 = vmul.f32 %v3076_v51, %v3076_v51  ;;  %v3083_v54 = vmul.f32 %v3077_v59, %v3077_v59  ;;  %v3084_v31 = vmul.f32 %v3078_v49, %v3078_v49  ;;  %v3085_v3 = vmul.f32 %v3079_v35, %v3079_v35 }
0x1b02   :  { %v3086_v50 = vmul.f32 %v3080_v13, %v3080_v13  ;;  %v3087_v28 = vmul.f32 %v3081_v14, %v3081_v14 }
0x1b03   :  { %v3088_v45 = vadd.f32 %v3083_v54, %v3082_v44 }
0x1b05   :  { %v3089_v55 = vadd.f32 %v3088_v45, %v3084_v31  ;;  %v6756_v45 = vld [vmem:[#allocation16 + $0x8] sm:$0xff] }
0x1b07   :  { %v3090_v10 = vadd.f32 %v3089_v55, %v3085_v3 }
0x1b09   :  { %v3091_v22 = vadd.f32 %v3090_v10, %v3086_v50  ;;  %v4565_v50 = vld [vmem:[%s7016_s3] sm:$0xff]  ;;  %v4566_v10 = vld [vmem:[%s7016_s3 + $0x8] sm:$0xff] }
0x1b0b   :  { %v3092_v53 = vadd.f32 %v3091_v22, %v3087_v28  ;;  %v4567_v28 = vld [vmem:[%s7016_s3 + $0x10] sm:$0xff]  ;;  %v4568_v22 = vld [vmem:[%s7016_s3 + $0x18] sm:$0xff] }
0x1b0d   :  { %v3093_v6 = vrot.slane %v3092_v53, 4 }
0x1b0f   :  { %v3094_v2 = vadd.f32 %v3093_v6, %v3092_v53  ;;  %v4569_v53 = vld [vmem:[%s7016_s3 + $0x20] sm:$0xff]  ;;  %v4570_v6 = vld [vmem:[%s7016_s3 + $0x28] sm:$0xff] }
0x1b11   :  { %v3095_v9 = vrot.slane %v3094_v2, 2 }
0x1b13   :  { %v3096_v17 = vadd.f32 %v3095_v9, %v3094_v2  ;;  %v4571_v2 = vld [vmem:[%s7016_s3 + $0x30] sm:$0xff]  ;;  %v4572_v9 = vld [vmem:[%s7016_s3 + $0x38] sm:$0xff] }
0x1b15   :  { %v3097_v57 = vrot.slane %v3096_v17, 1 }
0x1b17   :  { %v3098_v32 = vadd.f32 %v3097_v57, %v3096_v17  ;;  %v4573_v57 = vld [vmem:[%s7016_s3 + $0x40] sm:$0xff] }
0x1b19   :  { %v3099_v30 = vmul.f32 %v3098_v32, %v5616_v19 }
0x1b1b   :  { %v3100_v11 = vadd.f32 1e-05, %v3099_v30  ;;  %v4574_v30 = vld [vmem:[#allocation7] sm:$0xff] }
0x1b1d   :  { %4309 = vrsqrt.f32 %v3100_v11  ;;  %vm3107_vm4 = vweird.f32 %v3100_v11 }
0x1b23   :  { %v4310_v42 = vpop.eup %4309 }
0x1b24   :  { %v3102_v37 = vmul.f32 %v4310_v42, %v3100_v11  ;;  %vm3108_vm3 = vweird.f32 %v4310_v42 }
0x1b25   :  { %vm3109_vm5 = vmor %vm3107_vm4, %vm3108_vm3 }
0x1b26   :  { %v3103_v58 = vmul.f32 %v4310_v42, %v3102_v37 }
0x1b28   :  { %v3104_v4 = vmul.f32 0.5, %v3103_v58 }
0x1b2a   :  { %v3105_v15 = vsub.f32 1.5, %v3104_v4 }
0x1b2c   :  { %v3106_v52 = vmul.f32 %v4310_v42, %v3105_v15  ;;  %v4576_v15 = vld [vmem:[%s7016_s3 + $0x48] sm:$0xff] }
0x1b2e   :  { %v3110_v43 = vsel %vm3109_vm5, %v4310_v42, %v3106_v52  ;;  %v4575_v42 = vld [vmem:[#allocation7 + $0x8] sm:$0xff] }
0x1b2f   :  { %v3115_v5 = vmul.f32 %v3110_v43, %v3080_v13  ;;  %v3116_v40 = vmul.f32 %v3110_v43, %v3081_v14  ;;  %v3113_v33 = vmul.f32 %v3110_v43, %v3078_v49  ;;  %v3114_v21 = vmul.f32 %v3110_v43, %v3079_v35  ;;  %v6742_v35 = vld [vmem:[#allocation16 + $0x18] sm:$0xff]  ;;  %v6750_v13 = vld [vmem:[#allocation16] sm:$0xff] }
0x1b30   :  { %v3111_v29 = vmul.f32 %v3110_v43, %v3076_v51  ;;  %v3112_v48 = vmul.f32 %v3110_v43, %v3077_v59  ;;  %v6737_v59 = vld [vmem:[#allocation16 + $0x10] sm:$0xff] }
0x1b31   :  { %v3122_v61 = vmul.f32 %v6709_v47, %v3116_v40  ;;  %v3121_v39 = vmul.f32 %v6712_v20, %v3115_v5  ;;  %v3119_v34 = vmul.f32 %v6715_v63, %v3113_v33  ;;  %v3120_v56 = vmul.f32 %v6718_v23, %v3114_v21  ;;  %v4577_v33 = vld [vmem:[#allocation7 + $0x30] sm:$0xff] }
0x1b32   :  { %v3117_v8 = vmul.f32 %v6721_v41, %v3111_v29  ;;  %v3118_v60 = vmul.f32 %v6724_v26, %v3112_v48  ;;  %v4578_v48 = vld [vmem:[#allocation7 + $0x28] sm:$0xff] }
0x1b33   :  { %v6730_v12 = vadd.f32 %v6727_v16, %v3122_v61  ;;  %v6735_v51 = vadd.f32 %v6732_v18, %v3121_v39  ;;  %v6740_v49 = vadd.f32 %v6737_v59, %v3119_v34  ;;  %v6745_v44 = vadd.f32 %v6742_v35, %v3120_v56  ;;  %v4579_v34 = vld [vmem:[#allocation7 + $0x20] sm:$0xff] }
0x1b34   :  { %v6753_v31 = vadd.f32 %v6750_v13, %v3117_v8  ;;  %v6759_v14 = vadd.f32 %v6756_v45, %v3118_v60  ;;  %v4580_v60 = vld [vmem:[#allocation7 + $0x18] sm:$0xff] }
0x1b35   :  { %3135 = vst [vmem:[#allocation17 + $0xe8] sm:$0xff] %v6730_v12  ;;  %v3138_v54 = vpack.c.bf16 %v6730_v12, %v6735_v51  ;;  %v3137_v3 = vpack.c.bf16 %v6745_v44, %v6740_v49 }
0x1b36   :  { %3134 = vst [vmem:[#allocation17 + $0xe0] sm:$0xff] %v6735_v51  ;;  %v3136_v55 = vpack.c.bf16 %v6759_v14, %v6753_v31 }
0x1b37   :  { %3144 = vmatpush.bf16.msrb.mxu1 %v3138_v54  ;;  %3132 = vst [vmem:[#allocation17 + $0xd0] sm:$0xff] %v6740_v49 }
0x1b38   :  { %3133 = vst [vmem:[#allocation17 + $0xd8] sm:$0xff] %v6745_v44 }
0x1b39   :  { %3130 = vst [vmem:[#allocation17 + $0xc0] sm:$0xff] %v6753_v31 }
0x1b3a   :  { %3131 = vst [vmem:[#allocation17 + $0xc8] sm:$0xff] %v6759_v14 }
0x1b3b   :  { %3145 = vmatpush.bf16.msrb.mxu1 %v3137_v3 }
0x1b3f   :  { %3146 = vmatpush.bf16.msrb.mxu1 %v3136_v55  ;;  %v4581_v55 = vld [vmem:[#allocation7 + $0x10] sm:$0xff] }
0x1b42   :  { %3907 = vmatmul.msk.bf16.vlgmr.msrb.gmra.mxu1 %vm352_vm0, %v4565_v50 }
0x1b52   :  { %3908 = vmatmul.msk.bf16.gmra.mxu1 %vm352_vm0, %v4566_v10 }
0x1b62   :  { %3909 = vmatmul.msk.bf16.gmra.mxu1 %vm352_vm0, %v4567_v28 }
0x1b72   :  { %3910 = vmatmul.msk.bf16.gmra.mxu1 %vm352_vm0, %v4568_v22  ;;  %v4582_v22 = vld [vmem:[#allocation5] sm:$0xff] }
0x1b82   :  { %3911 = vmatmul.msk.bf16.gmra.mxu1 %vm352_vm0, %v4569_v53 }
0x1b92   :  { %3912 = vmatmul.msk.bf16.gmra.mxu1 %vm352_vm0, %v4570_v6 }
0x1ba2   :  { %3913 = vmatmul.msk.bf16.gmra.mxu1 %vm352_vm0, %v4571_v2  ;;  %v4583_v2 = vld [vmem:[#allocation5 + $0x8] sm:$0xff] }
0x1bb2   :  { %3914 = vmatmul.msk.bf16.gmra.mxu1 %vm352_vm0, %v4572_v9 }
0x1bbf   :  { %v3148_v17 = vpop.f32.mrf.mxu1 }
0x1bc0   :  { %v3149_v11 = vadd.f32 %v4574_v30, %v3148_v17  ;;  %v4584_v17 = vld [vmem:[#allocation7 + $0x68] sm:$0xff] }
0x1bc2   :  { %3915 = vmatmul.msk.bf16.gmra.mxu1 %vm352_vm0, %v4573_v57 }
0x1bc7   :  { %v3150_v32 = vpop.f32.mrf.mxu1 }
0x1bc8   :  { %v3151_v37 = vadd.f32 %v4575_v42, %v3150_v32  ;;  %v4585_v32 = vld [vmem:[#allocation7 + $0x58] sm:$0xff] }
0x1bca   :  { %v3202_v58 = vpack.c.bf16 %v3151_v37, %v3149_v11  ;;  %v4586_v11 = vld [vmem:[#allocation7 + $0x60] sm:$0xff] }
0x1bcf   :  { %v3153_v4 = vpop.f32.mrf.mxu1 }
0x1bd0   :  { %v3154_v50 = vadd.f32 %v4581_v55, %v3153_v4  ;;  %v4596_v55 = vld [vmem:[#allocation5 + $0x38] sm:$0xff] }
0x1bd2   :  { %3916 = vmatmul.msk.bf16.gmra.mxu1 %vm352_vm0, %v4576_v15  ;;  %v4587_v15 = vld [vmem:[#allocation7 + $0x48] sm:$0xff] }
0x1bd7   :  { %v3155_v52 = vpop.f32.mrf.mxu1 }
0x1bd8   :  { %v3156_v54 = vadd.f32 %v4580_v60, %v3155_v52  ;;  %v4594_v60 = vld [vmem:[#allocation5 + $0x28] sm:$0xff] }
0x1bda   :  { %v3203_v10 = vpack.c.bf16 %v3156_v54, %v3154_v50  ;;  %v4595_v54 = vld [vmem:[#allocation5 + $0x30] sm:$0xff] }
0x1bdf   :  { %v3158_v43 = vpop.f32.mrf.mxu1 }
0x1be0   :  { %v3159_v56 = vadd.f32 %v4579_v34, %v3158_v43 }
0x1be2   :  { %3917 = vmatmul.msk.bf16.gmra.mxu1 %vm352_vm0, %v7161_v7 }
0x1be7   :  { %v3160_v5 = vpop.f32.mrf.mxu1 }
0x1be8   :  { %v3161_v61 = vadd.f32 %v4578_v48, %v3160_v5  ;;  %v4591_v48 = vld [vmem:[#allocation7 + $0x38] sm:$0xff] }
0x1bea   :  { %v3204_v8 = vpack.c.bf16 %v3161_v61, %v3159_v56  ;;  %v4592_v56 = vld [vmem:[#allocation5 + $0x18] sm:$0xff] }
0x1bef   :  { %v3163_v40 = vpop.f32.mrf.mxu1 }
0x1bf0   :  { %v3164_v21 = vadd.f32 %v4577_v33, %v3163_v40  ;;  %v4589_v33 = vld [vmem:[#allocation7 + $0x40] sm:$0xff] }
0x1bf2   :  { %v3205_v29 = vpack.c.bf16 %v3164_v21, %v3164_v21 }
0x1bf4   :  { %3218 = vmatpush.bf16.xpose.msra.mxu3 %v3205_v29  ;;  %v4590_v29 = vld [vmem:[#allocation5 + $0x10] sm:$0xff] }
0x1bf7   :  { %v3165_v39 = vpop.f32.mrf.mxu1 }
0x1bf8   :  { %v3166_v61 = vadd.f32 %v4591_v48, %v3165_v39 }
0x1bfc   :  { %3219 = vmatpush.bf16.xpose.msra.mxu3 %v3204_v8  ;;  %v4593_v8 = vld [vmem:[#allocation5 + $0x20] sm:$0xff] }
0x1bff   :  { %v3168_v3 = vpop.f32.mrf.mxu1 }
0x1c00   :  { %v3169_v21 = vadd.f32 %v4589_v33, %v3168_v3 }
0x1c02   :  { %v3206_v34 = vpack.c.bf16 %v3169_v21, %v3166_v61 }
0x1c04   :  { %3220 = vmatpush.bf16.xpose.msra.mxu3 %v3203_v10 }
0x1c07   :  { %v3170_v7 = vpop.f32.mrf.mxu1 }
0x1c08   :  { %v3171_v52 = vadd.f32 %v4587_v15, %v3170_v7 }
0x1c0c   :  { %3221 = vmatpush.bf16.xpose.msra.mxu3 %v3202_v58  ;;  %v4588_v58 = vld [vmem:[#allocation7 + $0x50] sm:$0xff] }
0x1c0f   :  { %v3173_v28 = vpop.f32.mrf.mxu1 }
0x1c10   :  { %v3174_v43 = vadd.f32 %v4588_v58, %v3173_v28 }
0x1c12   :  { %v3207_v40 = vpack.c.bf16 %v3174_v43, %v3171_v52 }
0x1c13   :  { %3222 = vmatmul.bf16.vlgmr.msra.gmra.mxu3 %v4582_v22 }
0x1c17   :  { %v3175_v53 = vpop.f32.mrf.mxu1 }
0x1c18   :  { %v3176_v30 = vadd.f32 %v4585_v32, %v3175_v53 }
0x1c1f   :  { %v3178_v6 = vpop.f32.mrf.mxu1 }
0x1c20   :  { %v3179_v42 = vadd.f32 %v4586_v11, %v3178_v6 }
0x1c22   :  { %v3208_v5 = vpack.c.bf16 %v3179_v42, %v3176_v30 }
0x1c23   :  { %3227 = vmatmul.bf16.gmra.mxu3 %v4583_v2 }
0x1c27   :  { %v3180_v9 = vpop.f32.mrf.mxu1 }
0x1c28   :  { %v3181_v57 = vadd.f32 %v4584_v17, %v3180_v9 }
0x1c2a   :  { %v3209_v37 = vpack.c.bf16 %v3181_v57, %v3181_v57 }
0x1c2c   :  { %v3296_v4 = vsel %vm591_vm1, %v3209_v37, 0 }
0x1c2d   :  { %3302 = vmatpush.bf16.msra.mxu0 %v3296_v4 }
0x1c31   :  { %3303 = vmatpush.bf16.msra.mxu0 %v3208_v5 }
0x1c33   :  { %3232 = vmatmul.bf16.gmra.mxu3 %v4590_v29 }
0x1c35   :  { %3304 = vmatpush.bf16.msra.mxu0 %v3207_v40 }
0x1c39   :  { %3305 = vmatpush.bf16.msra.mxu0 %v3206_v34 }
0x1c43   :  { %3237 = vmatmul.bf16.gmra.mxu3 %v4592_v56 }
0x1c53   :  { %3242 = vmatmul.bf16.gmra.mxu3 %v4593_v8 }
0x1c63   :  { %3247 = vmatmul.bf16.gmra.mxu3 %v4594_v60 }
0x1c73   :  { %3252 = vmatmul.bf16.gmra.mxu3 %v4595_v54 }
0x1c83   :  { %3257 = vmatmul.bf16.gmra.mxu3 %v4596_v55 }
0x1c96   :  { %v3223_v50 = vpop.f32.mrf.mxu3 }
0x1c9e   :  { %v3225_v10 = vpop.f32.mrf.mxu3 }
0x1c9f   :  { %v3263_v3 = vpack.c.bf16 %v3225_v10, %v3223_v50  ;;  %v4597_v10 = vld [vmem:[%s7015_s2 + $0x60] sm:$0xff] }
0x1ca1   :  { %3918 = vmatmul.msk.bf16.vlgmr.msra.gmra.mxu0 %vm566_vm2, %v3263_v3 }
0x1ca6   :  { %v3228_v7 = vpop.f32.mrf.mxu3 }
0x1cae   :  { %v3230_v39 = vpop.f32.mrf.mxu3 }
0x1caf   :  { %v3264_v28 = vpack.c.bf16 %v3230_v39, %v3228_v7  ;;  %v4598_v39 = vld [vmem:[%s7015_s2 + $0x58] sm:$0xff] }
0x1cb1   :  { %3919 = vmatmul.msk.bf16.gmra.mxu0 %vm566_vm2, %v3264_v28 }
0x1cb6   :  { %v3233_v22 = vpop.f32.mrf.mxu3 }
0x1cbe   :  { %v3235_v53 = vpop.f32.mrf.mxu3 }
0x1cbf   :  { %v3265_v6 = vpack.c.bf16 %v3235_v53, %v3233_v22  ;;  %v4599_v53 = vld [vmem:[%s7015_s2 + $0x30] sm:$0xff] }
0x1cc1   :  { %3920 = vmatmul.msk.bf16.gmra.mxu0 %vm566_vm2, %v3265_v6 }
0x1cc6   :  { %v3238_v2 = vpop.f32.mrf.mxu3 }
0x1cce   :  { %v3240_v9 = vpop.f32.mrf.mxu3 }
0x1ccf   :  { %v3266_v17 = vpack.c.bf16 %v3240_v9, %v3238_v2  ;;  %v4600_v2 = vld [vmem:[%s7015_s2 + $0x70] sm:$0xff] }
0x1cd1   :  { %3921 = vmatmul.msk.bf16.gmra.mxu0 %vm566_vm2, %v3266_v17 }
0x1cd6   :  { %v3243_v57 = vpop.f32.mrf.mxu3 }
0x1cde   :  { %v3245_v32 = vpop.f32.mrf.mxu3 }
0x1cdf   :  { %v3267_v30 = vpack.c.bf16 %v3245_v32, %v3243_v57  ;;  %v4601_v57 = vld [vmem:[%s7015_s2 + $0x28] sm:$0xff] }
0x1ce1   :  { %3922 = vmatmul.msk.bf16.gmra.mxu0 %vm566_vm2, %v3267_v30  ;;  %v4602_v30 = vld [vmem:[%s7015_s2 + $0x78] sm:$0xff] }
0x1ce6   :  { %v3248_v11 = vpop.f32.mrf.mxu3 }
0x1cee   :  { %v3250_v42 = vpop.f32.mrf.mxu3 }
0x1cef   :  { %v3268_v37 = vpack.c.bf16 %v3250_v42, %v3248_v11  ;;  %v4603_v42 = vld [vmem:[%s7015_s2 + $0x68] sm:$0xff] }
0x1cf1   :  { %3923 = vmatmul.msk.bf16.gmra.mxu0 %vm566_vm2, %v3268_v37 }
0x1cf6   :  { %v3253_v4 = vpop.f32.mrf.mxu3 }
0x1cfe   :  { %v3255_v15 = vpop.f32.mrf.mxu3 }
0x1cff   :  { %v3269_v52 = vpack.c.bf16 %v3255_v15, %v3253_v4  ;;  %v4604_v4 = vld [vmem:[%s7015_s2 + $0x50] sm:$0xff] }
0x1d01   :  { %3924 = vmatmul.msk.bf16.gmra.mxu0 %vm566_vm2, %v3269_v52  ;;  %v4605_v52 = vld [vmem:[%s7015_s2 + $0x40] sm:$0xff] }
0x1d06   :  { %v3258_v58 = vpop.f32.mrf.mxu3 }
0x1d0e   :  { %v3260_v43 = vpop.f32.mrf.mxu3 }
0x1d0f   :  { %v3270_v5 = vpack.c.bf16 %v3260_v43, %v3258_v58  ;;  %v4606_v43 = vld [vmem:[%s7015_s2 + $0x48] sm:$0xff] }
0x1d11   :  { %3925 = vmatmul.msk.bf16.gmra.mxu0 %vm566_vm2, %v3270_v5 }
0x1d1e   :  { %v3307_v40 = vpop.f32.mrf.mxu0 }
0x1d26   :  { %v6820_v33 = vpop.f32.mrf.mxu0 }
0x1d2e   :  { %v3312_v21 = vpop.f32.mrf.mxu0 }
0x1d36   :  { %v3314_v29 = vpop.f32.mrf.mxu0 }
0x1d3e   :  { %v3317_v48 = vpop.f32.mrf.mxu0 }
0x1d46   :  { %v3319_v61 = vpop.f32.mrf.mxu0 }
0x1d47   :  { %v6846_v32 = vadd.f32 %v4601_v57, %v3319_v61  ;;  %v4607_v61 = vld [vmem:[%s7015_s2 + $0x38] sm:$0xff] }
0x1d4e   :  { %v3322_v34 = vpop.f32.mrf.mxu0 }
0x1d4f   :  { %v6837_v6 = vadd.f32 %v4599_v53, %v3322_v34 }
0x1d56   :  { %v3324_v56 = vpop.f32.mrf.mxu0 }
0x1d57   :  { %v3325_v34 = vadd.f32 %v4607_v61, %v3324_v56  ;;  %v4610_v56 = vld [vmem:[%s7015_s2 + $0x18] sm:$0xff] }
0x1d5e   :  { %v3327_v8 = vpop.f32.mrf.mxu0 }
0x1d5f   :  { %v3328_v58 = vadd.f32 %v4605_v52, %v3327_v8  ;;  %v4609_v8 = vld [vmem:[%s7015_s2 + $0x10] sm:$0xff] }
0x1d66   :  { %v3329_v60 = vpop.f32.mrf.mxu0 }
0x1d67   :  { %v3330_v5 = vadd.f32 %v4606_v43, %v3329_v60  ;;  %v6882_v60 = vadd.f32 %v4610_v56, %v3314_v29 }
0x1d6e   :  { %v3332_v54 = vpop.f32.mrf.mxu0 }
0x1d6f   :  { %v3333_v15 = vadd.f32 %v4604_v4, %v3332_v54  ;;  %v4608_v54 = vld [vmem:[%s7015_s2 + $0x20] sm:$0xff] }
0x1d76   :  { %v3334_v55 = vpop.f32.mrf.mxu0 }
0x1d77   :  { %v6831_v28 = vadd.f32 %v4598_v39, %v3334_v55  ;;  %v6870_v55 = vadd.f32 %v4608_v54, %v3317_v48  ;;  %v4611_v48 = vld [vmem:[%s7015_s2] sm:$0xff] }
0x1d7e   :  { %v3337_v50 = vpop.f32.mrf.mxu0 }
0x1d7f   :  { %v6825_v3 = vadd.f32 %v4597_v10, %v3337_v50  ;;  %v6875_v50 = vadd.f32 %v4609_v8, %v3312_v21  ;;  %v6888_v10 = vadd.f32 %v4611_v48, %v3307_v40 }
0x1d81   :  { %3371 = vmax.xlane.f32.xlu0 %v6825_v3 }
0x1d86   :  { %v3339_v7 = vpop.f32.mrf.mxu0 }
0x1d87   :  { %v3340_v37 = vadd.f32 %v4603_v42, %v3339_v7 }
0x1d89   :  { %3369 = vmax.xlane.f32.xlu0 %v6831_v28 }
0x1d8e   :  { %v3342_v22 = vpop.f32.mrf.mxu0 }
0x1d8f   :  { %v3343_v9 = vadd.f32 %v4600_v2, %v3342_v22 }
0x1d91   :  { %3359 = vmax.xlane.f32.xlu0 %v6837_v6  ;;  %3375 = vmax.xlane.f32.xlu1 %v3343_v9 }
0x1d96   :  { %v3344_v17 = vpop.f32.mrf.mxu0 }
0x1d97   :  { %v3345_v11 = vadd.f32 %v4602_v30, %v3344_v17 }
0x1d99   :  { %3357 = vmax.xlane.f32.xlu0 %v6846_v32  ;;  %3377 = vmax.xlane.f32.xlu2 %v3345_v11 }
0x1d9a   :  { %3373 = vmax.xlane.f32.xlu1 %v3340_v37 }
0x1da1   :  { %3367 = vmax.xlane.f32.xlu2 %v3333_v15 }
0x1da2   :  { %3363 = vmax.xlane.f32.xlu1 %v3328_v58 }
0x1da9   :  { %3365 = vmax.xlane.f32.xlu2 %v3330_v5 }
0x1daa   :  { %3361 = vmax.xlane.f32.xlu1 %v3325_v34 }
0x1db1   :  { %3355 = vmax.xlane.f32.xlu2 %v6870_v55 }
0x1db2   :  { %3351 = vmax.xlane.f32.xlu1 %v6875_v50 }
0x1db9   :  { %3353 = vmax.xlane.f32.xlu2 %v6882_v60 }
0x1dc1   :  { %3347 = vmax.xlane.f32.xlu2 %v6888_v10 }
0x1df4   :  { %v3372_v22 = vpop.xlane.xlu0 %3371 }
0x1df5   :  { %v3391_v42 = vsub.f32 %v6825_v3, %v3372_v22 }
0x1df7   :  { %v3419_v52 = vmul.f32 1.442695, %v3391_v42 }
0x1dfc   :  { %v3370_v40 = vpop.xlane.xlu0 %3369 }
0x1dfd   :  { %v3390_v56 = vsub.f32 %v6831_v28, %v3370_v40 }
0x1e04   :  { %v3376_v21 = vpop.xlane.xlu1 %3375 }
0x1e05   :  { %v3393_v7 = vsub.f32 %v3343_v9, %v3376_v21 }
0x1e07   :  { %v3423_v39 = vmul.f32 1.442695, %v3393_v7 }
0x1e09   :  { %4311 = vpow2.f32 %v3423_v39 }
0x1e0c   :  { %v3378_v53 = vpop.xlane.xlu2 %3377 }
0x1e0d   :  { %v3394_v2 = vsub.f32 %v3345_v11, %v3378_v53  ;;  %v3374_v17 = vpop.xlane.xlu1 %3373  ;;  %v4612_v11 = vld [vmem:[%s7015_s2 + $0x8] sm:$0xff]  ;;  %s4895_s2 = smov [#allocation17]  }
0x1e0e   :  { %v3392_v29 = vsub.f32 %v3340_v37, %v3374_v17  ;;  %v6899_v37 = vadd.f32 %v4612_v11, %v6820_v33  ;;  %s3667_s10 = sshll.u32 %s4895_s2, 4  ;;  %s3668_s10 = int_to_ptr.vmem [resolvable:$true] %s3667_s10 }
0x1e0f   :  { %v3425_v57 = vmul.f32 1.442695, %v3394_v2  ;;  %v6891_v30 = vpop.eup %4311 }
0x1e10   :  { %v3421_v4 = vmul.f32 1.442695, %v3392_v29  ;;  %3455 = vadd.xlane.f32.xlu0 %v6891_v30 }
0x1e11   :  { %4313 = vpow2.f32 %v3425_v57 }
0x1e12   :  { %4315 = vpow2.f32 %v3421_v4 }
0x1e13   :  { %4317 = vpow2.f32 %v3419_v52 }
0x1e14   :  { %v3368_v9 = vpop.xlane.xlu2 %3367 }
0x1e15   :  { %v3389_v43 = vsub.f32 %v3333_v15, %v3368_v9  ;;  %v3364_v61 = vpop.xlane.xlu1 %3363  ;;  %v3417_v15 = vmul.f32 1.442695, %v3390_v56 }
0x1e16   :  { %v3387_v54 = vsub.f32 %v3328_v58, %v3364_v61  ;;  %v3360_v58 = vpop.xlane.xlu0 %3359 }
0x1e17   :  { %v3415_v8 = vmul.f32 1.442695, %v3389_v43  ;;  %v6901_v3 = vpop.eup %4313  ;;  %v3385_v29 = vsub.f32 %v6837_v6, %v3360_v58 }
0x1e18   :  { %v3411_v48 = vmul.f32 1.442695, %v3387_v54  ;;  %v6904_v21 = vpop.eup %4315  ;;  %3457 = vadd.xlane.f32.xlu1 %v6901_v3  ;;  %3349 = vmax.xlane.f32.xlu0 %v6899_v37 }
0x1e19   :  { %4319 = vpow2.f32 %v3415_v8  ;;  %3453 = vadd.xlane.f32.xlu2 %v6904_v21  ;;  %v6909_v22 = vpop.eup %4317 }
0x1e1a   :  { %4321 = vpow2.f32 %v3411_v48 }
0x1e1b   :  { %4323 = vpow2.f32 %v3417_v15 }
0x1e1c   :  { %v3366_v33 = vpop.xlane.xlu2 %3365 }
0x1e1d   :  { %v3388_v7 = vsub.f32 %v3330_v5, %v3366_v33  ;;  %v3362_v39 = vpop.xlane.xlu1 %3361  ;;  %v3407_v5 = vmul.f32 1.442695, %v3385_v29 }
0x1e1e   :  { %v3386_v53 = vsub.f32 %v3325_v34, %v3362_v39  ;;  %v3358_v6 = vpop.xlane.xlu0 %3357 }
0x1e1f   :  { %v6911_v28 = vpop.eup %4319  ;;  %v3413_v2 = vmul.f32 1.442695, %v3388_v7 }
0x1e20   :  { %v6913_v17 = vpop.eup %4321  ;;  %v3409_v57 = vmul.f32 1.442695, %v3386_v53  ;;  %3451 = vadd.xlane.f32.xlu1 %v6909_v22  ;;  %3447 = vadd.xlane.f32.xlu0 %v6911_v28 }
0x1e21   :  { %4325 = vpow2.f32 %v3413_v2  ;;  %3443 = vadd.xlane.f32.xlu2 %v6913_v17  ;;  %v6920_v40 = vpop.eup %4323 }
0x1e22   :  { %4327 = vpow2.f32 %v3409_v57 }
0x1e23   :  { %4329 = vpow2.f32 %v3407_v5 }
0x1e24   :  { %v3356_v42 = vpop.xlane.xlu2 %3355 }
0x1e25   :  { %v3383_v34 = vsub.f32 %v6870_v55, %v3356_v42  ;;  %v3352_v4 = vpop.xlane.xlu1 %3351  ;;  %v3384_v55 = vsub.f32 %v6846_v32, %v3358_v6 }
0x1e26   :  { %v3381_v52 = vsub.f32 %v6875_v50, %v3352_v4 }
0x1e27   :  { %v6923_v9 = vpop.eup %4325  ;;  %v3403_v43 = vmul.f32 1.442695, %v3383_v34  ;;  %v3405_v56 = vmul.f32 1.442695, %v3384_v55 }
0x1e28   :  { %v6925_v61 = vpop.eup %4327  ;;  %v3399_v54 = vmul.f32 1.442695, %v3381_v52  ;;  %3449 = vadd.xlane.f32.xlu1 %v6920_v40  ;;  %3445 = vadd.xlane.f32.xlu0 %v6923_v9 }
0x1e29   :  { %4331 = vpow2.f32 %v3403_v43  ;;  %3441 = vadd.xlane.f32.xlu2 %v6925_v61  ;;  %v6932_v8 = vpop.eup %4329 }
0x1e2a   :  { %4333 = vpow2.f32 %v3399_v54 }
0x1e2c   :  { %v3354_v11 = vpop.xlane.xlu2 %3353 }
0x1e2d   :  { %v3382_v50 = vsub.f32 %v6882_v60, %v3354_v11 }
0x1e2f   :  { %v6934_v48 = vpop.eup %4331  ;;  %v3401_v15 = vmul.f32 1.442695, %v3382_v50 }
0x1e30   :  { %v6936_v33 = vpop.eup %4333  ;;  %3439 = vadd.xlane.f32.xlu1 %v6932_v8  ;;  %3435 = vadd.xlane.f32.xlu0 %v6934_v48 }
0x1e31   :  { %4335 = vpow2.f32 %v3401_v15  ;;  %3431 = vadd.xlane.f32.xlu2 %v6936_v33 }
0x1e32   :  { %4337 = vpow2.f32 %v3405_v56 }
0x1e34   :  { %v3348_v32 = vpop.xlane.xlu2 %3347 }
0x1e35   :  { %v3379_v58 = vsub.f32 %v6888_v10, %v3348_v32 }
0x1e37   :  { %v6942_v60 = vpop.eup %4335  ;;  %v3395_v7 = vmul.f32 1.442695, %v3379_v58 }
0x1e38   :  { %v6944_v39 = vpop.eup %4337  ;;  %3433 = vadd.xlane.f32.xlu0 %v6942_v60 }
0x1e39   :  { %4339 = vpow2.f32 %v3395_v7  ;;  %3437 = vadd.xlane.f32.xlu1 %v6944_v39 }
0x1e3f   :  { %v6948_v53 = vpop.eup %4339 }
0x1e41   :  { %3427 = vadd.xlane.f32.xlu1 %v6948_v53 }
0x1e83   :  { %v3456_v2 = vpop.xlane.xlu0 %3455 }
0x1e84   :  { %4341 = vrcp.f32 %v3456_v2 }
0x1e8a   :  { %v4342_v42 = vpop.eup %4341 }
0x1e8b   :  { %v3350_v29 = vpop.xlane.xlu0 %3349  ;;  %v3458_v57 = vpop.xlane.xlu1 %3457  ;;  %v3489_v52 = vmul.f32 %v4342_v42, %v6891_v30 }
0x1e8c   :  { %v3380_v10 = vsub.f32 %v6899_v37, %v3350_v29  ;;  %4343 = vrcp.f32 %v3458_v57  ;;  %v3454_v34 = vpop.xlane.xlu2 %3453 }
0x1e8e   :  { %v3397_v5 = vmul.f32 1.442695, %v3380_v10 }
0x1e90   :  { %4345 = vpow2.f32 %v3397_v5 }
0x1e91   :  { %4347 = vrcp.f32 %v3454_v34 }
0x1e92   :  { %v4344_v4 = vpop.eup %4343 }
0x1e93   :  { %v3490_v6 = vmul.f32 %v4344_v4, %v6901_v3  ;;  %v3452_v43 = vpop.xlane.xlu1 %3451  ;;  %v3448_v54 = vpop.xlane.xlu0 %3447 }
0x1e94   :  { %4349 = vrcp.f32 %v3452_v43  ;;  %v3444_v3 = vpop.xlane.xlu2 %3443 }
0x1e95   :  { %v3498_v55 = vpack.c.bf16 %v3490_v6, %v3489_v52  ;;  %4351 = vrcp.f32 %v3448_v54 }
0x1e96   :  { %v6954_v11 = vpop.eup %4345 }
0x1e97   :  { %3429 = vadd.xlane.f32.xlu2 %v6954_v11  ;;  %3499 = vmatpush.bf16.xpose.msra.mxu2 %v3498_v55  ;;  %v4348_v37 = vpop.eup %4347 }
0x1e98   :  { %v3488_v30 = vmul.f32 %v4348_v37, %v6904_v21 }
0x1e9a   :  { %v4350_v56 = vpop.eup %4349 }
0x1e9b   :  { %v3450_v50 = vpop.xlane.xlu1 %3449  ;;  %v3487_v15 = vmul.f32 %v4350_v56, %v6909_v22  ;;  %v3446_v32 = vpop.xlane.xlu0 %3445 }
0x1e9c   :  { %4353 = vrcp.f32 %v3450_v50  ;;  %v4352_v7 = vpop.eup %4351  ;;  %v3442_v34 = vpop.xlane.xlu2 %3441 }
0x1e9d   :  { %v3497_v58 = vpack.c.bf16 %v3488_v30, %v3487_v15  ;;  %4355 = vrcp.f32 %v3446_v32  ;;  %v3485_v57 = vmul.f32 %v4352_v7, %v6911_v28 }
0x1e9e   :  { %4357 = vrcp.f32 %v3444_v3 }
0x1e9f   :  { %3500 = vmatpush.bf16.xpose.msra.mxu2 %v3497_v58 }
0x1ea2   :  { %v4354_v2 = vpop.eup %4353 }
0x1ea3   :  { %v3440_v29 = vpop.xlane.xlu1 %3439  ;;  %v3486_v10 = vmul.f32 %v4354_v2, %v6920_v40  ;;  %v4356_v42 = vpop.eup %4355 }
0x1ea4   :  { %v4358_v22 = vpop.eup %4357  ;;  %4359 = vrcp.f32 %v3440_v29  ;;  %v3484_v21 = vmul.f32 %v4356_v42, %v6923_v9  ;;  %v3436_v4 = vpop.xlane.xlu0 %3435 }
0x1ea5   :  { %v3496_v5 = vpack.c.bf16 %v3486_v10, %v3485_v57  ;;  %4361 = vrcp.f32 %v3442_v34  ;;  %v3483_v52 = vmul.f32 %v4358_v22, %v6913_v17  ;;  %v3432_v15 = vpop.xlane.xlu2 %3431  ;;  %v3183_v2 = vpop.f32.mrf.mxu1 }
0x1ea7   :  { %3501 = vmatpush.bf16.xpose.msra.mxu2 %v3496_v5  ;;  %v3495_v43 = vpack.c.bf16 %v3484_v21, %v3483_v52 }
0x1eaa   :  { %v4360_v54 = vpop.eup %4359 }
0x1eab   :  { %v4362_v55 = vpop.eup %4361  ;;  %v3481_v28 = vmul.f32 %v4360_v54, %v6932_v8 }
0x1eac   :  { %v3438_v6 = vpop.xlane.xlu1 %3437  ;;  %v3482_v40 = vmul.f32 %v4362_v55, %v6925_v61  ;;  %v3434_v37 = vpop.xlane.xlu0 %3433 }
0x1ead   :  { %4363 = vrcp.f32 %v3438_v6  ;;  %v3185_v29 = vpop.f32.mrf.mxu1  ;;  %v4614_v6 = vld [vmem:[#allocation7 + $0x78] sm:$0xff] }
0x1eae   :  { %4365 = vrcp.f32 %v3436_v4  ;;  %v3494_v50 = vpack.c.bf16 %v3482_v40, %v3481_v28  ;;  %v4615_v40 = vld [vmem:[#allocation7 + $0x80] sm:$0xff] }
0x1eaf   :  { %3502 = vmatpush.bf16.xpose.msra.mxu2 %v3495_v43  ;;  %4367 = vrcp.f32 %v3434_v37  ;;  %v3186_v43 = vadd.f32 %v4614_v6, %v3185_v29 }
0x1eb0   :  { %4369 = vrcp.f32 %v3432_v15 }
0x1eb3   :  { %v4364_v56 = vpop.eup %4363 }
0x1eb4   :  { %v4366_v9 = vpop.eup %4365  ;;  %v3480_v17 = vmul.f32 %v4364_v56, %v6944_v39  ;;  %v3428_v5 = vpop.xlane.xlu1 %3427 }
0x1eb5   :  { %v3479_v30 = vmul.f32 %v4366_v9, %v6934_v48  ;;  %v4368_v32 = vpop.eup %4367  ;;  %v3188_v57 = vpop.f32.mrf.mxu1  ;;  %4371 = vrcp.f32 %v3428_v5 }
0x1eb6   :  { %v4370_v58 = vpop.eup %4369  ;;  %v3478_v8 = vmul.f32 %v4368_v32, %v6942_v60  ;;  %v3189_v37 = vadd.f32 %v4615_v40, %v3188_v57 }
0x1eb7   :  { %3503 = vmatpush.bf16.xpose.msra.mxu2 %v3494_v50  ;;  %v3493_v3 = vpack.c.bf16 %v3480_v17, %v3479_v30  ;;  %v3477_v61 = vmul.f32 %v4370_v58, %v6936_v33  ;;  %v4613_v33 = vld [vmem:[#allocation7 + $0x70] sm:$0xff]  ;;  %v4616_v50 = vld [vmem:[#allocation7 + $0x88] sm:$0xff] }
0x1eb8   :  { %v3184_v52 = vadd.f32 %v4613_v33, %v3183_v2 }
0x1eb9   :  { %v3492_v7 = vpack.c.bf16 %v3478_v8, %v3477_v61 }
0x1eba   :  { %v3210_v54 = vpack.c.bf16 %v3186_v43, %v3184_v52 }
0x1ebb   :  { %v4372_v48 = vpop.eup %4371 }
0x1ebc   :  { %v3475_v22 = vmul.f32 %v4372_v48, %v6948_v53  ;;  %v4617_v53 = vld [vmem:[#allocation7 + $0x90] sm:$0xff] }
0x1ebd   :  { %v3190_v10 = vpop.f32.mrf.mxu1 }
0x1ebe   :  { %v3191_v56 = vadd.f32 %v4616_v50, %v3190_v10 }
0x1ebf   :  { %3504 = vmatpush.bf16.xpose.msra.mxu2 %v3493_v3  ;;  %v4619_v3 = vld [vmem:[#allocation7 + $0xa0] sm:$0xff] }
0x1ec0   :  { %v3211_v15 = vpack.c.bf16 %v3191_v56, %v3189_v37  ;;  %v4624_v37 = vld [vmem:[#allocation10 + $0x18] sm:$0xff]  ;;  %v4625_v56 = vld [vmem:[#allocation10 + $0x28] sm:$0xff] }
0x1ec5   :  { %v3193_v42 = vpop.f32.mrf.mxu1 }
0x1ec6   :  { %v3194_v9 = vadd.f32 %v4617_v53, %v3193_v42  ;;  %v4626_v53 = vld [vmem:[#allocation10 + $0x10] sm:$0xff] }
0x1ec7   :  { %3505 = vmatpush.bf16.xpose.msra.mxu2 %v3492_v7 }
0x1ecd   :  { %v3195_v4 = vpop.f32.mrf.mxu1 }
0x1ed5   :  { %v3198_v55 = vpop.f32.mrf.mxu1 }
0x1ed6   :  { %v3199_v32 = vadd.f32 %v4619_v3, %v3198_v55  ;;  %v4623_v55 = vld [vmem:[#allocation10 + $0x20] sm:$0xff] }
0x1ed8   :  { %v3213_v58 = vpack.c.bf16 %v3199_v32, %v3199_v32 }
0x1edd   :  { %v3200_v28 = vpop.f32.mrf.mxu1 }
0x1f0a   :  { %v3430_v39 = vpop.xlane.xlu2 %3429 }
0x1f0b   :  { %4373 = vrcp.f32 %v3430_v39 }
0x1f11   :  { %v4374_v34 = vpop.eup %4373 }
0x1f12   :  { %v3476_v21 = vmul.f32 %v4374_v34, %v6954_v11  ;;  %v4618_v11 = vld [vmem:[#allocation7 + $0x98] sm:$0xff] }
0x1f13   :  { %v3196_v17 = vadd.f32 %v4618_v11, %v3195_v4  ;;  %v4622_v4 = vld [vmem:[#allocation8 + $0x10] sm:$0xff] }
0x1f14   :  { %v3491_v60 = vpack.c.bf16 %v3476_v21, %v3475_v22  ;;  %v4620_v21 = vld [vmem:[#allocation8] sm:$0xff] }
0x1f15   :  { %v3212_v30 = vpack.c.bf16 %v3196_v17, %v3194_v9 }
0x1f16   :  { %3506 = vmatpush.bf16.xpose.msra.mxu2 %v3491_v60  ;;  %v4621_v60 = vld [vmem:[#allocation8 + $0x8] sm:$0xff] }
0x1f1d   :  { %3507 = vmatmul.bf16.vlgmr.msra.gmra.mxu2 %v3210_v54 }
0x1f2d   :  { %3512 = vmatmul.bf16.gmra.mxu2 %v3211_v15 }
0x1f3d   :  { %3517 = vmatmul.bf16.gmra.mxu2 %v3212_v30  ;;  %v4627_v30 = vld [vmem:[#allocation10 + $0x8] sm:$0xff] }
0x1f4d   :  { %3522 = vmatmul.bf16.gmra.mxu2 %v3213_v58 }
0x1fa0   :  { %v3508_v8 = vpop.f32.mrf.mxu2 }
0x1fa8   :  { %v3510_v61 = vpop.f32.mrf.mxu2 }
0x1fa9   :  { %v3527_v22 = vpack.c.bf16 %v3510_v61, %v3508_v8  ;;  %v4628_v8 = vld [vmem:[#allocation10] sm:$0xff] }
0x1fb0   :  { %v3513_v7 = vpop.f32.mrf.mxu2 }
0x1fb8   :  { %v3515_v2 = vpop.f32.mrf.mxu2 }
0x1fb9   :  { %v3528_v34 = vpack.c.bf16 %v3515_v2, %v3513_v7 }
0x1fc0   :  { %v3518_v29 = vpop.f32.mrf.mxu2 }
0x1fc8   :  { %v3520_v57 = vpop.f32.mrf.mxu2 }
0x1fc9   :  { %v3529_v42 = vpack.c.bf16 %v3520_v57, %v3518_v29 }
0x1fd0   :  { %v3523_v5 = vpop.f32.mrf.mxu2 }
0x1fd1   :  { %v3530_v10 = vpack.c.bf16 %v3523_v5, %v3523_v5 }
0x1fd3   :  { %v3532_v39 = vsel %vm591_vm1, %v3530_v10, 0 }
0x1fd4   :  { %3538 = vmatpush.bf16.msrb.mxu2 %v3532_v39 }
0x1fd8   :  { %v3525_v48 = vpop.f32.mrf.mxu2  ;;  %3539 = vmatpush.bf16.msrb.mxu2 %v3529_v42 }
0x1fdc   :  { %3540 = vmatpush.bf16.msrb.mxu2 %v3528_v34 }
0x1fe0   :  { %3541 = vmatpush.bf16.msrb.mxu2 %v3527_v22 }
0x1fe3   :  { %3926 = vmatmul.msk.bf16.vlgmr.msrb.gmra.mxu2 %vm566_vm2, %v4620_v21 }
0x1ff3   :  { %3927 = vmatmul.msk.bf16.gmra.mxu2 %vm566_vm2, %v4621_v60 }
0x2003   :  { %3928 = vmatmul.msk.bf16.gmra.mxu2 %vm566_vm2, %v4622_v4 }
0x2066   :  { %v3543_v33 = vpop.f32.mrf.mxu2 }
0x2067   :  { %v3544_v61 = vadd.f32 %v4628_v8, %v3543_v33 }
0x2069   :  { %v3558_v57 = vadd.f32 %v3544_v61, %v6753_v31 }
0x206e   :  { %v3545_v52 = vpop.f32.mrf.mxu2 }
0x206f   :  { %v3546_v3 = vadd.f32 %v4627_v30, %v3545_v52 }
0x2071   :  { %v3559_v2 = vadd.f32 %v3546_v3, %v6759_v14 }
0x2073   :  { %v3564_v5 = vpack.c.bf16 %v3559_v2, %v3558_v57 }
0x2076   :  { %v3548_v6 = vpop.f32.mrf.mxu2 }
0x2077   :  { %v3549_v9 = vadd.f32 %v4626_v53, %v3548_v6 }
0x2079   :  { %v3560_v7 = vadd.f32 %v3549_v9, %v6740_v49 }
0x207e   :  { %v3550_v43 = vpop.f32.mrf.mxu2 }
0x207f   :  { %v3551_v50 = vadd.f32 %v4624_v37, %v3550_v43 }
0x2081   :  { %v3561_v32 = vadd.f32 %v3551_v50, %v6745_v44 }
0x2083   :  { %v3565_v29 = vpack.c.bf16 %v3561_v32, %v3560_v7 }
0x2086   :  { %v3553_v54 = vpop.f32.mrf.mxu2 }
0x2087   :  { %v3554_v28 = vadd.f32 %v4623_v55, %v3553_v54 }
0x2089   :  { %v3562_v11 = vadd.f32 %v3554_v28, %v6735_v51 }
0x208e   :  { %v3555_v40 = vpop.f32.mrf.mxu2 }
0x208f   :  { %v3556_v15 = vadd.f32 %v4625_v56, %v3555_v40 }
0x2091   :  { %v3563_v17 = vadd.f32 %v3556_v15, %v6730_v12 }
0x2093   :  { %v3566_v58 = vpack.c.bf16 %v3563_v17, %v3562_v11 }
0x2095   :  { %3572 = vmatpush.bf16.msrb.mxu3 %v3566_v58 }
0x2099   :  { %3573 = vmatpush.bf16.msrb.mxu3 %v3565_v29 }
0x209d   :  { %3574 = vmatpush.bf16.msrb.mxu3 %v3564_v5 }
0x20a0   :  { %3929 = vmatmul.msk.bf16.vlgmr.msrb.gmra.mxu3 %vm352_vm0, %v6677_v38 }
0x20b0   :  { %3930 = vmatmul.msk.bf16.gmra.mxu3 %vm352_vm0, %v6681_v1 }
0x20c0   :  { %3931 = vmatmul.msk.bf16.gmra.mxu3 %vm352_vm0, %v6685_v0 }
0x2123   :  { %v3576_v12 = vpop.f32.mrf.mxu3 }
0x2124   :  { %v3577_v31 = vadd.f32 %v6692_v36, %v3576_v12 }
0x212b   :  { %v3578_v51 = vpop.f32.mrf.mxu3 }
0x212c   :  { %v3579_v14 = vadd.f32 %v6689_v27, %v3578_v51 }
0x212e   :  { %v3591_v42 = vadd.f32 %v3579_v14, %v3577_v31 }
0x2133   :  { %v3581_v49 = vpop.f32.mrf.mxu3 }
0x2134   :  { %v3582_v39 = vadd.f32 %v6695_v25, %v3581_v49 }
0x2136   :  { %v3592_v48 = vadd.f32 %v3591_v42, %v3582_v39 }
0x213b   :  { %v3583_v44 = vpop.f32.mrf.mxu3 }
0x213c   :  { %v3584_v38 = vadd.f32 %v6698_v46, %v3583_v44 }
0x213e   :  { %v3593_v34 = vadd.f32 %v3592_v48, %v3584_v38 }
0x2143   :  { %v3586_v10 = vpop.f32.mrf.mxu3 }
0x2144   :  { %v3587_v1 = vadd.f32 %v6701_v62, %v3586_v10 }
0x2146   :  { %v3594_v0 = vadd.f32 %v3593_v34, %v3587_v1 }
0x214b   :  { %v3588_v22 = vpop.f32.mrf.mxu3 }
0x214c   :  { %v3589_v21 = vadd.f32 %v6704_v24, %v3588_v22 }
0x214e   :  { %v3595_v60 = vadd.f32 %v3594_v0, %v3589_v21 }
0x2150   :  { %v3596_v4 = vrot.slane %v3595_v60, 4 }
0x2152   :  { %v3597_v33 = vadd.f32 %v3596_v4, %v3595_v60 }
0x2154   :  { %v3598_v27 = vrot.slane %v3597_v33, 2 }
0x2156   :  { %v3599_v52 = vadd.f32 %v3598_v27, %v3597_v33 }
0x2158   :  { %v3600_v6 = vrot.slane %v3599_v52, 1 }
0x215a   :  { %v3601_v36 = vadd.f32 %v3600_v6, %v3599_v52 }
0x215c   :  { %v3602_v25 = vmul.f32 %v3601_v36, %v5616_v19 }
0x215e   :  { %v3603_v43 = vsub.f32 %v3577_v31, %v3602_v25  ;;  %v3604_v54 = vsub.f32 %v3579_v14, %v3602_v25  ;;  %v3605_v46 = vsub.f32 %v3582_v39, %v3602_v25  ;;  %v3606_v55 = vsub.f32 %v3584_v38, %v3602_v25 }
0x215f   :  { %v3607_v40 = vsub.f32 %v3587_v1, %v3602_v25  ;;  %v3608_v56 = vsub.f32 %v3589_v21, %v3602_v25 }
0x2160   :  { %v3609_v28 = vmul.f32 %v3603_v43, %v3603_v43  ;;  %v3610_v62 = vmul.f32 %v3604_v54, %v3604_v54  ;;  %v3611_v37 = vmul.f32 %v3605_v46, %v3605_v46  ;;  %v3612_v24 = vmul.f32 %v3606_v55, %v3606_v55 }
0x2161   :  { %v3613_v53 = vmul.f32 %v3607_v40, %v3607_v40  ;;  %v3614_v11 = vmul.f32 %v3608_v56, %v3608_v56 }
0x2162   :  { %v3615_v50 = vadd.f32 %v3610_v62, %v3609_v28 }
0x2164   :  { %v3616_v15 = vadd.f32 %v3615_v50, %v3611_v37 }
0x2166   :  { %v3617_v9 = vadd.f32 %v3616_v15, %v3612_v24 }
0x2168   :  { %v3618_v17 = vadd.f32 %v3617_v9, %v3613_v53 }
0x216a   :  { %v3619_v30 = vadd.f32 %v3618_v17, %v3614_v11 }
0x216c   :  { %v3620_v3 = vrot.slane %v3619_v30, 4 }
0x216e   :  { %v3621_v32 = vadd.f32 %v3620_v3, %v3619_v30 }
0x2170   :  { %v3622_v58 = vrot.slane %v3621_v32, 2 }
0x2172   :  { %v3623_v8 = vadd.f32 %v3622_v58, %v3621_v32 }
0x2174   :  { %v3624_v61 = vrot.slane %v3623_v8, 1 }
0x2176   :  { %v3625_v7 = vadd.f32 %v3624_v61, %v3623_v8 }
0x2178   :  { %v3626_v2 = vmul.f32 %v3625_v7, %v5616_v19 }
0x217a   :  { %v3627_v29 = vadd.f32 1e-05, %v3626_v2 }
0x217c   :  { %4375 = vrsqrt.f32 %v3627_v29  ;;  %vm3634_vm1 = vweird.f32 %v3627_v29 }
0x2182   :  { %v4376_v57 = vpop.eup %4375 }
0x2183   :  { %v3629_v5 = vmul.f32 %v4376_v57, %v3627_v29  ;;  %vm3635_vm0 = vweird.f32 %v4376_v57 }
0x2184   :  { %vm3636_vm2 = vmor %vm3634_vm1, %vm3635_vm0 }
0x2185   :  { %v3630_v12 = vmul.f32 %v4376_v57, %v3629_v5 }
0x2187   :  { %v3631_v51 = vmul.f32 0.5, %v3630_v12 }
0x2189   :  { %v3632_v49 = vsub.f32 1.5, %v3631_v51 }
0x218b   :  { %v3633_v44 = vmul.f32 %v4376_v57, %v3632_v49 }
0x218d   :  { %v3637_v14 = vsel %vm3636_vm2, %v4376_v57, %v3633_v44 }
0x218e   :  { %v3638_v10 = vmul.f32 %v3637_v14, %v3603_v43  ;;  %v3639_v31 = vmul.f32 %v3637_v14, %v3604_v54  ;;  %v3640_v39 = vmul.f32 %v3637_v14, %v3605_v46  ;;  %v3641_v42 = vmul.f32 %v3637_v14, %v3606_v55 }
0x218f   :  { %v3642_v38 = vmul.f32 %v3637_v14, %v3607_v40  ;;  %v3643_v48 = vmul.f32 %v3637_v14, %v3608_v56 }
0x2190   :  { %v3644_v19 = vmul.f32 %v6721_v41, %v3638_v10  ;;  %v3645_v1 = vmul.f32 %v6724_v26, %v3639_v31  ;;  %v3646_v34 = vmul.f32 %v6715_v63, %v3640_v39  ;;  %v3647_v22 = vmul.f32 %v6718_v23, %v3641_v42 }
0x2191   :  { %v3648_v0 = vmul.f32 %v6712_v20, %v3642_v38  ;;  %v3649_v21 = vmul.f32 %v6709_v47, %v3643_v48 }
0x2192   :  { %v3650_v60 = vadd.f32 %v6750_v13, %v3644_v19  ;;  %v3651_v4 = vadd.f32 %v6756_v45, %v3645_v1  ;;  %v3652_v33 = vadd.f32 %v6737_v59, %v3646_v34  ;;  %v3653_v27 = vadd.f32 %v6742_v35, %v3647_v22 }
0x2193   :  { %v3654_v41 = vadd.f32 %v6732_v18, %v3648_v0  ;;  %v3655_v20 = vadd.f32 %v6727_v16, %v3649_v21 }
0x2194   :  { %3657 = vst [vmem:[#allocation17 + $0xf0] sm:$0xff] %v3650_v60 }
0x2195   :  { %3658 = vst [vmem:[#allocation17 + $0xf8] sm:$0xff] %v3651_v4 }
0x2196   :  { %3659 = vst [vmem:[#allocation17 + $0x100] sm:$0xff] %v3652_v33 }
0x2197   :  { %3660 = vst [vmem:[#allocation17 + $0x108] sm:$0xff] %v3653_v27 }
0x2198   :  { %3661 = vst [vmem:[#allocation17 + $0x110] sm:$0xff] %v3654_v41 }
0x2199   :  { %3662 = vst [vmem:[#allocation17 + $0x118] sm:$0xff] %v3655_v20 }
0x219a   :  { %3675 = dma.vmem_to_hbm [thread:$0]  %s3668_s10, 4608, %s3670_s20, [#allocation4], %s4887_s7, %s4887_s7, %s4888_s21  }
0x219b   :  { %4879 = dma.done.wait [#allocation4], 4608  }
0x219c   :  { %4880 = vsyncadd [#allocation4], 4294962688 }
0x219d   :  { %3680 = vsyncpa [#allocation3], 1 }
0x219e   :  { %3681 = vsyncpa [#allocation6], 1 }
0x219f   :  { %3682 = vsyncpa [#allocation9], 1 }
0x21a0   :  { %3683 = vsyncpa [#allocation12], 1 }
0x21a1   :  { %3684 = vsyncpa [#allocation15], 1 }
0x21a2   :  { %3685 = vsyncpa [#allocation4], 1 }

</bundles_post_ra>
